<compile_context>
chip_gen: v6e
topology: v6e:2x2x1
jax: 0.10.0
libtpu: 0.0.40
codegen_flags: <defaults>
</compile_context>

<pallas_src>
import functools

import numpy as np
import jax
import jax.numpy as jnp
from jax import lax
from jax.experimental import pallas as pl
from jax.experimental.pallas import tpu as pltpu


# ======================================================================================
# Encoder: conv1(3x3, C->64, pad 1, no bias) -> ReLU -> global-avg-pool -> Linear(64, D)
# ======================================================================================
def _encoder_kernel(x_ref, wband_ref, wfc_ref, bfc_ref, out_ref, *,
                    IMG_TILE, HP_PAD, H, W, COUT):
    # x_ref rows r = img_local * HP_PAD + h_pad ; lanes j = w_pad * C + c   (bf16)
    R = (IMG_TILE - 1) * HP_PAD + H        # last needed output row + 1 (multiple of 8)

    # 3x3 conv as 3 banded matmuls (one per kh tap), f32 accumulation on the MXU.
    acc = jnp.dot(x_ref[pl.ds(0, R), :], wband_ref[0],
                  preferred_element_type=jnp.float32)
    for kh in (1, 2):
        acc = acc + jnp.dot(x_ref[pl.ds(kh, R), :], wband_ref[kh],
                            preferred_element_type=jnp.float32)
    conv = jnp.maximum(acc, 0.0)           # ReLU, (R, W*COUT), lanes = (w_out, cout)

    # Global average pool.
    #  (1) per-image mean over the h rows via a tiny (IMG_TILE, R) selection matmul
    #      (replaces the old O(B^2*HW) pool matrix; also discards the padded junk rows).
    img = lax.broadcasted_iota(jnp.int32, (IMG_TILE, R), 0)
    row = lax.broadcasted_iota(jnp.int32, (IMG_TILE, R), 1)
    sel = jnp.where((row >= img * HP_PAD) & (row < img * HP_PAD + H),
                    1.0 / (H * W), 0.0)
    pooled_w = jnp.dot(sel, conv, preferred_element_type=jnp.float32)  # (IMG_TILE, W*COUT)
    #  (2) sum over the W lane groups -> (IMG_TILE, COUT)
    pooled = pooled_w[:, 0:COUT]
    for wi in range(1, W):
        pooled = pooled + pooled_w[:, wi * COUT:(wi + 1) * COUT]

    # FC head (bf16 operands, f32 accumulate), lane-dense (IMG_TILE, D) output block.
    out_ref[...] = (jnp.dot(pooled.astype(jnp.bfloat16), wfc_ref[...],
                            preferred_element_type=jnp.float32) + bfc_ref[...])


def _build_banded_conv_weight(w_oihw, W, Wp):
    """wband[kh][(w_out+kw)*C + c, w_out*COUT + o] = w_oihw[o, c, kh, kw]  (zero elsewhere)."""
    O, C, KH, KW = w_oihw.shape
    w_np = np.asarray(w_oihw, np.float32)
    wb = np.zeros((KH, Wp * C, W * O), np.float32)
    for kh in range(KH):
        for kw in range(KW):
            blk = w_np[:, :, kh, kw].T                       # (C, O)
            for wo in range(W):
                wb[kh, (wo + kw) * C:(wo + kw) * C + C, wo * O:(wo + 1) * O] = blk
    return jnp.asarray(wb, jnp.bfloat16)


def encoder_forward(x_nchw, w_oihw, wfc, bfc, *, img_tile=8):
    """x_nchw: [B2, 3, H, W] f32 (both views concatenated).  Returns [B2, mlp_dim] f32."""
    B2, C, H, W = x_nchw.shape
    COUT, D = wfc.shape
    assert w_oihw.shape[1:] == (C, 3, 3) and B2 % img_tile == 0
    Hp, Wp = H + 2, W + 2
    HP_PAD = ((Hp + 7) // 8) * 8

    # NHWC + conv padding (+1 each side) + sublane padding of the h axis; flatten to
    # rows = (image, padded_h) x lanes = (padded_w, c).  One ~1.7x padded copy instead of 9x im2col.
    x = jnp.transpose(x_nchw, (0, 2, 3, 1))
    x = jnp.pad(x, ((0, 0), (1, 1 + HP_PAD - Hp), (1, 1), (0, 0)))
    x2 = x.reshape(B2 * HP_PAD, Wp * C).astype(jnp.bfloat16)

    wband = _build_banded_conv_weight(w_oihw, W, Wp)         # (3, Wp*C, W*COUT) bf16
    wfc_b = wfc.astype(jnp.bfloat16)
    bfc_f = bfc.astype(jnp.float32)

    kern = functools.partial(_encoder_kernel, IMG_TILE=img_tile, HP_PAD=HP_PAD,
                             H=H, W=W, COUT=COUT)
    return pl.pallas_call(
        kern,
        out_shape=jax.ShapeDtypeStruct((B2, D), jnp.float32),
        grid=(B2 // img_tile,),
        in_specs=[
            pl.BlockSpec((img_tile * HP_PAD, Wp * C), lambda i: (i, 0)),   # image tile
            pl.BlockSpec((3, Wp * C, W * COUT), lambda i: (0, 0, 0)),      # banded conv weight
            pl.BlockSpec((COUT, D), lambda i: (0, 0)),                     # fc weight
            pl.BlockSpec((1, D), lambda i: (0, 0)),                        # fc bias
        ],
        out_specs=pl.BlockSpec((img_tile, D), lambda i: (i, 0)),
        compiler_params=pltpu.CompilerParams(
            dimension_semantics=("parallel",),          # 2-TC split on v7x; no-op on v5e/v6e
            vmem_limit_bytes=32 * 1024 * 1024,
        ),
    )(x2, wband, wfc_b, bfc_f)


# ======================================================================================
# Dynamic contrastive loss (SimCLR.dynamic_contrastive_loss), row-tiled over queries
# ======================================================================================
def _dcl_loss_kernel(gamma_ref, zq_ref, z_ref, u_ref, out_ref, *, B, T, TQ, OUT_LANES):
    inv_T = 1.0 / T
    inv_denom = 1.0 / (2.0 * (B - 1))

    # F.normalize(p=2, dim=1) via rsqrt (EUP), then bf16 operands for the MXU.
    zq = zq_ref[...]
    zf = z_ref[...]
    zq = zq * lax.rsqrt(jnp.sum(zq * zq, axis=1, keepdims=True) + 1e-24)
    zf = zf * lax.rsqrt(jnp.sum(zf * zf, axis=1, keepdims=True) + 1e-24)

    # One fused similarity matmul: rows of S = [aa ab ; ba bb] for this query tile.
    s = lax.dot_general(zq.astype(jnp.bfloat16), zf.astype(jnp.bfloat16),
                        (((1,), (1,)), ((), ())),
                        preferred_element_type=jnp.float32)              # (TQ, 2B)

    r = pl.program_id(0) * TQ + lax.broadcasted_iota(jnp.int32, (TQ, 2 * B), 0)
    c = lax.broadcasted_iota(jnp.int32, (TQ, 2 * B), 1)
    self_mask = c == r                               # aa/bb diagonal (-LARGE_NUM -> exp == 0)
    pos_mask = (c - r == B) | (r - c == B)           # positive-pair column (neg_mask == 0)

    # NOTE: no running-max subtraction (would change the u moving-average semantics); safe for
    # unit-norm features at T=1, matching the PyTorch reference.
    neg = jnp.where(self_mask | pos_mask, 0.0, jnp.exp(s * inv_T))
    sum_neg = jnp.sum(neg, axis=1, keepdims=True)                        # (TQ, 1)

    gamma = gamma_ref[...]                                               # (1, 1)
    u_rows = (1.0 - gamma) * u_ref[...] + gamma * sum_neg * inv_denom    # u1 (rows < B) / u2

    w = neg * pl.reciprocal(u_rows, approx=True)
    e = jnp.sum(w * s, axis=1, keepdims=True) * inv_denom                # (TQ, 1)
    pos_logit = jnp.sum(jnp.where(pos_mask, s, 0.0), axis=1, keepdims=True)
    row_loss = e - pos_logit                                             # = -(pos - e)

    # Lane-dense packed output: lane 0 = per-row u update, lane 1 = per-row loss.
    lane = lax.broadcasted_iota(jnp.int32, (TQ, OUT_LANES), 1)
    out_ref[...] = (jnp.where(lane == 0, u_rows, 0.0) +
                    jnp.where(lane == 1, row_loss, 0.0))


def dcl_loss(h1, h2, u_idx, gamma, *, T=1.0, tile_q=8):
    B, D = h1.shape
    assert (2 * B) % tile_q == 0
    OUT_LANES = 128
    z = jnp.concatenate([h1, h2], axis=0).astype(jnp.float32)            # (2B, D)
    u2b = jnp.concatenate([u_idx, u_idx], axis=0).astype(jnp.float32)    # u[index] for both halves
    gamma_arr = jnp.reshape(jnp.asarray(gamma, jnp.float32), (1, 1))

    kern = functools.partial(_dcl_loss_kernel, B=B, T=T, TQ=tile_q, OUT_LANES=OUT_LANES)
    slab = pl.pallas_call(
        kern,
        out_shape=jax.ShapeDtypeStruct((2 * B, OUT_LANES), jnp.float32),
        grid=(2 * B // tile_q,),
        in_specs=[
            pl.BlockSpec((1, 1), lambda i: (0, 0)),           # gamma
            pl.BlockSpec((tile_q, D), lambda i: (i, 0)),      # query-row tile of Z
            pl.BlockSpec((2 * B, D), lambda i: (0, 0)),       # full Z (keys), resident
            pl.BlockSpec((tile_q, 1), lambda i: (i, 0)),      # u[index], tiled to 2B rows
        ],
        out_specs=pl.BlockSpec((tile_q, OUT_LANES), lambda i: (i, 0)),
        compiler_params=pltpu.CompilerParams(
            dimension_semantics=("parallel",),
            vmem_limit_bytes=32 * 1024 * 1024,
        ),
    )(gamma_arr, z, z, u2b)

    u_rows = slab[:, 0:1]
    u_new = u_rows[:B] + u_rows[B:]                  # self.u[index] = u1 + u2
    loss = jnp.sum(slab[:, 1]) / B                   # mean_i(loss_a[i] + loss_b[i])
    return loss, u_new


# ======================================================================================
# Pure-JAX f32 references (sanity checks for the Pallas kernels)
# ======================================================================================
def _ref_encoder(x_nchw, w_oihw, wfc, bfc):
    conv = lax.conv_general_dilated(x_nchw, w_oihw, window_strides=(1, 1),
                                    padding=((1, 1), (1, 1)),
                                    dimension_numbers=('NCHW', 'OIHW', 'NCHW'))
    conv = jnp.maximum(conv, 0.0)
    return conv.mean(axis=(2, 3)) @ wfc + bfc


def _ref_dcl(h1, h2, u_idx, gamma, T=1.0, large_num=1.0e9):
    h1 = h1 / jnp.maximum(jnp.linalg.norm(h1, axis=1, keepdims=True), 1e-12)
    h2 = h2 / jnp.maximum(jnp.linalg.norm(h2, axis=1, keepdims=True), 1e-12)
    B = h1.shape[0]
    masks = jnp.eye(B, dtype=jnp.float32)
    labels = jnp.eye(B, 2 * B, dtype=jnp.float32)
    laa = h1 @ h1.T - masks * large_num
    lbb = h2 @ h2.T - masks * large_num
    lab = h1 @ h2.T
    lba = h2 @ h1.T
    l1 = jnp.concatenate([lab, laa], axis=1)
    l2 = jnp.concatenate([lba, lbb], axis=1)
    nm = 1.0 - labels
    n1 = jnp.exp(l1 / T) * nm
    n2 = jnp.exp(l2 / T) * nm
    den = 2.0 * (B - 1)
    u1 = (1 - gamma) * u_idx + gamma * n1.sum(1, keepdims=True) / den
    u2 = (1 - gamma) * u_idx + gamma * n2.sum(1, keepdims=True) / den
    e1 = ((n1 / u1) * l1).sum(1, keepdims=True) / den
    e2 = ((n2 / u2) * l2).sum(1, keepdims=True) / den
    la = -(labels * (l1 - e1)).sum(1)
    lb = -(labels * (l2 - e2)).sum(1)
    return (la + lb).mean(), u1 + u2


if __name__ == "__main__":
    key = jax.random.PRNGKey(0)
    B, C, H, W = 8, 3, 16, 16      # small cifar-like images (the cifar-head conv expects C=3)
    mlp_dim = 256                  # encoder output dim (num_classes=mlp_dim); lane-dense
    T = 1.0
    N = 64                         # size of the u moving-average buffer
    gamma = 0.99

    k1, k2, k3, k4, k5 = jax.random.split(key, 5)
    x1 = jax.random.normal(k1, (B, C, H, W), jnp.float32)
    x2 = jax.random.normal(k2, (B, C, H, W), jnp.float32)

    # conv1: Conv2d(3, 64, kernel_size=3, stride=1, padding=1, bias=False)   (PyTorch OIHW)
    w_oihw = jax.random.normal(k3, (64, C, 3, 3), jnp.float32) * 0.1
    # synthetic FC head standing in for the rest of the injected ResNet: Linear(64, mlp_dim)
    wfc = jax.random.normal(k4, (64, mlp_dim), jnp.float32) * 0.1
    bfc = jax.random.normal(k5, (1, mlp_dim), jnp.float32) * 0.01

    u = jnp.zeros((N, 1), jnp.float32)                 # self.u
    index = jnp.arange(B) % N
    u_idx = u[index]                                   # self.u[index] -> (B, 1)

    # ----- forward (loss_type='dcl'): one encoder call for both views, then the loss kernel -----
    h12 = encoder_forward(jnp.concatenate([x1, x2], axis=0), w_oihw, wfc, bfc, img_tile=8)
    h1, h2 = h12[:B], h12[B:]
    loss, u_new = dcl_loss(h1, h2, u_idx, gamma, T=T, tile_q=8)
    jax.block_until_ready((loss, u_new))
    u = u.at[index].set(u_new)                         # self.u[index] = u1 + u2 (host-side scatter)

    # ----- sanity checks (Pallas uses bf16 MXU operands; references are pure f32) -----
    ref_h1 = _ref_encoder(x1, w_oihw, wfc, bfc)
    ref_h2 = _ref_encoder(x2, w_oihw, wfc, bfc)
    assert jnp.allclose(h1, ref_h1, rtol=2e-2, atol=2e-2)
    assert jnp.allclose(h2, ref_h2, rtol=2e-2, atol=2e-2)

    ref_loss, ref_u_new = _ref_dcl(h1, h2, u_idx, gamma, T=T)   # same features -> tight loss check
    assert jnp.allclose(loss, ref_loss, rtol=1e-2, atol=1e-2), (loss, ref_loss)
    assert jnp.allclose(u_new, ref_u_new, rtol=1e-2, atol=1e-2)

    print("KERNEL_OK")
</pallas_src>

<mosaic_0001>
module attributes {stable_mosaic.version = 11 : i64} {
  func.func @_encoder_kernel(%arg0: i32, %arg1: memref<192x54xbf16, #tpu.memory_space<vmem>>, %arg2: memref<3x54x1024xbf16, #tpu.memory_space<vmem>>, %arg3: memref<64x256xbf16, #tpu.memory_space<vmem>>, %arg4: memref<1x256xf32, #tpu.memory_space<vmem>>, %arg5: memref<8x256xf32, #tpu.memory_space<vmem>>) attributes {dimension_semantics = [#tpu.dimension_semantics<parallel>], iteration_bounds = array<i64: 2>, scalar_prefetch = 0 : i64, scratch_operands = 0 : i64, tpu.core_type = #tpu.core_type<tc>, window_params = [{transform_indices = @transform_0, window_bounds = array<i64: 192, 54>}, {pipeline_mode = #tpu.pipeline_mode<synchronous>, transform_indices = @transform_1, window_bounds = array<i64: 3, 54, 1024>}, {pipeline_mode = #tpu.pipeline_mode<synchronous>, transform_indices = @transform_2, window_bounds = array<i64: 64, 256>}, {pipeline_mode = #tpu.pipeline_mode<synchronous>, transform_indices = @transform_3, window_bounds = array<i64: 1, 256>}, {transform_indices = @transform_4, window_bounds = array<i64: 8, 256>}]} {
    %c0 = arith.constant 0 : index
    %c0_0 = arith.constant 0 : index
    %0 = vector.load %arg1[%c0, %c0_0] : memref<192x54xbf16, #tpu.memory_space<vmem>>, vector<184x54xbf16>
    %c0_1 = arith.constant 0 : index
    %c0_2 = arith.constant 0 : index
    %c0_3 = arith.constant 0 : index
    %1 = vector.load %arg2[%c0_1, %c0_2, %c0_3] : memref<3x54x1024xbf16, #tpu.memory_space<vmem>>, vector<1x54x1024xbf16>
    %2 = vector.shape_cast %1 : vector<1x54x1024xbf16> to vector<54x1024xbf16>
    %cst = arith.constant dense<0.000000e+00> : vector<184x1024xf32>
    %3 = tpu.matmul %0, %2, %cst {dimension_numbers = #tpu.dot_dimension_numbers<[1], [0], [0], [1], [0, 0, 1, 1], [], []>} : vector<184x54xbf16>, vector<54x1024xbf16>, vector<184x1024xf32> -> vector<184x1024xf32>
    %c1 = arith.constant 1 : index
    %c0_4 = arith.constant 0 : index
    %4 = vector.load %arg1[%c1, %c0_4] : memref<192x54xbf16, #tpu.memory_space<vmem>>, vector<184x54xbf16>
    %c1_5 = arith.constant 1 : index
    %c0_6 = arith.constant 0 : index
    %c0_7 = arith.constant 0 : index
    %5 = vector.load %arg2[%c1_5, %c0_6, %c0_7] : memref<3x54x1024xbf16, #tpu.memory_space<vmem>>, vector<1x54x1024xbf16>
    %6 = vector.shape_cast %5 : vector<1x54x1024xbf16> to vector<54x1024xbf16>
    %cst_8 = arith.constant dense<0.000000e+00> : vector<184x1024xf32>
    %7 = tpu.matmul %4, %6, %cst_8 {dimension_numbers = #tpu.dot_dimension_numbers<[1], [0], [0], [1], [0, 0, 1, 1], [], []>} : vector<184x54xbf16>, vector<54x1024xbf16>, vector<184x1024xf32> -> vector<184x1024xf32>
    %8 = arith.addf %3, %7 : vector<184x1024xf32>
    %c2 = arith.constant 2 : index
    %c0_9 = arith.constant 0 : index
    %9 = vector.load %arg1[%c2, %c0_9] : memref<192x54xbf16, #tpu.memory_space<vmem>>, vector<184x54xbf16>
    %c2_10 = arith.constant 2 : index
    %c0_11 = arith.constant 0 : index
    %c0_12 = arith.constant 0 : index
    %10 = vector.load %arg2[%c2_10, %c0_11, %c0_12] : memref<3x54x1024xbf16, #tpu.memory_space<vmem>>, vector<1x54x1024xbf16>
    %11 = vector.shape_cast %10 : vector<1x54x1024xbf16> to vector<54x1024xbf16>
    %cst_13 = arith.constant dense<0.000000e+00> : vector<184x1024xf32>
    %12 = tpu.matmul %9, %11, %cst_13 {dimension_numbers = #tpu.dot_dimension_numbers<[1], [0], [0], [1], [0, 0, 1, 1], [], []>} : vector<184x54xbf16>, vector<54x1024xbf16>, vector<184x1024xf32> -> vector<184x1024xf32>
    %13 = arith.addf %8, %12 : vector<184x1024xf32>
    %cst_14 = arith.constant 0.000000e+00 : f32
    %14 = vector.broadcast %cst_14 : f32 to vector<184x1024xf32>
    %15 = arith.maximumf %13, %14 : vector<184x1024xf32>
    %16 = tpu.iota {dimensions = array<i32: 0>} : vector<8x184xi32>
    %17 = tpu.iota {dimensions = array<i32: 1>} : vector<8x184xi32>
    %c24_i32 = arith.constant 24 : i32
    %18 = vector.broadcast %c24_i32 : i32 to vector<8x184xi32>
    %19 = arith.muli %16, %18 : vector<8x184xi32>
    %20 = arith.cmpi sge, %17, %19 : vector<8x184xi32>
    %c24_i32_15 = arith.constant 24 : i32
    %21 = vector.broadcast %c24_i32_15 : i32 to vector<8x184xi32>
    %22 = arith.muli %16, %21 : vector<8x184xi32>
    %c16_i32 = arith.constant 16 : i32
    %23 = vector.broadcast %c16_i32 : i32 to vector<8x184xi32>
    %24 = arith.addi %22, %23 : vector<8x184xi32>
    %25 = arith.cmpi slt, %17, %24 : vector<8x184xi32>
    %26 = arith.andi %20, %25 : vector<8x184xi1>
    %cst_16 = arith.constant 3.906250e-03 : f32
    %cst_17 = arith.constant 0.000000e+00 : f32
    %27 = vector.broadcast %cst_16 : f32 to vector<8x184xf32>
    %28 = vector.broadcast %cst_17 : f32 to vector<8x184xf32>
    %29 = arith.select %26, %27, %28 : vector<8x184xi1>, vector<8x184xf32>
    %cst_18 = arith.constant dense<0.000000e+00> : vector<8x1024xf32>
    %30 = tpu.matmul %29, %15, %cst_18 {dimension_numbers = #tpu.dot_dimension_numbers<[1], [0], [0], [1], [0, 0, 1, 1], [], []>} : vector<8x184xf32>, vector<184x1024xf32>, vector<8x1024xf32> -> vector<8x1024xf32>
    %31 = vector.extract_strided_slice %30 {offsets = [0, 0], sizes = [8, 64], strides = [1, 1]} : vector<8x1024xf32> to vector<8x64xf32>
    %32 = vector.extract_strided_slice %30 {offsets = [0, 64], sizes = [8, 64], strides = [1, 1]} : vector<8x1024xf32> to vector<8x64xf32>
    %33 = arith.addf %31, %32 : vector<8x64xf32>
    %34 = vector.extract_strided_slice %30 {offsets = [0, 128], sizes = [8, 64], strides = [1, 1]} : vector<8x1024xf32> to vector<8x64xf32>
    %35 = arith.addf %33, %34 : vector<8x64xf32>
    %36 = vector.extract_strided_slice %30 {offsets = [0, 192], sizes = [8, 64], strides = [1, 1]} : vector<8x1024xf32> to vector<8x64xf32>
    %37 = arith.addf %35, %36 : vector<8x64xf32>
    %38 = vector.extract_strided_slice %30 {offsets = [0, 256], sizes = [8, 64], strides = [1, 1]} : vector<8x1024xf32> to vector<8x64xf32>
    %39 = arith.addf %37, %38 : vector<8x64xf32>
    %40 = vector.extract_strided_slice %30 {offsets = [0, 320], sizes = [8, 64], strides = [1, 1]} : vector<8x1024xf32> to vector<8x64xf32>
    %41 = arith.addf %39, %40 : vector<8x64xf32>
    %42 = vector.extract_strided_slice %30 {offsets = [0, 384], sizes = [8, 64], strides = [1, 1]} : vector<8x1024xf32> to vector<8x64xf32>
    %43 = arith.addf %41, %42 : vector<8x64xf32>
    %44 = vector.extract_strided_slice %30 {offsets = [0, 448], sizes = [8, 64], strides = [1, 1]} : vector<8x1024xf32> to vector<8x64xf32>
    %45 = arith.addf %43, %44 : vector<8x64xf32>
    %46 = vector.extract_strided_slice %30 {offsets = [0, 512], sizes = [8, 64], strides = [1, 1]} : vector<8x1024xf32> to vector<8x64xf32>
    %47 = arith.addf %45, %46 : vector<8x64xf32>
    %48 = vector.extract_strided_slice %30 {offsets = [0, 576], sizes = [8, 64], strides = [1, 1]} : vector<8x1024xf32> to vector<8x64xf32>
    %49 = arith.addf %47, %48 : vector<8x64xf32>
    %50 = vector.extract_strided_slice %30 {offsets = [0, 640], sizes = [8, 64], strides = [1, 1]} : vector<8x1024xf32> to vector<8x64xf32>
    %51 = arith.addf %49, %50 : vector<8x64xf32>
    %52 = vector.extract_strided_slice %30 {offsets = [0, 704], sizes = [8, 64], strides = [1, 1]} : vector<8x1024xf32> to vector<8x64xf32>
    %53 = arith.addf %51, %52 : vector<8x64xf32>
    %54 = vector.extract_strided_slice %30 {offsets = [0, 768], sizes = [8, 64], strides = [1, 1]} : vector<8x1024xf32> to vector<8x64xf32>
    %55 = arith.addf %53, %54 : vector<8x64xf32>
    %56 = vector.extract_strided_slice %30 {offsets = [0, 832], sizes = [8, 64], strides = [1, 1]} : vector<8x1024xf32> to vector<8x64xf32>
    %57 = arith.addf %55, %56 : vector<8x64xf32>
    %58 = vector.extract_strided_slice %30 {offsets = [0, 896], sizes = [8, 64], strides = [1, 1]} : vector<8x1024xf32> to vector<8x64xf32>
    %59 = arith.addf %57, %58 : vector<8x64xf32>
    %60 = vector.extract_strided_slice %30 {offsets = [0, 960], sizes = [8, 64], strides = [1, 1]} : vector<8x1024xf32> to vector<8x64xf32>
    %61 = arith.addf %59, %60 : vector<8x64xf32>
    %62 = arith.truncf %61 : vector<8x64xf32> to vector<8x64xbf16>
    %c0_19 = arith.constant 0 : index
    %c0_20 = arith.constant 0 : index
    %63 = vector.load %arg3[%c0_19, %c0_20] : memref<64x256xbf16, #tpu.memory_space<vmem>>, vector<64x256xbf16>
    %cst_21 = arith.constant dense<0.000000e+00> : vector<8x256xf32>
    %64 = tpu.matmul %62, %63, %cst_21 {dimension_numbers = #tpu.dot_dimension_numbers<[1], [0], [0], [1], [0, 0, 1, 1], [], []>} : vector<8x64xbf16>, vector<64x256xbf16>, vector<8x256xf32> -> vector<8x256xf32>
    %c0_22 = arith.constant 0 : index
    %c0_23 = arith.constant 0 : index
    %65 = vector.load %arg4[%c0_22, %c0_23] : memref<1x256xf32, #tpu.memory_space<vmem>>, vector<1x256xf32>
    %66 = vector.broadcast %65 : vector<1x256xf32> to vector<8x256xf32>
    %67 = arith.addf %64, %66 : vector<8x256xf32>
    %c0_24 = arith.constant 0 : index
    %c0_25 = arith.constant 0 : index
    %68 = vector.load %arg5[%c0_24, %c0_25] : memref<8x256xf32, #tpu.memory_space<vmem>>, vector<8x256xf32>
    tpu.vector_store %arg5[%c0_24, %c0_25], %67 {strides = array<i32>} : memref<8x256xf32, #tpu.memory_space<vmem>>, vector<8x256xf32>,
    return
  }
  func.func @transform_0(%arg0: i32) -> (i32, i32) {
    %c0_i32 = arith.constant 0 : i32
    %c0_i32_0 = arith.constant 0 : i32
    return %arg0, %c0_i32 : i32, i32
  }
  func.func @transform_1(%arg0: i32) -> (i32, i32, i32) {
    %c0_i32 = arith.constant 0 : i32
    %c0_i32_0 = arith.constant 0 : i32
    %c0_i32_1 = arith.constant 0 : i32
    %c0_i32_2 = arith.constant 0 : i32
    return %c0_i32, %c0_i32_0, %c0_i32_1 : i32, i32, i32
  }
  func.func @transform_2(%arg0: i32) -> (i32, i32) {
    %c0_i32 = arith.constant 0 : i32
    %c0_i32_0 = arith.constant 0 : i32
    %c0_i32_1 = arith.constant 0 : i32
    return %c0_i32, %c0_i32_0 : i32, i32
  }
  func.func @transform_3(%arg0: i32) -> (i32, i32) {
    %c0_i32 = arith.constant 0 : i32
    %c0_i32_0 = arith.constant 0 : i32
    %c0_i32_1 = arith.constant 0 : i32
    return %c0_i32, %c0_i32_0 : i32, i32
  }
  func.func @transform_4(%arg0: i32) -> (i32, i32) {
    %c0_i32 = arith.constant 0 : i32
    %c0_i32_0 = arith.constant 0 : i32
    return %arg0, %c0_i32 : i32, i32
  }
}

</mosaic_0001>

<bundles_post_ra>
// kernel: tpu_custom_call.1
= control target key start
LH: loop header
LB: loop body
LE: loop exit
PB: predicated region body
PF: predicated region fallthrough
CT: control target
= control target key end

     0   :  { %9 = vsyncpa [#allocation3], 0  ;;  %s7166_s0 = inlined_call_operand.vmem [shape: bf16[384,54], index: 0, kind: input, shape index: {}]   ;;  %s7167_s1 = inlined_call_operand.hbm [shape: bf16[3,54,1024], index: 1, kind: input, shape index: {}]   ;;  %s7168_s2 = inlined_call_operand.vmem [shape: bf16[64,256], index: 2, kind: input, shape index: {}]   ;;  %s7169_s3 = inlined_call_operand.vmem [shape: f32[1,256], index: 3, kind: input, shape index: {}]   ;;  %s7170_s4 = inlined_call_operand.hbm [shape: f32[16,256], index: 4, kind: output, shape index: {}]  }
   0x1   :  { %10 = vsyncpa [#allocation4], 0 }
   0x2   :  { %12 = vsyncpa [#allocation4 + $0x1], 0  ;;  %s4363_s15 = smov 0   ;;  %s4365_s16 = smov 0  }
   0x3   :  { %s4367_s17 = smov 0   ;;  %s4369_s18 = smov 0  }
   0x4 LB: > { %s4384_s19 = sadd.s32 4294967295, %s4328_s18   ;;  %s3824_s20 = sadd.s32 4294967294, %s4328_s18   ;;  %s4328_s18 = sphi %s4369_s18, %s8188_s18   ;;  %s4324_s17 = sphi %s4367_s17, %s8187_s17   ;;  %s4320_s16 = sphi %s4365_s16, %s8186_s16   ;;  %s4316_s15 = sphi %s4363_s15, %s8185_s15  }
   0x5   : > { %s4388_s21 = sadd.s32 1, %s4328_s18   ;;  %s114_s22 = sadd.s32 1, %s4324_s17 }
   0x6   : > { %s111_s23 = ssub.s32 %s4328_s18, %s4388_s21  ;;  %p124_p0 = scmp.ne.s32.totalorder %s4324_s17, %s4320_s16 }
   0x7   : > { %p112_p1 = scmp.eq.s32.totalorder %s111_s23, 0  ;;  %p125_p2 = scmp.eq.s32.totalorder %s4384_s19, 1 }
   0x8   : > { %p130_p3 = scmp.ne.s32.totalorder %s4320_s16, %s4316_s15  ;;  %p131_p4 = scmp.eq.s32.totalorder %s3824_s20, 1 }
   0x9   : > { %s4399_s24 = scalar_select %p112_p1, %s4324_s17, %s114_s22  }
   0xa   : > { %p4401_p5 = por %p125_p2, %p124_p0  ;;  %p4405_p6 = por %p131_p4, %p130_p3 }
   0xb   : > { %p3825_p7 = scmp.ge.s32.totalorder %s4328_s18, 1  ;;  %p138_p8 = scmp.lt.s32.totalorder %s4328_s18, 3 }
   0xc   : > { %s7186_s26 = scalar_select %p4405_p6, 1, 0 }
   0xd   : > { %p4135_p9 = scmp.eq.s32.totalorder %s4384_s19, 0  ;;  %p4412_p10 = pnand %p3825_p7, %p138_p8 }
   0xe   : > { %s4330_s28 = smov [#allocation2]  }
   0xf   : > { %s150_s29 = sshll.u32 %s4330_s28, 4  ;;  %p4127_p11 = pneg %p4412_p10  ;;  %s151_s29 = int_to_ptr.vmem [resolvable:$true] %s150_s29 }
  0x10   : > { %s4249_s30 = scalar_lea.vmem %s151_s29, 10752  ;;  %p4257_p3 = scmp.lt.s32.totalorder %s151_s29, %s151_s29 }
  0x11   : > { %p4128_p12 = pnand %p4135_p9, %p4127_p11  ;;  %p4250_p0 = scmp.ne.s32.totalorder %s151_s29, %s4249_s30 }
  0x12   : > { %p4258_p4 = scmp.lt.s32.totalorder %s4249_s30, %s4249_s30 }
  0x13   : > { %p4240_p13 = pneg %p4128_p12 }
  0x14   : > { %p4259_p6 = por %p4258_p4, %p4257_p3 }
  0x15   : > { %p4252_p1 = pnand %p4250_p0, %p4240_p13 }
  0x17   : > { %p4253_p2 = pneg %p4252_p1 }
  0x19   : > { %p4260_p7 = pnand %p4259_p6, %p4253_p2 }
  0x1b   : > { %4263 = shalt.err (!%p4260_p7)
}
  0x1c   : > { %s4331_s5 = smov 512   ;;  %s4332_s6 = smov 32  }
  0x1d   : > { %4130 = dma.hbm_to_vmem [thread:$0]  (!%p4128_p12), %s7167_s1, 10752, %s151_s29, [#allocation3], %s4331_s5, %s4331_s5, %s4332_s6  }
  0x1e   : > { %181 = sbr.rel (%p4412_p10) target bundleno = 1386 (0x56a), region = 36 }
  0x23   : > { %4307 = dma.done.wait (%p4135_p9), [#allocation3], 10752  }
  0x24   : > { %4309 = vsyncadd (%p4135_p9), [#allocation3], 4294956544  ;;  %s207_s9 = smul.u32 24, %s4384_s19  ;;  %v7171_v0 = vmov 0   ;;  %v291_v1 = vld [vmem:[#allocation2 + $0x1a0] sm:$0x77] }
  0x25   : > { %685 = vmatprep.mubr.bf16.mxu0 %v7171_v0  ;;  %836 = vmatprep.mubr.bf16.mxu1 %v7171_v0  ;;  %vm628_vm0 = vcmask 1042432   ;;  %v292_v2 = vld [vmem:[#allocation2 + $0x1a8] sm:$0x77]  ;;  %v283_v3 = vld [vmem:[#allocation2 + $0x160] sm:$0xff]  ;;  %v3869_v4 = vcombine.high %v291_v1, %v291_v1  ;;  %v3868_v6 = vcombine.low %v291_v1, %v291_v1  ;;  %v293_v38 = vld [vmem:[#allocation2 + $0x1b0] sm:$0x77] }
  0x26   : > { %p208_p6 = scmp.lt.s32.totalorder %s207_s9, 47  ;;  %v3871_v5 = vcombine.high %v292_v2, %v292_v2  ;;  %v3870_v7 = vcombine.low %v292_v2, %v292_v2  ;;  %v287_v8 = vld [vmem:[#allocation2 + $0x180] sm:$0xff]  ;;  %v284_v9 = vld [vmem:[#allocation2 + $0x168] sm:$0xff]  ;;  %v294_v40 = vld [vmem:[#allocation2 + $0x1b8] sm:$0x77]  ;;  %v3873_v46 = vcombine.high %v293_v38, %v293_v38  ;;  %v3872_v47 = vcombine.low %v293_v38, %v293_v38  ;;  %s4336_s14 = smov 64  }
  0x27   : > { %v288_v10 = vld [vmem:[#allocation2 + $0x188] sm:$0xff]  ;;  %v3861_v11 = vcombine.high %v283_v3, %v287_v8  ;;  %v275_v13 = vld [vmem:[#allocation2 + $0x120] sm:$0xff]  ;;  %3876 = vmatprep.subr.msk.bf16.mxu0 %vm628_vm0, %v3869_v4  ;;  %v630_v16 = vsel %vm628_vm0, %v3868_v6, 0  ;;  %v3860_v19 = vcombine.low %v283_v3, %v287_v8  ;;  %vm355_vm1 = vsmask.f32 7424  ;;  %v285_v49 = vld [vmem:[#allocation2 + $0x170] sm:$0xff] }
  0x28   : > { %s8190_s9 = smov (!%p208_p6, %s207_s9), 47  ;;  %v3863_v12 = vcombine.high %v284_v9, %v288_v10  ;;  %v279_v14 = vld [vmem:[#allocation2 + $0x140] sm:$0xff]  ;;  %v276_v15 = vld [vmem:[#allocation2 + $0x128] sm:$0xff]  ;;  %3889 = vmatprep.subr.msk.bf16.mxu1 %vm628_vm0, %v3871_v5  ;;  %v636_v17 = vsel %vm628_vm0, %v3870_v7, 0  ;;  %662 = vmatpush1.bf16.msra.mxu0 %v630_v16  ;;  %v3862_v20 = vcombine.low %v284_v9, %v288_v10  ;;  %v3875_v48 = vcombine.high %v294_v40, %v294_v40  ;;  %v289_v50 = vld [vmem:[#allocation2 + $0x190] sm:$0xff]  ;;  %s4120_s27 = sshll.u32 %s4384_s19, 8 }
  0x29   : > { %s3831_s10 = sshll.u32 %s8190_s9, 2  ;;  %v280_v18 = vld [vmem:[#allocation2 + $0x148] sm:$0xff]  ;;  %813 = vmatpush1.bf16.msra.mxu1 %v636_v17  ;;  %v267_v21 = vld [vmem:[#allocation2 + $0xe0] sm:$0xff]  ;;  %663 = vmatprep.subr.bf16.mxu0 %v3861_v11  ;;  %v3853_v25 = vcombine.high %v275_v13, %v279_v14  ;;  %v3852_v31 = vcombine.low %v275_v13, %v279_v14  ;;  %v3874_v51 = vcombine.low %v294_v40, %v294_v40  ;;  %v286_v52 = vld [vmem:[#allocation2 + $0x178] sm:$0xff]  ;;  %vm591_vm2 = vcmask 441344   ;;  %s7125_s6 = scalar_lea.hbm %s7170_s4, %s4120_s27 }
  0x2a   : > { %s4435_s13 = scalar_lea.vmem %s7166_s0, %s3831_s10  ;;  %v271_v22 = vld [vmem:[#allocation2 + $0x100] sm:$0xff]  ;;  %v268_v23 = vld [vmem:[#allocation2 + $0xe8] sm:$0xff]  ;;  %814 = vmatprep.subr.bf16.mxu1 %v3863_v12  ;;  %v3855_v26 = vcombine.high %v276_v15, %v280_v18  ;;  %v3854_v32 = vcombine.low %v276_v15, %v280_v18  ;;  %v290_v53 = vld [vmem:[#allocation2 + $0x198] sm:$0xff]  ;;  %v642_v57 = vsel %vm628_vm0, %v3872_v47, 0  ;;  %v3865_v60 = vcombine.high %v285_v49, %v289_v50  ;;  %s4337_s8 = smov [#allocation5]  }
  0x2b   : > { %v214_v24 = vld [vmem:[%s4435_s13] sm:$0xf]  ;;  %v215_v27 = vld [vmem:[%s4435_s13 + $0x4] sm:$0xf]  ;;  %v272_v28 = vld [vmem:[#allocation2 + $0x108] sm:$0xff]  ;;  %v3845_v36 = vcombine.high %v267_v21, %v271_v22  ;;  %v3844_v41 = vcombine.low %v267_v21, %v271_v22  ;;  %v648_v59 = vsel %vm628_vm0, %v3874_v51, 0  ;;  %v3867_v61 = vcombine.high %v286_v52, %v290_v53 }
  0x2c   : > { %v4443_v29 = vcombine.low %v214_v24, %v215_v27  ;;  %v4446_v30 = vld [vmem:[%s4435_s13 + $0x8] sm:$0xff]   ;;  %664 = vmatpush1.bf16.msra.mxu0 %v3860_v19  ;;  %v3847_v37 = vcombine.high %v268_v23, %v272_v28  ;;  %v3846_v42 = vcombine.low %v268_v23, %v272_v28  ;;  %v4452_v45 = vld [vmem:[%s4435_s13 + $0x10] sm:$0xff]   ;;  %v278_v63 = vld [vmem:[#allocation2 + $0x138] sm:$0xff]  ;;  %v3864_v5 = vcombine.low %v285_v49, %v289_v50  ;;  %s4268_s9 = sshll.u32 %s4337_s8, 4  ;;  %s4269_s9 = int_to_ptr.vmem [resolvable:$false] %s4268_s9 }
  0x2d   : > { %815 = vmatpush1.bf16.msra.mxu1 %v3862_v20  ;;  %v364_v35 = vshll.u32 %v4446_v30, 16  ;;  %665 = vmatprep.subr.bf16.mxu0 %v3853_v25  ;;  %v368_v55 = vshrl.u32 %v4446_v30, 16  ;;  %v372_v56 = vshll.u32 %v4452_v45, 16  ;;  %v277_v58 = vld [vmem:[#allocation2 + $0x130] sm:$0xff]  ;;  %v282_v1 = vld [vmem:[#allocation2 + $0x158] sm:$0xff]  ;;  %v3866_v6 = vcombine.low %v286_v52, %v290_v53  ;;  %v4488_v24 = vld [vmem:[%s4435_s13 + $0x20] sm:$0xff]  }
  0x2e   : > { %v357_v33 = vshrl.u32 %v4443_v29, 16  ;;  %v359_v34 = vshll.u32 %v4443_v29, 16  ;;  %816 = vmatprep.subr.bf16.mxu1 %v3855_v26  ;;  %v281_v62 = vld [vmem:[#allocation2 + $0x150] sm:$0xff]  ;;  %v4469_v4 = vld [vmem:[%s4435_s13 + $0x18] sm:$0xff]   ;;  %v3859_v8 = vcombine.high %v278_v63, %v282_v1  ;;  %v376_v14 = vshrl.u32 %v4452_v45, 16  ;;  %s4270_s10 = scalar_lea.vmem %s4269_s9, 512 }
  0x2f   : > { %v366_v44 = vrot.slane %v364_v35, 1  ;;  %v374_v3 = vrot.slane %v372_v56, 1  ;;  %v3857_v7 = vcombine.high %v277_v58, %v281_v62  ;;  %v269_v9 = vld [vmem:[#allocation2 + $0xf0] sm:$0xff]  ;;  %v270_v11 = vld [vmem:[#allocation2 + $0xf8] sm:$0xff]  ;;  %v380_v15 = vshll.u32 %v4469_v4, 16  ;;  %v4550_v56 = vld [vmem:[%s4435_s13 + $0x40] sm:$0xff]  }
  0x30   : > { %v361_v39 = vrot.slane %v359_v34, 1  ;;  %666 = vmatpush1.bf16.msra.mxu0 %v3852_v31  ;;  %v273_v10 = vld [vmem:[#allocation2 + $0x110] sm:$0xff]  ;;  %v274_v12 = vld [vmem:[#allocation2 + $0x118] sm:$0xff]  ;;  %v3856_v16 = vcombine.low %v277_v58, %v281_v62  ;;  %v3858_v17 = vcombine.low %v278_v63, %v282_v1  ;;  %v4477_v18 = vld [vmem:[#allocation2 + $0xc0] sm:$0x77]  ;;  %v392_v38 = vshrl.u32 %v4488_v24, 16 }
  0x31   : > { %817 = vmatpush1.bf16.msra.mxu1 %v3854_v32  ;;  %667 = vmatprep.subr.bf16.mxu0 %v3845_v36  ;;  %v370_v2 = vor.u32 %v368_v55, %v366_v44  ;;  %v4479_v19 = vld [vmem:[#allocation2 + $0xc8] sm:$0x77]  ;;  %v3849_v20 = vcombine.high %v269_v9, %v273_v10  ;;  %v3851_v21 = vcombine.high %v270_v11, %v274_v12  ;;  %v382_v23 = vrot.slane %v380_v15, 1  ;;  %v4536_v49 = vld [vmem:[%s4435_s13 + $0x38] sm:$0xff]  }
  0x32   : > { %v362_v43 = vor.u32 %v361_v39, %v357_v33  ;;  %818 = vmatprep.subr.bf16.mxu1 %v3847_v37  ;;  %v378_v22 = vor.u32 %v376_v14, %v374_v3  ;;  %v3848_v25 = vcombine.low %v269_v9, %v273_v10  ;;  %v3850_v26 = vcombine.low %v270_v11, %v274_v12  ;;  %v4508_v36 = vld [vmem:[%s4435_s13 + $0x28] sm:$0xff]   ;;  %v4586_v10 = vld [vmem:[%s4435_s13 + $0x58] sm:$0xf]  ;;  %v265_v11 = vld [vmem:[%s4435_s13 + $0x5c] sm:$0x1] }
  0x33   : > { %v4473_v13 = vsel %vm355_vm1, %v370_v2, %v374_v3  ;;  %v3954_v27 = vcombine.high %v4477_v18, %v4477_v18  ;;  %v3956_v28 = vcombine.high %v4479_v19, %v4479_v19  ;;  %v384_v32 = vshrl.u32 %v4469_v4, 16  ;;  %v4564_v62 = vld [vmem:[%s4435_s13 + $0x48] sm:$0xff]  }
  0x34   : > { %668 = vmatpush1.bf16.msra.mxu0 %v3844_v41  ;;  %v4455_v54 = vsel %vm355_vm1, %v362_v43, %v366_v44  ;;  %v4495_v31 = vsel %vm355_vm1, %v378_v22, %v382_v23  ;;  %v388_v33 = vshll.u32 %v4488_v24, 16  ;;  %v396_v39 = vshll.u32 %v4508_v36, 16 }
  0x35   : > { %819 = vmatpush1.bf16.msra.mxu1 %v3846_v42  ;;  %3902 = vmatprep.subr.msk.bf16.mxu0 %vm628_vm0, %v3873_v46  ;;  %v386_v34 = vor.u32 %v384_v32, %v382_v23  ;;  %v4522_v42 = vld [vmem:[%s4435_s13 + $0x30] sm:$0xff]   ;;  %v400_v44 = vshrl.u32 %v4508_v36, 16  ;;  %v412_v52 = vshll.u32 %v4536_v49, 16  ;;  %v416_v58 = vshrl.u32 %v4536_v49, 16  ;;  %v253_v32 = vld [vmem:[#allocation2 + $0x80] sm:$0xff] }
  0x36   : > { %3915 = vmatprep.subr.msk.bf16.mxu1 %vm628_vm0, %v3875_v48  ;;  %v390_v35 = vrot.slane %v388_v33, 1  ;;  %v398_v41 = vrot.slane %v396_v39, 1  ;;  %v404_v46 = vshll.u32 %v4522_v42, 16  ;;  %v408_v51 = vshrl.u32 %v4522_v42, 16  ;;  %v257_v33 = vld [vmem:[#allocation2 + $0xa0] sm:$0xff] }
  0x37   : > { %3877 = vmatmul.mubr.msk.bf16.vlgmr.msra.gmra.mxu0 %vm591_vm2, %v4455_v54  ;;  %v414_v55 = vrot.slane %v412_v52, 1  ;;  %v424_v1 = vshrl.u32 %v4550_v56, 16  ;;  %v428_v2 = vshll.u32 %v4564_v62, 16  ;;  %v4596_v15 = vcombine.low %v4586_v10, %v265_v11 }
  0x38   : > { %3890 = vmatmul.mubr.msk.bf16.vlgmr.msra.gmra.mxu1 %vm591_vm2, %v4455_v54  ;;  %964 = vmatpush1.bf16.msra.mxu0 %v642_v57  ;;  %v4511_v37 = vsel %vm355_vm1, %v386_v34, %v390_v35  ;;  %v394_v40 = vor.u32 %v392_v38, %v390_v35  ;;  %v402_v47 = vor.u32 %v400_v44, %v398_v41  ;;  %v406_v48 = vrot.slane %v404_v46, 1  ;;  %v254_v34 = vld [vmem:[#allocation2 + $0x88] sm:$0xff]  ;;  %v245_v44 = vld [vmem:[#allocation2 + $0x40] sm:$0xff] }
  0x39   : > { %695 = vmatprep.mubr.bf16.mxu0 %v7171_v0  ;;  %846 = vmatprep.mubr.bf16.mxu1 %v7171_v0  ;;  %v258_v35 = vld [vmem:[#allocation2 + $0xa8] sm:$0xff]  ;;  %v249_v46 = vld [vmem:[#allocation2 + $0x60] sm:$0xff]  ;;  %vm2084_vm3 = vcmask 1046528   ;;  %vm3295_vm10 = vcmask 457728   ;;  %vm3691_vm11 = vcmask 523264  }
  0x3a   : > { %1115 = vmatpush1.bf16.msra.mxu1 %v648_v59  ;;  %965 = vmatprep.subr.bf16.mxu0 %v3865_v60  ;;  %v4525_v43 = vsel %vm355_vm1, %v394_v40, %v398_v41  ;;  %v4539_v50 = vsel %vm355_vm1, %v402_v47, %v406_v48  ;;  %v410_v53 = vor.u32 %v408_v51, %v406_v48  ;;  %v420_v59 = vshll.u32 %v4550_v56, 16 }
  0x3b   : > { %1116 = vmatprep.subr.bf16.mxu1 %v3867_v61  ;;  %v418_v60 = vor.u32 %v416_v58, %v414_v55  ;;  %v3946_v40 = vcombine.high %v253_v32, %v257_v33  ;;  %v3948_v41 = vcombine.high %v254_v34, %v258_v35  ;;  %v3945_v47 = vcombine.low %v253_v32, %v257_v33  ;;  %v238_v58 = vld [vmem:[#allocation2 + $0x8] sm:$0xff] }
  0x3c   : > { %966 = vmatpush1.bf16.msra.mxu0 %v3864_v5  ;;  %v4553_v57 = vsel %vm355_vm1, %v410_v53, %v414_v55  ;;  %v422_v61 = vrot.slane %v420_v59, 1  ;;  %v430_v5 = vrot.slane %v428_v2, 1  ;;  %v3947_v48 = vcombine.low %v254_v34, %v258_v35  ;;  %v237_v53 = vld [vmem:[#allocation2] sm:$0xff]  ;;  %v242_v59 = vld [vmem:[#allocation2 + $0x28] sm:$0xff]  ;;  %v4643_v2 = vld [vmem:[#allocation2 + $0xd0] sm:$0x77] }
  0x3d   : > { %967 = vmatprep.subr.bf16.mxu0 %v3857_v7  ;;  %v3938_v51 = vcombine.high %v245_v44, %v249_v46  ;;  %v241_v55 = vld [vmem:[#allocation2 + $0x20] sm:$0xff]  ;;  %v239_v34 = vld [vmem:[#allocation2 + $0x10] sm:$0xff] }
  0x3e   : > { %1117 = vmatpush1.bf16.msra.mxu1 %v3866_v6  ;;  %v4567_v63 = vsel %vm355_vm1, %v418_v60, %v422_v61  ;;  %v426_v3 = vor.u32 %v424_v1, %v422_v61  ;;  %v4578_v6 = vld [vmem:[%s4435_s13 + $0x50] sm:$0xff]   ;;  %v3930_v61 = vcombine.high %v237_v53, %v241_v55  ;;  %v3932_v1 = vcombine.high %v238_v58, %v242_v59 }
  0x3f   : > { %1118 = vmatprep.subr.bf16.mxu1 %v3859_v8  ;;  %3878 = vmatmul.mubr.msk.bf16.gmra.mxu0 %vm591_vm2, %v4473_v13  ;;  %v432_v8 = vshrl.u32 %v4564_v62, 16  ;;  %v436_v9 = vshll.u32 %v4578_v6, 16 }
  0x40   : > { %3891 = vmatmul.mubr.msk.bf16.gmra.mxu1 %vm591_vm2, %v4473_v13  ;;  %705 = vmatprep.mubr.bf16.mxu0 %v7171_v0  ;;  %v4581_v7 = vsel %vm355_vm1, %v426_v3, %v430_v5  ;;  %v4645_v3 = vld [vmem:[#allocation2 + $0xd8] sm:$0x77] }
  0x41   : > { %856 = vmatprep.mubr.bf16.mxu1 %v7171_v0  ;;  %968 = vmatpush1.bf16.msra.mxu0 %v3856_v16  ;;  %v434_v12 = vor.u32 %v432_v8, %v430_v5  ;;  %v438_v14 = vrot.slane %v436_v9, 1  ;;  %v3929_v5 = vcombine.low %v237_v53, %v241_v55  ;;  %v3931_v8 = vcombine.low %v238_v58, %v242_v59  ;;  %v4751_v53 = vld [vmem:[#allocation2 + $0x280] sm:$0x77]  ;;  %v4753_v55 = vld [vmem:[#allocation2 + $0x288] sm:$0x77] }
  0x42   : > { %1119 = vmatpush1.bf16.msra.mxu1 %v3858_v17  ;;  %969 = vmatprep.subr.bf16.mxu0 %v3849_v20  ;;  %v440_v17 = vshrl.u32 %v4578_v6, 16  ;;  %v444_v20 = vshll.u32 %v4596_v15, 16  ;;  %v3958_v9 = vcombine.high %v4643_v2, %v4643_v2 }
  0x43   : > { %1120 = vmatprep.subr.bf16.mxu1 %v3851_v21  ;;  %v4599_v16 = vsel %vm355_vm1, %v434_v12, %v438_v14 }
  0x44   : > { %v442_v21 = vor.u32 %v440_v17, %v438_v14  ;;  %v446_v22 = vrot.slane %v444_v20, 1  ;;  %v251_v17 = vld [vmem:[#allocation2 + $0x70] sm:$0xff] }
  0x45   : > { %970 = vmatpush1.bf16.msra.mxu0 %v3848_v25  ;;  %v448_v25 = vshrl.u32 %v4596_v15, 16 }
  0x46   : > { %1121 = vmatpush1.bf16.msra.mxu1 %v3850_v26  ;;  %3961 = vmatprep.subr.msk.bf16.mxu0 %vm628_vm0, %v3954_v27  ;;  %v4610_v23 = vsel %vm355_vm1, %v442_v21, %v446_v22  ;;  %v3953_v27 = vcombine.low %v4477_v18, %v4477_v18  ;;  %v246_v18 = vld [vmem:[#allocation2 + $0x48] sm:$0xff] }
  0x47   : > { %3974 = vmatprep.subr.msk.bf16.mxu1 %vm628_vm0, %v3956_v28  ;;  %3879 = vmatmul.mubr.msk.bf16.gmra.mxu0 %vm591_vm2, %v4495_v31  ;;  %v4619_v26 = vor.u32 %v448_v25, %v446_v22  ;;  %v3955_v28 = vcombine.low %v4479_v19, %v4479_v19  ;;  %v250_v19 = vld [vmem:[#allocation2 + $0x68] sm:$0xff]  ;;  %v248_v22 = vld [vmem:[#allocation2 + $0x58] sm:$0xff] }
  0x48   : > { %3892 = vmatmul.mubr.msk.bf16.gmra.mxu1 %vm591_vm2, %v4495_v31  ;;  %715 = vmatprep.mubr.bf16.mxu0 %v7171_v0  ;;  %v1424_v38 = vsel %vm628_vm0, %v3953_v27, 0  ;;  %v3940_v52 = vcombine.high %v246_v18, %v250_v19  ;;  %v3939_v60 = vcombine.low %v246_v18, %v250_v19 }
  0x49   : > { %866 = vmatprep.mubr.bf16.mxu1 %v7171_v0  ;;  %v1430_v39 = vsel %vm628_vm0, %v3955_v28, 0 }
  0x4f   : > { %3880 = vmatmul.mubr.msk.bf16.gmra.mxu0 %vm591_vm2, %v4511_v37 }
  0x50   : > { %3893 = vmatmul.mubr.msk.bf16.gmra.mxu1 %vm591_vm2, %v4511_v37  ;;  %725 = vmatprep.mubr.bf16.mxu0 %v7171_v0 }
  0x51   : > { %876 = vmatprep.mubr.bf16.mxu1 %v7171_v0 }
  0x57   : > { %3881 = vmatmul.mubr.msk.bf16.gmra.mxu0 %vm591_vm2, %v4525_v43 }
  0x58   : > { %3894 = vmatmul.mubr.msk.bf16.gmra.mxu1 %vm591_vm2, %v4525_v43  ;;  %735 = vmatprep.mubr.bf16.mxu0 %v7171_v0 }
  0x59   : > { %886 = vmatprep.mubr.bf16.mxu1 %v7171_v0 }
  0x5f   : > { %3882 = vmatmul.mubr.msk.bf16.gmra.mxu0 %vm591_vm2, %v4539_v50 }
  0x60   : > { %3895 = vmatmul.mubr.msk.bf16.gmra.mxu1 %vm591_vm2, %v4539_v50  ;;  %745 = vmatprep.mubr.bf16.mxu0 %v7171_v0 }
  0x61   : > { %896 = vmatprep.mubr.bf16.mxu1 %v7171_v0 }
  0x67   : > { %3883 = vmatmul.mubr.msk.bf16.gmra.mxu0 %vm591_vm2, %v4553_v57 }
  0x68   : > { %3896 = vmatmul.mubr.msk.bf16.gmra.mxu1 %vm591_vm2, %v4553_v57  ;;  %755 = vmatprep.mubr.bf16.mxu0 %v7171_v0 }
  0x69   : > { %906 = vmatprep.mubr.bf16.mxu1 %v7171_v0 }
  0x6f   : > { %3884 = vmatmul.mubr.msk.bf16.gmra.mxu0 %vm591_vm2, %v4567_v63 }
  0x70   : > { %3897 = vmatmul.mubr.msk.bf16.gmra.mxu1 %vm591_vm2, %v4567_v63  ;;  %765 = vmatprep.mubr.bf16.mxu0 %v7171_v0 }
  0x71   : > { %916 = vmatprep.mubr.bf16.mxu1 %v7171_v0 }
  0x77   : > { %3885 = vmatmul.mubr.msk.bf16.gmra.mxu0 %vm591_vm2, %v4581_v7 }
  0x78   : > { %3898 = vmatmul.mubr.msk.bf16.gmra.mxu1 %vm591_vm2, %v4581_v7  ;;  %775 = vmatprep.mubr.bf16.mxu0 %v7171_v0 }
  0x79   : > { %926 = vmatprep.mubr.bf16.mxu1 %v7171_v0 }
  0x7f   : > { %3886 = vmatmul.mubr.msk.bf16.gmra.mxu0 %vm591_vm2, %v4599_v16 }
  0x80   : > { %3899 = vmatmul.mubr.msk.bf16.gmra.mxu1 %vm591_vm2, %v4599_v16  ;;  %785 = vmatprep.mubr.bf16.mxu0 %v7171_v0 }
  0x81   : > { %936 = vmatprep.mubr.bf16.mxu1 %v7171_v0 }
  0x87   : > { %3887 = vmatmul.mubr.msk.bf16.gmra.mxu0 %vm591_vm2, %v4610_v23 }
  0x88   : > { %3900 = vmatmul.mubr.msk.bf16.gmra.mxu1 %vm591_vm2, %v4610_v23  ;;  %795 = vmatprep.mubr.bf16.mxu0 %v7171_v0 }
  0x89   : > { %946 = vmatprep.mubr.bf16.mxu1 %v7171_v0 }
  0x8f   : > { %3888 = vmatmul.mubr.msk.bf16.gmra.mxu0 %vm591_vm2, %v4619_v26 }
  0x90   : > { %3901 = vmatmul.mubr.msk.bf16.gmra.mxu1 %vm591_vm2, %v4619_v26  ;;  %987 = vmatprep.mubr.bf16.mxu0 %v7171_v0 }
  0x91   : > { %1138 = vmatprep.mubr.bf16.mxu1 %v7171_v0 }
  0x97   : > { %3903 = vmatmul.mubr.msk.bf16.vlgmr.msra.gmra.mxu0 %vm591_vm2, %v4455_v54 }
  0x98   : > { %3916 = vmatmul.mubr.msk.bf16.vlgmr.msra.gmra.mxu1 %vm591_vm2, %v4455_v54  ;;  %1456 = vmatpush1.bf16.msra.mxu0 %v1424_v38  ;;  %v3937_v54 = vcombine.low %v245_v44, %v249_v46 }
  0x99   : > { %997 = vmatprep.mubr.bf16.mxu0 %v7171_v0  ;;  %1148 = vmatprep.mubr.bf16.mxu1 %v7171_v0 }
  0x9a   : > { %1607 = vmatpush1.bf16.msra.mxu1 %v1430_v39  ;;  %1457 = vmatprep.subr.bf16.mxu0 %v3946_v40  ;;  %v243_v39 = vld [vmem:[#allocation2 + $0x30] sm:$0xff]  ;;  %v240_v40 = vld [vmem:[#allocation2 + $0x18] sm:$0xff] }
  0x9b   : > { %1608 = vmatprep.subr.bf16.mxu1 %v3948_v41  ;;  %v244_v41 = vld [vmem:[#allocation2 + $0x38] sm:$0xff] }
  0x9c   : > { %1458 = vmatpush1.bf16.msra.mxu0 %v3945_v47  ;;  %v3934_v47 = vcombine.high %v239_v34, %v243_v39 }
  0x9d   : > { %1459 = vmatprep.subr.bf16.mxu0 %v3938_v51 }
  0x9e   : > { %1609 = vmatpush1.bf16.msra.mxu1 %v3947_v48  ;;  %v3936_v48 = vcombine.high %v240_v40, %v244_v41 }
  0x9f   : > { %1610 = vmatprep.subr.bf16.mxu1 %v3940_v52  ;;  %3904 = vmatmul.mubr.msk.bf16.gmra.mxu0 %vm591_vm2, %v4473_v13 }
  0xa0   : > { %3917 = vmatmul.mubr.msk.bf16.gmra.mxu1 %vm591_vm2, %v4473_v13  ;;  %1007 = vmatprep.mubr.bf16.mxu0 %v7171_v0  ;;  %v3960_v13 = vcombine.high %v4645_v3, %v4645_v3 }
  0xa1   : > { %1158 = vmatprep.mubr.bf16.mxu1 %v7171_v0  ;;  %1460 = vmatpush1.bf16.msra.mxu0 %v3937_v54  ;;  %v3933_v54 = vcombine.low %v239_v34, %v243_v39 }
  0xa2   : > { %1611 = vmatpush1.bf16.msra.mxu1 %v3939_v60  ;;  %1461 = vmatprep.subr.bf16.mxu0 %v3930_v61  ;;  %v3935_v60 = vcombine.low %v240_v40, %v244_v41  ;;  %v4041_v61 = vcombine.high %v4753_v55, %v4753_v55 }
  0xa3   : > { %1612 = vmatprep.subr.bf16.mxu1 %v3932_v1 }
  0xa5   : > { %1462 = vmatpush1.bf16.msra.mxu0 %v3929_v5 }
  0xa6   : > { %1613 = vmatpush1.bf16.msra.mxu1 %v3931_v8  ;;  %3987 = vmatprep.subr.msk.bf16.mxu0 %vm628_vm0, %v3958_v9 }
  0xa7   : > { %4000 = vmatprep.subr.msk.bf16.mxu1 %vm628_vm0, %v3960_v13  ;;  %3905 = vmatmul.mubr.msk.bf16.gmra.mxu0 %vm591_vm2, %v4495_v31 }
  0xa8   : > { %3918 = vmatmul.mubr.msk.bf16.gmra.mxu1 %vm591_vm2, %v4495_v31  ;;  %1017 = vmatprep.mubr.bf16.mxu0 %v7171_v0  ;;  %v3957_v31 = vcombine.low %v4643_v2, %v4643_v2 }
  0xa9   : > { %1168 = vmatprep.mubr.bf16.mxu1 %v7171_v0 }
  0xaf   : > { %3906 = vmatmul.mubr.msk.bf16.gmra.mxu0 %vm591_vm2, %v4511_v37 }
  0xb0   : > { %3919 = vmatmul.mubr.msk.bf16.gmra.mxu1 %vm591_vm2, %v4511_v37  ;;  %1027 = vmatprep.mubr.bf16.mxu0 %v7171_v0  ;;  %v3959_v37 = vcombine.low %v4645_v3, %v4645_v3 }
  0xb1   : > { %1178 = vmatprep.mubr.bf16.mxu1 %v7171_v0 }
  0xb2   : > { %v1442_v11 = vsel %vm628_vm0, %v3959_v37, 0 }
  0xb7   : > { %3907 = vmatmul.mubr.msk.bf16.gmra.mxu0 %vm591_vm2, %v4525_v43 }
  0xb8   : > { %3920 = vmatmul.mubr.msk.bf16.gmra.mxu1 %vm591_vm2, %v4525_v43  ;;  %1037 = vmatprep.mubr.bf16.mxu0 %v7171_v0  ;;  %v255_v43 = vld [vmem:[#allocation2 + $0x90] sm:$0xff] }
  0xb9   : > { %1188 = vmatprep.mubr.bf16.mxu1 %v7171_v0 }
  0xbf   : > { %3908 = vmatmul.mubr.msk.bf16.gmra.mxu0 %vm591_vm2, %v4539_v50 }
  0xc0   : > { %3921 = vmatmul.mubr.msk.bf16.gmra.mxu1 %vm591_vm2, %v4539_v50  ;;  %1047 = vmatprep.mubr.bf16.mxu0 %v7171_v0  ;;  %v259_v50 = vld [vmem:[#allocation2 + $0xb0] sm:$0xff] }
  0xc1   : > { %1198 = vmatprep.mubr.bf16.mxu1 %v7171_v0  ;;  %v3950_v12 = vcombine.high %v255_v43, %v259_v50  ;;  %v3949_v25 = vcombine.low %v255_v43, %v259_v50 }
  0xc7   : > { %3909 = vmatmul.mubr.msk.bf16.gmra.mxu0 %vm591_vm2, %v4553_v57 }
  0xc8   : > { %3922 = vmatmul.mubr.msk.bf16.gmra.mxu1 %vm591_vm2, %v4553_v57  ;;  %1057 = vmatprep.mubr.bf16.mxu0 %v7171_v0  ;;  %v256_v57 = vld [vmem:[#allocation2 + $0x98] sm:$0xff] }
  0xc9   : > { %1208 = vmatprep.mubr.bf16.mxu1 %v7171_v0 }
  0xcf   : > { %3910 = vmatmul.mubr.msk.bf16.gmra.mxu0 %vm591_vm2, %v4567_v63 }
  0xd0   : > { %3923 = vmatmul.mubr.msk.bf16.gmra.mxu1 %vm591_vm2, %v4567_v63  ;;  %1067 = vmatprep.mubr.bf16.mxu0 %v7171_v0  ;;  %v260_v63 = vld [vmem:[#allocation2 + $0xb8] sm:$0xff] }
  0xd1   : > { %1218 = vmatprep.mubr.bf16.mxu1 %v7171_v0  ;;  %v3952_v14 = vcombine.high %v256_v57, %v260_v63  ;;  %v3951_v28 = vcombine.low %v256_v57, %v260_v63 }
  0xd7   : > { %3911 = vmatmul.mubr.msk.bf16.gmra.mxu0 %vm591_vm2, %v4581_v7 }
  0xd8   : > { %3924 = vmatmul.mubr.msk.bf16.gmra.mxu1 %vm591_vm2, %v4581_v7  ;;  %1077 = vmatprep.mubr.bf16.mxu0 %v7171_v0  ;;  %v1436_v7 = vsel %vm628_vm0, %v3957_v31, 0 }
  0xd9   : > { %1228 = vmatprep.mubr.bf16.mxu1 %v7171_v0 }
  0xdf   : > { %3912 = vmatmul.mubr.msk.bf16.gmra.mxu0 %vm591_vm2, %v4599_v16 }
  0xe0   : > { %3925 = vmatmul.mubr.msk.bf16.gmra.mxu1 %vm591_vm2, %v4599_v16  ;;  %1087 = vmatprep.mubr.bf16.mxu0 %v7171_v0  ;;  %v247_v16 = vld [vmem:[#allocation2 + $0x50] sm:$0xff] }
  0xe1   : > { %1238 = vmatprep.mubr.bf16.mxu1 %v7171_v0  ;;  %v3942_v32 = vcombine.high %v247_v16, %v251_v17  ;;  %v3941_v18 = vcombine.low %v247_v16, %v251_v17 }
  0xe7   : > { %3913 = vmatmul.mubr.msk.bf16.gmra.mxu0 %vm591_vm2, %v4610_v23 }
  0xe8   : > { %3926 = vmatmul.mubr.msk.bf16.gmra.mxu1 %vm591_vm2, %v4610_v23  ;;  %1097 = vmatprep.mubr.bf16.mxu0 %v7171_v0  ;;  %v252_v23 = vld [vmem:[#allocation2 + $0x78] sm:$0xff] }
  0xe9   : > { %1248 = vmatprep.mubr.bf16.mxu1 %v7171_v0  ;;  %v3944_v33 = vcombine.high %v248_v22, %v252_v23  ;;  %v3943_v19 = vcombine.low %v248_v22, %v252_v23 }
  0xef   : > { %3914 = vmatmul.mubr.msk.bf16.gmra.mxu0 %vm591_vm2, %v4619_v26 }
  0xf0   : > { %3927 = vmatmul.mubr.msk.bf16.gmra.mxu1 %vm591_vm2, %v4619_v26  ;;  %1479 = vmatprep.mubr.bf16.mxu0 %v7171_v0 }
  0xf1   : > { %1630 = vmatprep.mubr.bf16.mxu1 %v7171_v0 }
  0xf7   : > { %v4721_v20 = vpop.f32.mrf.mxu0  ;;  %3962 = vmatmul.mubr.msk.bf16.vlgmr.msra.gmra.mxu0 %vm591_vm2, %v4443_v29 }
  0xf8   : > { %v4723_v21 = vpop.f32.mrf.mxu1  ;;  %3975 = vmatmul.mubr.msk.bf16.vlgmr.msra.gmra.mxu1 %vm591_vm2, %v4443_v29  ;;  %1758 = vmatpush1.bf16.msra.mxu0 %v1436_v7 }
  0xf9   : > { %1489 = vmatprep.mubr.bf16.mxu0 %v7171_v0  ;;  %v4730_v26 = vpop.f32.mrf.mxu0  ;;  %1640 = vmatprep.mubr.bf16.mxu1 %v7171_v0 }
  0xfa   : > { %v4732_v27 = vpop.f32.mrf.mxu1  ;;  %1909 = vmatpush1.bf16.msra.mxu1 %v1442_v11  ;;  %1759 = vmatprep.subr.bf16.mxu0 %v3950_v12 }
  0xfb   : > { %1910 = vmatprep.subr.bf16.mxu1 %v3952_v14  ;;  %v4735_v35 = vpop.f32.mrf.mxu0 }
  0xfc   : > { %v4737_v38 = vpop.f32.mrf.mxu1  ;;  %1760 = vmatpush1.bf16.msra.mxu0 %v3949_v25 }
  0xfd   : > { %v4739_v44 = vpop.f32.mrf.mxu0  ;;  %1761 = vmatprep.subr.bf16.mxu0 %v3942_v32 }
  0xfe   : > { %v4741_v46 = vpop.f32.mrf.mxu1  ;;  %1911 = vmatpush1.bf16.msra.mxu1 %v3951_v28 }
  0xff   : > { %1912 = vmatprep.subr.bf16.mxu1 %v3944_v33  ;;  %v4743_v51 = vpop.f32.mrf.mxu0  ;;  %3963 = vmatmul.mubr.msk.bf16.gmra.mxu0 %vm591_vm2, %v4446_v30 }
 0x100   : > { %v4745_v52 = vpop.f32.mrf.mxu1  ;;  %3976 = vmatmul.mubr.msk.bf16.gmra.mxu1 %vm591_vm2, %v4446_v30  ;;  %1499 = vmatprep.mubr.bf16.mxu0 %v7171_v0  ;;  %v4039_v30 = vcombine.high %v4751_v53, %v4751_v53 }
 0x101   : > { %1650 = vmatprep.mubr.bf16.mxu1 %v7171_v0  ;;  %v4757_v58 = vpop.f32.mrf.mxu0  ;;  %1762 = vmatpush1.bf16.msra.mxu0 %v3941_v18 }
 0x102   : > { %v4759_v59 = vpop.f32.mrf.mxu1  ;;  %1913 = vmatpush1.bf16.msra.mxu1 %v3943_v19  ;;  %1763 = vmatprep.subr.bf16.mxu0 %v3934_v47 }
 0x103   : > { %1914 = vmatprep.subr.bf16.mxu1 %v3936_v48  ;;  %v4765_v1 = vpop.f32.mrf.mxu0 }
 0x104   : > { %v4767_v2 = vpop.f32.mrf.mxu1 }
 0x105   : > { %v4769_v3 = vpop.f32.mrf.mxu0  ;;  %1764 = vmatpush1.bf16.msra.mxu0 %v3933_v54 }
 0x106   : > { %v4771_v5 = vpop.f32.mrf.mxu1  ;;  %1915 = vmatpush1.bf16.msra.mxu1 %v3935_v60  ;;  %4046 = vmatprep.subr.msk.bf16.mxu0 %vm628_vm0, %v4039_v30 }
 0x107   : > { %4059 = vmatprep.subr.msk.bf16.mxu1 %vm628_vm0, %v4041_v61  ;;  %v4775_v8 = vpop.f32.mrf.mxu0  ;;  %3964 = vmatmul.mubr.msk.bf16.gmra.mxu0 %vm591_vm2, %v4452_v45 }
 0x108   : > { %v4777_v9 = vpop.f32.mrf.mxu1  ;;  %3977 = vmatmul.mubr.msk.bf16.gmra.mxu1 %vm591_vm2, %v4452_v45  ;;  %1509 = vmatprep.mubr.bf16.mxu0 %v7171_v0 }
 0x109   : > { %1660 = vmatprep.mubr.bf16.mxu1 %v7171_v0  ;;  %v4785_v13 = vpop.f32.mrf.mxu0 }
 0x10a   : > { %v4787_v31 = vpop.f32.mrf.mxu1 }
 0x10b   : > { %v4789_v37 = vpop.f32.mrf.mxu0 }
 0x10c   : > { %v4791_v43 = vpop.f32.mrf.mxu1 }
 0x10d   : > { %7188 = vst [vmem:[#allocation8_spill] sm:$0xff] %v4791_v43  ;;  %v4793_v50 = vpop.f32.mrf.mxu0 }
 0x10e   : > { %7189 = vst [vmem:[#allocation9_spill] sm:$0xff] %v4793_v50  ;;  %v4795_v57 = vpop.f32.mrf.mxu1 }
 0x10f   : > { %7190 = vst [vmem:[#allocation10_spill] sm:$0xff] %v4795_v57  ;;  %v4797_v63 = vpop.f32.mrf.mxu0  ;;  %3965 = vmatmul.mubr.msk.bf16.gmra.mxu0 %vm591_vm2, %v4469_v4 }
 0x110   : > { %7191 = vst [vmem:[#allocation11_spill] sm:$0xff] %v4797_v63  ;;  %v4799_v7 = vpop.f32.mrf.mxu1  ;;  %3978 = vmatmul.mubr.msk.bf16.gmra.mxu1 %vm591_vm2, %v4469_v4  ;;  %1519 = vmatprep.mubr.bf16.mxu0 %v7171_v0 }
 0x111   : > { %7192 = vst [vmem:[#allocation12_spill] sm:$0xff] %v4799_v7  ;;  %1670 = vmatprep.mubr.bf16.mxu1 %v7171_v0  ;;  %v4807_v45 = vpop.f32.mrf.mxu0 }
 0x112   : > { %7193 = vst [vmem:[#allocation13_spill] sm:$0xff] %v4807_v45  ;;  %v4809_v11 = vpop.f32.mrf.mxu1 }
 0x113   : > { %7194 = vst [vmem:[#allocation14_spill] sm:$0xff] %v4809_v11  ;;  %v4811_v12 = vpop.f32.mrf.mxu0 }
 0x114   : > { %7195 = vst [vmem:[#allocation15_spill] sm:$0xff] %v4811_v12  ;;  %v4813_v14 = vpop.f32.mrf.mxu1 }
 0x115   : > { %7196 = vst [vmem:[#allocation16_spill] sm:$0xff] %v4813_v14  ;;  %v4815_v16 = vpop.f32.mrf.mxu0 }
 0x116   : > { %7197 = vst [vmem:[#allocation17_spill] sm:$0xff] %v4815_v16  ;;  %v4817_v17 = vpop.f32.mrf.mxu1 }
 0x117   : > { %7198 = vst [vmem:[#allocation18_spill] sm:$0xff] %v4817_v17  ;;  %v4819_v22 = vpop.f32.mrf.mxu0  ;;  %3966 = vmatmul.mubr.msk.bf16.gmra.mxu0 %vm591_vm2, %v4488_v24 }
 0x118   : > { %7199 = vst [vmem:[#allocation19_spill] sm:$0xff] %v4819_v22  ;;  %v4821_v23 = vpop.f32.mrf.mxu1  ;;  %3979 = vmatmul.mubr.msk.bf16.gmra.mxu1 %vm591_vm2, %v4488_v24  ;;  %1529 = vmatprep.mubr.bf16.mxu0 %v7171_v0 }
 0x119   : > { %7200 = vst [vmem:[#allocation20_spill] sm:$0xff] %v4821_v23  ;;  %1680 = vmatprep.mubr.bf16.mxu1 %v7171_v0  ;;  %v4829_v4 = vpop.f32.mrf.mxu0 }
 0x11a   : > { %7201 = vst [vmem:[#allocation21_spill] sm:$0xff] %v4829_v4  ;;  %v4831_v25 = vpop.f32.mrf.mxu1  ;;  %v2053_v4 = vld [vmem:[#allocation2 + $0x1c0] sm:$0xff] }
 0x11b   : > { %7202 = vst [vmem:[#allocation22_spill] sm:$0xff] %v4831_v25  ;;  %v4833_v28 = vpop.f32.mrf.mxu0 }
 0x11c   : > { %7203 = vst [vmem:[#allocation23_spill] sm:$0xff] %v4833_v28  ;;  %v4835_v32 = vpop.f32.mrf.mxu1  ;;  %v2065_v28 = vld [vmem:[#allocation2 + $0x220] sm:$0xff] }
 0x11d   : > { %7204 = vst [vmem:[#allocation24_spill] sm:$0xff] %v4835_v32  ;;  %v4837_v33 = vpop.f32.mrf.mxu0  ;;  %v2061_v32 = vld [vmem:[#allocation2 + $0x200] sm:$0xff] }
 0x11e   : > { %7205 = vst [vmem:[#allocation25_spill] sm:$0xff] %v4837_v33  ;;  %v4839_v34 = vpop.f32.mrf.mxu1 }
 0x11f   : > { %7206 = vst [vmem:[#allocation26_spill] sm:$0xff] %v4839_v34  ;;  %v4841_v39 = vpop.f32.mrf.mxu0  ;;  %3967 = vmatmul.mubr.msk.bf16.gmra.mxu0 %vm591_vm2, %v4508_v36 }
 0x120   : > { %7207 = vst [vmem:[#allocation27_spill] sm:$0xff] %v4841_v39  ;;  %v4843_v40 = vpop.f32.mrf.mxu1  ;;  %3980 = vmatmul.mubr.msk.bf16.gmra.mxu1 %vm591_vm2, %v4508_v36  ;;  %1539 = vmatprep.mubr.bf16.mxu0 %v7171_v0 }
 0x121   : > { %7208 = vst [vmem:[#allocation28_spill] sm:$0xff] %v4843_v40  ;;  %1690 = vmatprep.mubr.bf16.mxu1 %v7171_v0  ;;  %v4851_v41 = vpop.f32.mrf.mxu0  ;;  %v2074_v40 = vld [vmem:[#allocation2 + $0x268] sm:$0xff] }
 0x122   : > { %7209 = vst [vmem:[#allocation29_spill] sm:$0xff] %v4851_v41  ;;  %v4853_v18 = vpop.f32.mrf.mxu1 }
 0x123   : > { %7210 = vst [vmem:[#allocation30_spill] sm:$0xff] %v4853_v18  ;;  %v4855_v19 = vpop.f32.mrf.mxu0 }
 0x124   : > { %7211 = vst [vmem:[#allocation31_spill] sm:$0xff] %v4855_v19  ;;  %v4857_v47 = vpop.f32.mrf.mxu1 }
 0x125   : > { %7212 = vst [vmem:[#allocation32_spill] sm:$0xff] %v4857_v47  ;;  %v4859_v48 = vpop.f32.mrf.mxu0 }
 0x126   : > { %7213 = vst [vmem:[#allocation33_spill] sm:$0xff] %v4859_v48  ;;  %v4861_v54 = vpop.f32.mrf.mxu1 }
 0x127   : > { %7214 = vst [vmem:[#allocation34_spill] sm:$0xff] %v4861_v54  ;;  %v4863_v60 = vpop.f32.mrf.mxu0  ;;  %3968 = vmatmul.mubr.msk.bf16.gmra.mxu0 %vm591_vm2, %v4522_v42 }
 0x128   : > { %7215 = vst [vmem:[#allocation35_spill] sm:$0xff] %v4863_v60  ;;  %v4865_v30 = vpop.f32.mrf.mxu1  ;;  %3981 = vmatmul.mubr.msk.bf16.gmra.mxu1 %vm591_vm2, %v4522_v42  ;;  %1549 = vmatprep.mubr.bf16.mxu0 %v7171_v0 }
 0x129   : > { %7216 = vst [vmem:[#allocation36_spill] sm:$0xff] %v4865_v30  ;;  %1700 = vmatprep.mubr.bf16.mxu1 %v7171_v0  ;;  %v4873_v61 = vpop.f32.mrf.mxu0 }
 0x12a   : > { %7217 = vst [vmem:[#allocation37_spill] sm:$0xff] %v4873_v61  ;;  %v4875_v47 = vpop.f32.mrf.mxu1 }
 0x12b   : > { %7218 = vst [vmem:[#allocation38_spill] sm:$0xff] %v4875_v47  ;;  %v4877_v48 = vpop.f32.mrf.mxu0 }
 0x12c   : > { %7219 = vst [vmem:[#allocation39_spill] sm:$0xff] %v4877_v48  ;;  %v4879_v54 = vpop.f32.mrf.mxu1 }
 0x12d   : > { %7220 = vst [vmem:[#allocation40_spill] sm:$0xff] %v4879_v54  ;;  %v4881_v60 = vpop.f32.mrf.mxu0 }
 0x12e   : > { %7221 = vst [vmem:[#allocation41_spill] sm:$0xff] %v4881_v60  ;;  %v4883_v30 = vpop.f32.mrf.mxu1 }
 0x12f   : > { %7222 = vst [vmem:[#allocation42_spill] sm:$0xff] %v4883_v30  ;;  %v4885_v19 = vpop.f32.mrf.mxu0  ;;  %3969 = vmatmul.mubr.msk.bf16.gmra.mxu0 %vm591_vm2, %v4536_v49 }
 0x130   : > { %7223 = vst [vmem:[#allocation43_spill] sm:$0xff] %v4885_v19  ;;  %v4887_v18 = vpop.f32.mrf.mxu1  ;;  %3982 = vmatmul.mubr.msk.bf16.gmra.mxu1 %vm591_vm2, %v4536_v49  ;;  %1559 = vmatprep.mubr.bf16.mxu0 %v7171_v0 }
 0x131   : > { %7224 = vst [vmem:[#allocation44_spill] sm:$0xff] %v4887_v18  ;;  %1710 = vmatprep.mubr.bf16.mxu1 %v7171_v0  ;;  %v4895_v48 = vpop.f32.mrf.mxu0 }
 0x132   : > { %7225 = vst [vmem:[#allocation45_spill] sm:$0xff] %v4895_v48  ;;  %v4897_v54 = vpop.f32.mrf.mxu1 }
 0x133   : > { %7226 = vst [vmem:[#allocation46_spill] sm:$0xff] %v4897_v54  ;;  %v4899_v60 = vpop.f32.mrf.mxu0 }
 0x134   : > { %7227 = vst [vmem:[#allocation47_spill] sm:$0xff] %v4899_v60  ;;  %v4901_v30 = vpop.f32.mrf.mxu1 }
 0x135   : > { %7228 = vst [vmem:[#allocation48_spill] sm:$0xff] %v4901_v30  ;;  %v4903_v19 = vpop.f32.mrf.mxu0 }
 0x136   : > { %7229 = vst [vmem:[#allocation49_spill] sm:$0xff] %v4903_v19  ;;  %v4905_v18 = vpop.f32.mrf.mxu1 }
 0x137   : > { %7230 = vst [vmem:[#allocation50_spill] sm:$0xff] %v4905_v18  ;;  %v4907_v47 = vpop.f32.mrf.mxu0  ;;  %3970 = vmatmul.mubr.msk.bf16.gmra.mxu0 %vm591_vm2, %v4550_v56 }
 0x138   : > { %7231 = vst [vmem:[#allocation51_spill] sm:$0xff] %v4907_v47  ;;  %v4909_v61 = vpop.f32.mrf.mxu1  ;;  %3983 = vmatmul.mubr.msk.bf16.gmra.mxu1 %vm591_vm2, %v4550_v56  ;;  %1569 = vmatprep.mubr.bf16.mxu0 %v7171_v0 }
 0x139   : > { %7232 = vst [vmem:[#allocation52_spill] sm:$0xff] %v4909_v61  ;;  %1720 = vmatprep.mubr.bf16.mxu1 %v7171_v0  ;;  %v4917_v60 = vpop.f32.mrf.mxu0 }
 0x13a   : > { %7233 = vst [vmem:[#allocation53_spill] sm:$0xff] %v4917_v60  ;;  %v4919_v30 = vpop.f32.mrf.mxu1 }
 0x13b   : > { %7234 = vst [vmem:[#allocation54_spill] sm:$0xff] %v4919_v30  ;;  %v4921_v19 = vpop.f32.mrf.mxu0 }
 0x13c   : > { %7235 = vst [vmem:[#allocation55_spill] sm:$0xff] %v4921_v19  ;;  %v4923_v18 = vpop.f32.mrf.mxu1 }
 0x13d   : > { %7236 = vst [vmem:[#allocation56_spill] sm:$0xff] %v4923_v18  ;;  %v4925_v47 = vpop.f32.mrf.mxu0 }
 0x13e   : > { %7237 = vst [vmem:[#allocation57_spill] sm:$0xff] %v4925_v47  ;;  %v4927_v61 = vpop.f32.mrf.mxu1 }
 0x13f   : > { %7238 = vst [vmem:[#allocation58_spill] sm:$0xff] %v4927_v61  ;;  %v4929_v54 = vpop.f32.mrf.mxu0  ;;  %3971 = vmatmul.mubr.msk.bf16.gmra.mxu0 %vm591_vm2, %v4564_v62 }
 0x140   : > { %7239 = vst [vmem:[#allocation59_spill] sm:$0xff] %v4929_v54  ;;  %v4931_v48 = vpop.f32.mrf.mxu1  ;;  %3984 = vmatmul.mubr.msk.bf16.gmra.mxu1 %vm591_vm2, %v4564_v62  ;;  %1579 = vmatprep.mubr.bf16.mxu0 %v7171_v0 }
 0x141   : > { %7240 = vst [vmem:[#allocation60_spill] sm:$0xff] %v4931_v48  ;;  %1730 = vmatprep.mubr.bf16.mxu1 %v7171_v0  ;;  %v4939_v19 = vpop.f32.mrf.mxu0 }
 0x142   : > { %7241 = vst [vmem:[#allocation61_spill] sm:$0xff] %v4939_v19  ;;  %v4941_v18 = vpop.f32.mrf.mxu1 }
 0x143   : > { %7242 = vst [vmem:[#allocation62_spill] sm:$0xff] %v4941_v18  ;;  %v4943_v47 = vpop.f32.mrf.mxu0 }
 0x144   : > { %7243 = vst [vmem:[#allocation63_spill] sm:$0xff] %v4943_v47  ;;  %v4945_v61 = vpop.f32.mrf.mxu1 }
 0x145   : > { %7244 = vst [vmem:[#allocation64_spill] sm:$0xff] %v4945_v61  ;;  %v4947_v54 = vpop.f32.mrf.mxu0 }
 0x146   : > { %7245 = vst [vmem:[#allocation65_spill] sm:$0xff] %v4947_v54  ;;  %v4949_v48 = vpop.f32.mrf.mxu1 }
 0x147   : > { %7246 = vst [vmem:[#allocation66_spill] sm:$0xff] %v4949_v48  ;;  %v4951_v30 = vpop.f32.mrf.mxu0  ;;  %3972 = vmatmul.mubr.msk.bf16.gmra.mxu0 %vm591_vm2, %v4578_v6 }
 0x148   : > { %7247 = vst [vmem:[#allocation67_spill] sm:$0xff] %v4951_v30  ;;  %v4953_v60 = vpop.f32.mrf.mxu1  ;;  %3985 = vmatmul.mubr.msk.bf16.gmra.mxu1 %vm591_vm2, %v4578_v6  ;;  %1589 = vmatprep.mubr.bf16.mxu0 %v7171_v0 }
 0x149   : > { %7248 = vst [vmem:[#allocation68_spill] sm:$0xff] %v4953_v60  ;;  %1740 = vmatprep.mubr.bf16.mxu1 %v7171_v0  ;;  %v4961_v47 = vpop.f32.mrf.mxu0  ;;  %v4971_v60 = vcombine.low %v4586_v10, %v4586_v10 }
 0x14a   : > { %7249 = vst [vmem:[#allocation69_spill] sm:$0xff] %v4961_v47  ;;  %v4963_v61 = vpop.f32.mrf.mxu1  ;;  %v2070_v47 = vld [vmem:[#allocation2 + $0x248] sm:$0xff] }
 0x14b   : > { %7250 = vst [vmem:[#allocation70_spill] sm:$0xff] %v4963_v61  ;;  %v4965_v54 = vpop.f32.mrf.mxu0  ;;  %v2073_v61 = vld [vmem:[#allocation2 + $0x260] sm:$0xff] }
 0x14c   : > { %7251 = vst [vmem:[#allocation71_spill] sm:$0xff] %v4965_v54  ;;  %v4967_v48 = vpop.f32.mrf.mxu1 }
 0x14d   : > { %7252 = vst [vmem:[#allocation72_spill] sm:$0xff] %v4967_v48  ;;  %v4973_v30 = vpop.f32.mrf.mxu0 }
 0x14e   : > { %7253 = vst [vmem:[#allocation73_spill] sm:$0xff] %v4973_v30  ;;  %v4975_v18 = vpop.f32.mrf.mxu1 }
 0x14f   : > { %7254 = vst [vmem:[#allocation74_spill] sm:$0xff] %v4975_v18  ;;  %v4977_v19 = vpop.f32.mrf.mxu0  ;;  %3973 = vmatmul.mubr.msk.bf16.gmra.mxu0 %vm591_vm2, %v4971_v60  ;;  %v4038_v18 = vcombine.low %v4751_v53, %v4751_v53 }
 0x150   : > { %7255 = vst [vmem:[#allocation75_spill] sm:$0xff] %v4977_v19  ;;  %v4979_v41 = vpop.f32.mrf.mxu1  ;;  %3986 = vmatmul.mubr.msk.bf16.gmra.mxu1 %vm591_vm2, %v4971_v60  ;;  %1781 = vmatprep.mubr.bf16.mxu0 %v7171_v0  ;;  %v2069_v19 = vld [vmem:[#allocation2 + $0x240] sm:$0xff] }
 0x151   : > { %7256 = vst [vmem:[#allocation76_spill] sm:$0xff] %v4979_v41  ;;  %1932 = vmatprep.mubr.bf16.mxu1 %v7171_v0  ;;  %v4987_v10 = vpop.f32.mrf.mxu0  ;;  %v4040_v41 = vcombine.low %v4753_v55, %v4753_v55  ;;  %v2285_v0 = vsel %vm628_vm0, %v4038_v18, 0  ;;  %v4031_v33 = vcombine.high %v2069_v19, %v2073_v61  ;;  %v2062_v55 = vld [vmem:[#allocation2 + $0x208] sm:$0xff] }
 0x152   : > { %7257 = vst [vmem:[#allocation77_spill] sm:$0xff] %v4987_v10  ;;  %v4989_v48 = vpop.f32.mrf.mxu1 }
 0x153   : > { %7258 = vst [vmem:[#allocation78_spill] sm:$0xff] %v4989_v48  ;;  %v801_v30 = vpop.f32.mrf.mxu0  ;;  %v2291_v10 = vsel %vm628_vm0, %v4040_v41, 0  ;;  %v4033_v48 = vcombine.high %v2070_v47, %v2074_v40  ;;  %v4030_v41 = vcombine.low %v2069_v19, %v2073_v61  ;;  %v2054_v19 = vld [vmem:[#allocation2 + $0x1c8] sm:$0xff] }
 0x154   : > { %v952_v54 = vpop.f32.mrf.mxu1  ;;  %v4032_v30 = vcombine.low %v2070_v47, %v2074_v40  ;;  %v2058_v61 = vld [vmem:[#allocation2 + $0x1e8] sm:$0xff]  ;;  %v4022_v40 = vcombine.low %v2061_v32, %v2065_v28 }
 0x155   : > { %v802_v39 = vpop.f32.mrf.mxu0 }
 0x156   : > { %v953_v34 = vpop.f32.mrf.mxu1  ;;  %v7261_v39 = vmov 0  }
 0x157   : > { %v4997_v53 = vpop.f32.mrf.mxu0  ;;  %3988 = vmatmul.mubr.msk.bf16.vlgmr.msra.gmra.mxu0 %vm591_vm2, %v4443_v29  ;;  %v2066_v34 = vld [vmem:[#allocation2 + $0x228] sm:$0xff] }
 0x158   : > { %7259 = vst [vmem:[#allocation79_spill] sm:$0xff] %v4997_v53  ;;  %v4999_v25 = vpop.f32.mrf.mxu1  ;;  %4001 = vmatmul.mubr.msk.bf16.vlgmr.msra.gmra.mxu1 %vm591_vm2, %v4443_v29  ;;  %2317 = vmatpush1.bf16.msra.mxu0 %v2285_v0  ;;  %v4025_v53 = vcombine.high %v2062_v55, %v2066_v34  ;;  %v2057_v0 = vld [vmem:[#allocation2 + $0x1e0] sm:$0xff] }
 0x159   : > { %7260 = vst [vmem:[#allocation80_spill] sm:$0xff] %v4999_v25  ;;  %1791 = vmatprep.mubr.bf16.mxu0 %v7261_v39  ;;  %v5006_v18 = vpop.f32.mrf.mxu0  ;;  %1942 = vmatprep.mubr.bf16.mxu1 %v7261_v39  ;;  %v4023_v25 = vcombine.high %v2061_v32, %v2065_v28  ;;  %v4015_v47 = vcombine.high %v2053_v4, %v2057_v0  ;;  %v5032_v28 = vld [vmem:[#allocation2 + $0x298] sm:$0x77] }
 0x15a   : > { %7262 = vst [vmem:[#allocation81_spill] sm:$0xff] %v5006_v18  ;;  %v5008_v54 = vpop.f32.mrf.mxu1  ;;  %2468 = vmatpush1.bf16.msra.mxu1 %v2291_v10  ;;  %2318 = vmatprep.subr.bf16.mxu0 %v4031_v33  ;;  %v4024_v33 = vcombine.low %v2062_v55, %v2066_v34  ;;  %v4016_v55 = vcombine.low %v2054_v19, %v2058_v61 }
 0x15b   : > { %7263 = vst [vmem:[#allocation82_spill] sm:$0xff] %v5008_v54  ;;  %2469 = vmatprep.subr.bf16.mxu1 %v4033_v48  ;;  %v5011_v29 = vpop.f32.mrf.mxu0  ;;  %v4017_v48 = vcombine.high %v2054_v19, %v2058_v61  ;;  %v5059_v19 = vld [vmem:[%s4435_s13 + $0x10] sm:$0xff]  }
 0x15c   : > { %7264 = vst [vmem:[#allocation83_spill] sm:$0xff] %v5011_v29  ;;  %v5013_v23 = vpop.f32.mrf.mxu1  ;;  %2319 = vmatpush1.bf16.msra.mxu0 %v4030_v41  ;;  %v5030_v41 = vld [vmem:[#allocation2 + $0x290] sm:$0x77] }
 0x15d   : > { %7265 = vst [vmem:[#allocation84_spill] sm:$0xff] %v5013_v23  ;;  %v5015_v18 = vpop.f32.mrf.mxu0  ;;  %2320 = vmatprep.subr.bf16.mxu0 %v4023_v25  ;;  %v5024_v23 = vld [vmem:[%s4435_s13 + $0x8] sm:$0xff]   ;;  %v4043_v34 = vcombine.high %v5030_v41, %v5030_v41 }
 0x15e   : > { %7266 = vst [vmem:[#allocation85_spill] sm:$0xff] %v5015_v18  ;;  %v5017_v54 = vpop.f32.mrf.mxu1  ;;  %2470 = vmatpush1.bf16.msra.mxu1 %v4032_v30  ;;  %v4045_v30 = vcombine.high %v5032_v28, %v5032_v28 }
 0x15f   : > { %7267 = vst [vmem:[#allocation86_spill] sm:$0xff] %v5017_v54  ;;  %2471 = vmatprep.subr.bf16.mxu1 %v4025_v53  ;;  %v5019_v10 = vpop.f32.mrf.mxu0  ;;  %3989 = vmatmul.mubr.msk.bf16.gmra.mxu0 %vm591_vm2, %v5024_v23  ;;  %v4014_v53 = vcombine.low %v2053_v4, %v2057_v0  ;;  %v2059_v54 = vld [vmem:[#allocation2 + $0x1f0] sm:$0xff] }
 0x160   : > { %7268 = vst [vmem:[#allocation87_spill] sm:$0xff] %v5019_v10  ;;  %v5021_v29 = vpop.f32.mrf.mxu1  ;;  %4002 = vmatmul.mubr.msk.bf16.gmra.mxu1 %vm591_vm2, %v5024_v23  ;;  %1801 = vmatprep.mubr.bf16.mxu0 %v7261_v39 }
 0x161   : > { %7269 = vst [vmem:[#allocation88_spill] sm:$0xff] %v5021_v29  ;;  %1952 = vmatprep.mubr.bf16.mxu1 %v7261_v39  ;;  %v5036_v25 = vpop.f32.mrf.mxu0  ;;  %2321 = vmatpush1.bf16.msra.mxu0 %v4022_v40 }
 0x162   : > { %7270 = vst [vmem:[#allocation89_spill] sm:$0xff] %v5036_v25  ;;  %v5038_v32 = vpop.f32.mrf.mxu1  ;;  %2472 = vmatpush1.bf16.msra.mxu1 %v4024_v33  ;;  %2322 = vmatprep.subr.bf16.mxu0 %v4015_v47 }
 0x163   : > { %7271 = vst [vmem:[#allocation90_spill] sm:$0xff] %v5038_v32  ;;  %2473 = vmatprep.subr.bf16.mxu1 %v4017_v48  ;;  %v5044_v29 = vpop.f32.mrf.mxu0 }
 0x164   : > { %7272 = vst [vmem:[#allocation91_spill] sm:$0xff] %v5044_v29  ;;  %v5046_v10 = vpop.f32.mrf.mxu1 }
 0x165   : > { %7273 = vst [vmem:[#allocation92_spill] sm:$0xff] %v5046_v10  ;;  %v5048_v25 = vpop.f32.mrf.mxu0  ;;  %2323 = vmatpush1.bf16.msra.mxu0 %v4014_v53  ;;  %v2055_v10 = vld [vmem:[#allocation2 + $0x1d0] sm:$0xff] }
 0x166   : > { %7274 = vst [vmem:[#allocation93_spill] sm:$0xff] %v5048_v25  ;;  %v5050_v32 = vpop.f32.mrf.mxu1  ;;  %2474 = vmatpush1.bf16.msra.mxu1 %v4016_v55  ;;  %4072 = vmatprep.subr.msk.bf16.mxu0 %vm628_vm0, %v4043_v34 }
 0x167   : > { %7275 = vst [vmem:[#allocation94_spill] sm:$0xff] %v5050_v32  ;;  %4085 = vmatprep.subr.msk.bf16.mxu1 %vm628_vm0, %v4045_v30  ;;  %v5054_v4 = vpop.f32.mrf.mxu0  ;;  %3990 = vmatmul.mubr.msk.bf16.gmra.mxu0 %vm591_vm2, %v5059_v19  ;;  %v5084_v30 = vld [vmem:[%s4435_s13 + $0x18] sm:$0xff]  }
 0x168   : > { %7276 = vst [vmem:[#allocation95_spill] sm:$0xff] %v5054_v4  ;;  %v5056_v0 = vpop.f32.mrf.mxu1  ;;  %4003 = vmatmul.mubr.msk.bf16.gmra.mxu1 %vm591_vm2, %v5059_v19  ;;  %1811 = vmatprep.mubr.bf16.mxu0 %v7261_v39 }
 0x169   : > { %7277 = vst [vmem:[#allocation96_spill] sm:$0xff] %v5056_v0  ;;  %1962 = vmatprep.mubr.bf16.mxu1 %v7261_v39  ;;  %v5067_v61 = vpop.f32.mrf.mxu0  ;;  %v2067_v0 = vld [vmem:[#allocation2 + $0x230] sm:$0xff] }
 0x16a   : > { %7278 = vst [vmem:[#allocation97_spill] sm:$0xff] %v5067_v61  ;;  %v5069_v40 = vpop.f32.mrf.mxu1 }
 0x16b   : > { %7279 = vst [vmem:[#allocation98_spill] sm:$0xff] %v5069_v40  ;;  %v5071_v33 = vpop.f32.mrf.mxu0 }
 0x16c   : > { %7280 = vst [vmem:[#allocation99_spill] sm:$0xff] %v5071_v33  ;;  %v5073_v47 = vpop.f32.mrf.mxu1 }
 0x16d   : > { %7281 = vst [vmem:[#allocation100_spill] sm:$0xff] %v5073_v47  ;;  %v5075_v48 = vpop.f32.mrf.mxu0 }
 0x16e   : > { %7282 = vst [vmem:[#allocation101_spill] sm:$0xff] %v5075_v48  ;;  %v5077_v53 = vpop.f32.mrf.mxu1 }
 0x16f   : > { %7283 = vst [vmem:[#allocation102_spill] sm:$0xff] %v5077_v53  ;;  %v5079_v55 = vpop.f32.mrf.mxu0  ;;  %3991 = vmatmul.mubr.msk.bf16.gmra.mxu0 %vm591_vm2, %v5084_v30 }
 0x170   : > { %7284 = vst [vmem:[#allocation103_spill] sm:$0xff] %v5079_v55  ;;  %v5081_v34 = vpop.f32.mrf.mxu1  ;;  %4004 = vmatmul.mubr.msk.bf16.gmra.mxu1 %vm591_vm2, %v5084_v30  ;;  %1821 = vmatprep.mubr.bf16.mxu0 %v7261_v39 }
 0x171   : > { %7285 = vst [vmem:[#allocation104_spill] sm:$0xff] %v5081_v34  ;;  %1972 = vmatprep.mubr.bf16.mxu1 %v7261_v39  ;;  %v5092_v47 = vpop.f32.mrf.mxu0 }
 0x172   : > { %7286 = vst [vmem:[#allocation105_spill] sm:$0xff] %v5092_v47  ;;  %v5094_v48 = vpop.f32.mrf.mxu1 }
 0x173   : > { %7287 = vst [vmem:[#allocation106_spill] sm:$0xff] %v5094_v48  ;;  %v5096_v53 = vpop.f32.mrf.mxu0 }
 0x174   : > { %7288 = vst [vmem:[#allocation107_spill] sm:$0xff] %v5096_v53  ;;  %v5098_v55 = vpop.f32.mrf.mxu1 }
 0x175   : > { %7289 = vst [vmem:[#allocation108_spill] sm:$0xff] %v5098_v55  ;;  %v5100_v34 = vpop.f32.mrf.mxu0 }
 0x176   : > { %7290 = vst [vmem:[#allocation109_spill] sm:$0xff] %v5100_v34  ;;  %v5102_v33 = vpop.f32.mrf.mxu1 }
 0x177   : > { %7291 = vst [vmem:[#allocation110_spill] sm:$0xff] %v5102_v33  ;;  %v5104_v40 = vpop.f32.mrf.mxu0  ;;  %3992 = vmatmul.mubr.msk.bf16.gmra.mxu0 %vm591_vm2, %v4488_v24 }
 0x178   : > { %7292 = vst [vmem:[#allocation111_spill] sm:$0xff] %v5104_v40  ;;  %v5106_v61 = vpop.f32.mrf.mxu1  ;;  %4005 = vmatmul.mubr.msk.bf16.gmra.mxu1 %vm591_vm2, %v4488_v24  ;;  %1831 = vmatprep.mubr.bf16.mxu0 %v7261_v39 }
 0x179   : > { %7293 = vst [vmem:[#allocation112_spill] sm:$0xff] %v5106_v61  ;;  %1982 = vmatprep.mubr.bf16.mxu1 %v7261_v39  ;;  %v5114_v53 = vpop.f32.mrf.mxu0 }
 0x17a   : > { %7294 = vst [vmem:[#allocation113_spill] sm:$0xff] %v5114_v53  ;;  %v5116_v55 = vpop.f32.mrf.mxu1  ;;  %v2063_v53 = vld [vmem:[#allocation2 + $0x210] sm:$0xff] }
 0x17b   : > { %7295 = vst [vmem:[#allocation114_spill] sm:$0xff] %v5116_v55  ;;  %v5118_v34 = vpop.f32.mrf.mxu0  ;;  %v4027_v32 = vcombine.high %v2063_v53, %v2067_v0 }
 0x17c   : > { %7296 = vst [vmem:[#allocation115_spill] sm:$0xff] %v5118_v34  ;;  %v5120_v33 = vpop.f32.mrf.mxu1 }
 0x17d   : > { %7297 = vst [vmem:[#allocation116_spill] sm:$0xff] %v5120_v33  ;;  %v5122_v40 = vpop.f32.mrf.mxu0 }
 0x17e   : > { %7298 = vst [vmem:[#allocation117_spill] sm:$0xff] %v5122_v40  ;;  %v5124_v61 = vpop.f32.mrf.mxu1 }
 0x17f   : > { %7299 = vst [vmem:[#allocation118_spill] sm:$0xff] %v5124_v61  ;;  %v5126_v48 = vpop.f32.mrf.mxu0  ;;  %3993 = vmatmul.mubr.msk.bf16.gmra.mxu0 %vm591_vm2, %v4508_v36 }
 0x180   : > { %7300 = vst [vmem:[#allocation119_spill] sm:$0xff] %v5126_v48  ;;  %v5128_v47 = vpop.f32.mrf.mxu1  ;;  %4006 = vmatmul.mubr.msk.bf16.gmra.mxu1 %vm591_vm2, %v4508_v36  ;;  %1841 = vmatprep.mubr.bf16.mxu0 %v7261_v39 }
 0x181   : > { %7301 = vst [vmem:[#allocation120_spill] sm:$0xff] %v5128_v47  ;;  %1992 = vmatprep.mubr.bf16.mxu1 %v7261_v39  ;;  %v5136_v24 = vpop.f32.mrf.mxu0 }
 0x182   : > { %7302 = vst [vmem:[#allocation121_spill] sm:$0xff] %v5136_v24  ;;  %v5138_v33 = vpop.f32.mrf.mxu1 }
 0x183   : > { %7303 = vst [vmem:[#allocation122_spill] sm:$0xff] %v5138_v33  ;;  %v5140_v40 = vpop.f32.mrf.mxu0 }
 0x184   : > { %7304 = vst [vmem:[#allocation123_spill] sm:$0xff] %v5140_v40  ;;  %v5142_v61 = vpop.f32.mrf.mxu1 }
 0x185   : > { %7305 = vst [vmem:[#allocation124_spill] sm:$0xff] %v5142_v61  ;;  %v5144_v48 = vpop.f32.mrf.mxu0 }
 0x186   : > { %7306 = vst [vmem:[#allocation125_spill] sm:$0xff] %v5144_v48  ;;  %v5146_v47 = vpop.f32.mrf.mxu1 }
 0x187   : > { %7307 = vst [vmem:[#allocation126_spill] sm:$0xff] %v5146_v47  ;;  %v5148_v34 = vpop.f32.mrf.mxu0  ;;  %3994 = vmatmul.mubr.msk.bf16.gmra.mxu0 %vm591_vm2, %v4522_v42 }
 0x188   : > { %7308 = vst [vmem:[#allocation127_spill] sm:$0xff] %v5148_v34  ;;  %v5150_v55 = vpop.f32.mrf.mxu1  ;;  %4007 = vmatmul.mubr.msk.bf16.gmra.mxu1 %vm591_vm2, %v4522_v42  ;;  %1851 = vmatprep.mubr.bf16.mxu0 %v7261_v39 }
 0x189   : > { %7309 = vst [vmem:[#allocation128_spill] sm:$0xff] %v5150_v55  ;;  %2002 = vmatprep.mubr.bf16.mxu1 %v7261_v39  ;;  %v5158_v36 = vpop.f32.mrf.mxu0 }
 0x18a   : > { %7310 = vst [vmem:[#allocation129_spill] sm:$0xff] %v5158_v36  ;;  %v5160_v61 = vpop.f32.mrf.mxu1 }
 0x18b   : > { %7311 = vst [vmem:[#allocation130_spill] sm:$0xff] %v5160_v61  ;;  %v5162_v48 = vpop.f32.mrf.mxu0 }
 0x18c   : > { %7312 = vst [vmem:[#allocation131_spill] sm:$0xff] %v5162_v48  ;;  %v5164_v47 = vpop.f32.mrf.mxu1 }
 0x18d   : > { %7313 = vst [vmem:[#allocation132_spill] sm:$0xff] %v5164_v47  ;;  %v5166_v34 = vpop.f32.mrf.mxu0 }
 0x18e   : > { %7314 = vst [vmem:[#allocation133_spill] sm:$0xff] %v5166_v34  ;;  %v5168_v55 = vpop.f32.mrf.mxu1 }
 0x18f   : > { %7315 = vst [vmem:[#allocation134_spill] sm:$0xff] %v5168_v55  ;;  %v5170_v40 = vpop.f32.mrf.mxu0  ;;  %3995 = vmatmul.mubr.msk.bf16.gmra.mxu0 %vm591_vm2, %v4536_v49 }
 0x190   : > { %7316 = vst [vmem:[#allocation135_spill] sm:$0xff] %v5170_v40  ;;  %v5172_v33 = vpop.f32.mrf.mxu1  ;;  %4008 = vmatmul.mubr.msk.bf16.gmra.mxu1 %vm591_vm2, %v4536_v49  ;;  %1861 = vmatprep.mubr.bf16.mxu0 %v7261_v39 }
 0x191   : > { %7317 = vst [vmem:[#allocation136_spill] sm:$0xff] %v5172_v33  ;;  %2012 = vmatprep.mubr.bf16.mxu1 %v7261_v39  ;;  %v5180_v42 = vpop.f32.mrf.mxu0 }
 0x192   : > { %7318 = vst [vmem:[#allocation137_spill] sm:$0xff] %v5180_v42  ;;  %v5182_v47 = vpop.f32.mrf.mxu1  ;;  %v2076_v42 = vld [vmem:[#allocation2 + $0x278] sm:$0xff] }
 0x193   : > { %7319 = vst [vmem:[#allocation138_spill] sm:$0xff] %v5182_v47  ;;  %v5184_v34 = vpop.f32.mrf.mxu0 }
 0x194   : > { %7320 = vst [vmem:[#allocation139_spill] sm:$0xff] %v5184_v34  ;;  %v5186_v55 = vpop.f32.mrf.mxu1 }
 0x195   : > { %7321 = vst [vmem:[#allocation140_spill] sm:$0xff] %v5186_v55  ;;  %v5188_v40 = vpop.f32.mrf.mxu0 }
 0x196   : > { %7322 = vst [vmem:[#allocation141_spill] sm:$0xff] %v5188_v40  ;;  %v5190_v33 = vpop.f32.mrf.mxu1 }
 0x197   : > { %7323 = vst [vmem:[#allocation142_spill] sm:$0xff] %v5190_v33  ;;  %v5192_v48 = vpop.f32.mrf.mxu0  ;;  %3996 = vmatmul.mubr.msk.bf16.gmra.mxu0 %vm591_vm2, %v4550_v56 }
 0x198   : > { %7324 = vst [vmem:[#allocation143_spill] sm:$0xff] %v5192_v48  ;;  %v5194_v61 = vpop.f32.mrf.mxu1  ;;  %4009 = vmatmul.mubr.msk.bf16.gmra.mxu1 %vm591_vm2, %v4550_v56  ;;  %1871 = vmatprep.mubr.bf16.mxu0 %v7261_v39 }
 0x199   : > { %7325 = vst [vmem:[#allocation144_spill] sm:$0xff] %v5194_v61  ;;  %2022 = vmatprep.mubr.bf16.mxu1 %v7261_v39  ;;  %v5202_v49 = vpop.f32.mrf.mxu0 }
 0x19a   : > { %7326 = vst [vmem:[#allocation145_spill] sm:$0xff] %v5202_v49  ;;  %v5204_v55 = vpop.f32.mrf.mxu1 }
 0x19b   : > { %7327 = vst [vmem:[#allocation146_spill] sm:$0xff] %v5204_v55  ;;  %v5206_v40 = vpop.f32.mrf.mxu0 }
 0x19c   : > { %7328 = vst [vmem:[#allocation147_spill] sm:$0xff] %v5206_v40  ;;  %v5208_v33 = vpop.f32.mrf.mxu1 }
 0x19d   : > { %7329 = vst [vmem:[#allocation148_spill] sm:$0xff] %v5208_v33  ;;  %v5210_v48 = vpop.f32.mrf.mxu0 }
 0x19e   : > { %7330 = vst [vmem:[#allocation149_spill] sm:$0xff] %v5210_v48  ;;  %v5212_v61 = vpop.f32.mrf.mxu1 }
 0x19f   : > { %7331 = vst [vmem:[#allocation150_spill] sm:$0xff] %v5212_v61  ;;  %v5214_v34 = vpop.f32.mrf.mxu0  ;;  %3997 = vmatmul.mubr.msk.bf16.gmra.mxu0 %vm591_vm2, %v4564_v62 }
 0x1a0   : > { %7332 = vst [vmem:[#allocation151_spill] sm:$0xff] %v5214_v34  ;;  %v5216_v47 = vpop.f32.mrf.mxu1  ;;  %4010 = vmatmul.mubr.msk.bf16.gmra.mxu1 %vm591_vm2, %v4564_v62  ;;  %1881 = vmatprep.mubr.bf16.mxu0 %v7261_v39 }
 0x1a1   : > { %7333 = vst [vmem:[#allocation152_spill] sm:$0xff] %v5216_v47  ;;  %2032 = vmatprep.mubr.bf16.mxu1 %v7261_v39  ;;  %v5224_v56 = vpop.f32.mrf.mxu0 }
 0x1a2   : > { %7334 = vst [vmem:[#allocation153_spill] sm:$0xff] %v5224_v56  ;;  %v5226_v48 = vpop.f32.mrf.mxu1 }
 0x1a3   : > { %7335 = vst [vmem:[#allocation154_spill] sm:$0xff] %v5226_v48  ;;  %v5228_v61 = vpop.f32.mrf.mxu0 }
 0x1a4   : > { %7336 = vst [vmem:[#allocation155_spill] sm:$0xff] %v5228_v61  ;;  %v5230_v34 = vpop.f32.mrf.mxu1 }
 0x1a5   : > { %7337 = vst [vmem:[#allocation156_spill] sm:$0xff] %v5230_v34  ;;  %v5232_v47 = vpop.f32.mrf.mxu0 }
 0x1a6   : > { %7338 = vst [vmem:[#allocation157_spill] sm:$0xff] %v5232_v47  ;;  %v5234_v33 = vpop.f32.mrf.mxu1  ;;  %v2051_v47 = vld [vmem:[%s4435_s13] sm:$0xe] }
 0x1a7   : > { %7339 = vst [vmem:[#allocation158_spill] sm:$0xff] %v5234_v33  ;;  %v5236_v40 = vpop.f32.mrf.mxu0  ;;  %3998 = vmatmul.mubr.msk.bf16.gmra.mxu0 %vm591_vm2, %v4578_v6 }
 0x1a8   : > { %7340 = vst [vmem:[#allocation159_spill] sm:$0xff] %v5236_v40  ;;  %v5238_v62 = vpop.f32.mrf.mxu1  ;;  %4011 = vmatmul.mubr.msk.bf16.gmra.mxu1 %vm591_vm2, %v4578_v6  ;;  %1891 = vmatprep.mubr.bf16.mxu0 %v7261_v39 }
 0x1a9   : > { %7341 = vst [vmem:[#allocation160_spill] sm:$0xff] %v5238_v62  ;;  %2042 = vmatprep.mubr.bf16.mxu1 %v7261_v39  ;;  %v5246_v61 = vpop.f32.mrf.mxu0  ;;  %v4230_v62 = vld [vmem:[%s4435_s13 + $0x4] sm:$0xf] }
 0x1aa   : > { %7342 = vst [vmem:[#allocation161_spill] sm:$0xff] %v5246_v61  ;;  %v5248_v34 = vpop.f32.mrf.mxu1  ;;  %v4013_v48 = vcombine.low %v2051_v47, %v4230_v62  ;;  %v2086_v47 = vrot.slane %v5024_v23, 1  ;;  %v2072_v61 = vld [vmem:[#allocation2 + $0x258] sm:$0xff] }
 0x1ab   : > { %7343 = vst [vmem:[#allocation162_spill] sm:$0xff] %v5248_v34  ;;  %v5251_v33 = vpop.f32.mrf.mxu0  ;;  %v2075_v34 = vld [vmem:[#allocation2 + $0x270] sm:$0xff]  ;;  %v4036_v4 = vcombine.low %v2072_v61, %v2076_v42 }
 0x1ac   : > { %7344 = vst [vmem:[#allocation163_spill] sm:$0xff] %v5251_v33  ;;  %v5253_v40 = vpop.f32.mrf.mxu1 }
 0x1ad   : > { %7345 = vst [vmem:[#allocation164_spill] sm:$0xff] %v5253_v40  ;;  %v5256_v56 = vpop.f32.mrf.mxu0  ;;  %v2085_v40 = vrot.slane %v4013_v48, 1 }
 0x1ae   : > { %7346 = vst [vmem:[#allocation165_spill] sm:$0xff] %v5256_v56  ;;  %v5258_v55 = vpop.f32.mrf.mxu1  ;;  %v2071_v56 = vld [vmem:[#allocation2 + $0x250] sm:$0xff] }
 0x1af   : > { %7347 = vst [vmem:[#allocation166_spill] sm:$0xff] %v5258_v55  ;;  %v5260_v6 = vpop.f32.mrf.mxu0  ;;  %3999 = vmatmul.mubr.msk.bf16.gmra.mxu0 %vm591_vm2, %v4971_v60  ;;  %v5280_v48 = vsel %vm2084_vm3, %v2085_v40, %v2086_v47  ;;  %v4035_v24 = vcombine.high %v2071_v56, %v2075_v34  ;;  %v2064_v40 = vld [vmem:[#allocation2 + $0x218] sm:$0xff] }
 0x1b0   : > { %7348 = vst [vmem:[#allocation167_spill] sm:$0xff] %v5260_v6  ;;  %v5262_v49 = vpop.f32.mrf.mxu1  ;;  %4012 = vmatmul.mubr.msk.bf16.gmra.mxu1 %vm591_vm2, %v4971_v60  ;;  %2340 = vmatprep.mubr.bf16.mxu0 %v7261_v39  ;;  %v4044_v6 = vcombine.low %v5032_v28, %v5032_v28 }
 0x1b1   : > { %7349 = vst [vmem:[#allocation168_spill] sm:$0xff] %v5262_v49  ;;  %2491 = vmatprep.mubr.bf16.mxu1 %v7261_v39  ;;  %v5271_v62 = vpop.f32.mrf.mxu0  ;;  %v4042_v49 = vcombine.low %v5030_v41, %v5030_v41  ;;  %v4037_v41 = vcombine.high %v2072_v61, %v2076_v42  ;;  %v4026_v61 = vcombine.low %v2063_v53, %v2067_v0 }
 0x1b2   : > { %7350 = vst [vmem:[#allocation169_spill] sm:$0xff] %v5271_v62  ;;  %v5273_v55 = vpop.f32.mrf.mxu1  ;;  %v2303_v36 = vsel %vm628_vm0, %v4044_v6, 0  ;;  %v4034_v6 = vcombine.low %v2071_v56, %v2075_v34  ;;  %v2060_v34 = vld [vmem:[#allocation2 + $0x1f8] sm:$0xff]  ;;  %v4019_v42 = vcombine.high %v2055_v10, %v2059_v54  ;;  %v4018_v0 = vcombine.low %v2055_v10, %v2059_v54  ;;  %v4231_v10 = vld [vmem:[%s4435_s13 + $0x20] sm:$0xff]  }
 0x1b3   : > { %7351 = vst [vmem:[#allocation170_spill] sm:$0xff] %v5273_v55  ;;  %v1103_v60 = vpop.f32.mrf.mxu0  ;;  %v2297_v55 = vsel %vm628_vm0, %v4042_v49, 0  ;;  %v2088_v49 = vrot.slane %v5059_v19, 1  ;;  %v2056_v19 = vld [vmem:[#allocation2 + $0x1d8] sm:$0xff] }
 0x1b4   : > { %v1254_v33 = vpop.f32.mrf.mxu1  ;;  %v4020_v53 = vcombine.low %v2056_v19, %v2060_v34 }
 0x1b5   : > { %v1104_v23 = vpop.f32.mrf.mxu0  ;;  %v2068_v33 = vld [vmem:[#allocation2 + $0x238] sm:$0xff]  ;;  %v5304_v56 = vsel %vm2084_vm3, %v2086_v47, %v2088_v49 }
 0x1b6   : > { %v1255_v62 = vpop.f32.mrf.mxu1  ;;  %v4029_v25 = vcombine.high %v2064_v40, %v2068_v33 }
 0x1b7   : > { %v5284_v28 = vpop.f32.mrf.mxu0  ;;  %4047 = vmatmul.mubr.msk.bf16.vlgmr.msra.gmra.mxu0 %vm591_vm2, %v5280_v48 }
 0x1b8   : > { %v5286_v60 = vpop.f32.mrf.mxu1  ;;  %4060 = vmatmul.mubr.msk.bf16.vlgmr.msra.gmra.mxu1 %vm591_vm2, %v5280_v48  ;;  %2619 = vmatpush1.bf16.msra.mxu0 %v2297_v55 }
 0x1b9   : > { %2350 = vmatprep.mubr.bf16.mxu0 %v7261_v39  ;;  %v5294_v62 = vpop.f32.mrf.mxu0  ;;  %2501 = vmatprep.mubr.bf16.mxu1 %v7261_v39 }
 0x1ba   : > { %v5296_v23 = vpop.f32.mrf.mxu1  ;;  %2770 = vmatpush1.bf16.msra.mxu1 %v2303_v36  ;;  %2620 = vmatprep.subr.bf16.mxu0 %v4035_v24  ;;  %v4028_v24 = vcombine.low %v2064_v40, %v2068_v33 }
 0x1bb   : > { %2771 = vmatprep.subr.bf16.mxu1 %v4037_v41  ;;  %v5299_v29 = vpop.f32.mrf.mxu0  ;;  %v4021_v41 = vcombine.high %v2056_v19, %v2060_v34 }
 0x1bc   : > { %v5301_v55 = vpop.f32.mrf.mxu1  ;;  %2621 = vmatpush1.bf16.msra.mxu0 %v4034_v6 }
 0x1bd   : > { %v5306_v18 = vpop.f32.mrf.mxu0  ;;  %2622 = vmatprep.subr.bf16.mxu0 %v4027_v32  ;;  %v2090_v32 = vrot.slane %v5084_v30, 1 }
 0x1be   : > { %v5308_v36 = vpop.f32.mrf.mxu1  ;;  %2772 = vmatpush1.bf16.msra.mxu1 %v4036_v4 }
 0x1bf   : > { %2773 = vmatprep.subr.bf16.mxu1 %v4029_v25  ;;  %v5310_v22 = vpop.f32.mrf.mxu0  ;;  %4048 = vmatmul.mubr.msk.bf16.gmra.mxu0 %vm591_vm2, %v5304_v56  ;;  %v5330_v33 = vsel %vm2084_vm3, %v2088_v49, %v2090_v32  ;;  %v2092_v49 = vrot.slane %v4231_v10, 1 }
 0x1c0   : > { %v5312_v17 = vpop.f32.mrf.mxu1  ;;  %4061 = vmatmul.mubr.msk.bf16.gmra.mxu1 %vm591_vm2, %v5304_v56  ;;  %2360 = vmatprep.mubr.bf16.mxu0 %v7261_v39 }
 0x1c1   : > { %2511 = vmatprep.mubr.bf16.mxu1 %v7261_v39  ;;  %v5321_v4 = vpop.f32.mrf.mxu0  ;;  %2623 = vmatpush1.bf16.msra.mxu0 %v4026_v61 }
 0x1c2   : > { %v5323_v25 = vpop.f32.mrf.mxu1  ;;  %2774 = vmatpush1.bf16.msra.mxu1 %v4028_v24  ;;  %2624 = vmatprep.subr.bf16.mxu0 %v4019_v42 }
 0x1c3   : > { %2775 = vmatprep.subr.bf16.mxu1 %v4021_v41  ;;  %v5325_v47 = vpop.f32.mrf.mxu0  ;;  %v5356_v41 = vsel %vm2084_vm3, %v2090_v32, %v2092_v49  ;;  %v4232_v32 = vld [vmem:[%s4435_s13 + $0x28] sm:$0xff]  }
 0x1c4   : > { %v5327_v40 = vpop.f32.mrf.mxu1  ;;  %v2094_v10 = vrot.slane %v4232_v32, 1 }
 0x1c5   : > { %v5332_v6 = vpop.f32.mrf.mxu0  ;;  %2625 = vmatpush1.bf16.msra.mxu0 %v4018_v0 }
 0x1c6   : > { %v5334_v30 = vpop.f32.mrf.mxu1  ;;  %2776 = vmatpush1.bf16.msra.mxu1 %v4020_v53  ;;  %v5382_v7 = vsel %vm2084_vm3, %v2092_v49, %v2094_v10  ;;  %v4233_v49 = vld [vmem:[%s4435_s13 + $0x30] sm:$0xff]  }
 0x1c7   : > { %v5336_v61 = vpop.f32.mrf.mxu0  ;;  %4049 = vmatmul.mubr.msk.bf16.gmra.mxu0 %vm591_vm2, %v5330_v33  ;;  %v2096_v32 = vrot.slane %v4233_v49, 1 }
 0x1c8   : > { %v5338_v54 = vpop.f32.mrf.mxu1  ;;  %4062 = vmatmul.mubr.msk.bf16.gmra.mxu1 %vm591_vm2, %v5330_v33  ;;  %2370 = vmatprep.mubr.bf16.mxu0 %v7261_v39 }
 0x1c9   : > { %2521 = vmatprep.mubr.bf16.mxu1 %v7261_v39  ;;  %v5347_v19 = vpop.f32.mrf.mxu0 }
 0x1ca   : > { %v5349_v34 = vpop.f32.mrf.mxu1 }
 0x1cb   : > { %v5351_v24 = vpop.f32.mrf.mxu0 }
 0x1cc   : > { %7352 = vst [vmem:[#allocation171_spill] sm:$0xff] %v5351_v24  ;;  %v5353_v42 = vpop.f32.mrf.mxu1 }
 0x1cd   : > { %7353 = vst [vmem:[#allocation172_spill] sm:$0xff] %v5353_v42  ;;  %v5358_v0 = vpop.f32.mrf.mxu0 }
 0x1ce   : > { %7354 = vst [vmem:[#allocation173_spill] sm:$0xff] %v5358_v0  ;;  %v5360_v53 = vpop.f32.mrf.mxu1 }
 0x1cf   : > { %7355 = vst [vmem:[#allocation174_spill] sm:$0xff] %v5360_v53  ;;  %v5362_v16 = vpop.f32.mrf.mxu0  ;;  %4050 = vmatmul.mubr.msk.bf16.gmra.mxu0 %vm591_vm2, %v5356_v41 }
 0x1d0   : > { %7356 = vst [vmem:[#allocation175_spill] sm:$0xff] %v5362_v16  ;;  %v5364_v14 = vpop.f32.mrf.mxu1  ;;  %4063 = vmatmul.mubr.msk.bf16.gmra.mxu1 %vm591_vm2, %v5356_v41  ;;  %2380 = vmatprep.mubr.bf16.mxu0 %v7261_v39 }
 0x1d1   : > { %7357 = vst [vmem:[#allocation176_spill] sm:$0xff] %v5364_v14  ;;  %2531 = vmatprep.mubr.bf16.mxu1 %v7261_v39  ;;  %v5373_v12 = vpop.f32.mrf.mxu0 }
 0x1d2   : > { %7358 = vst [vmem:[#allocation177_spill] sm:$0xff] %v5373_v12  ;;  %v5375_v11 = vpop.f32.mrf.mxu1 }
 0x1d3   : > { %7359 = vst [vmem:[#allocation178_spill] sm:$0xff] %v5375_v11  ;;  %v5377_v45 = vpop.f32.mrf.mxu0 }
 0x1d4   : > { %7360 = vst [vmem:[#allocation179_spill] sm:$0xff] %v5377_v45  ;;  %v5379_v14 = vpop.f32.mrf.mxu1 }
 0x1d5   : > { %7361 = vst [vmem:[#allocation180_spill] sm:$0xff] %v5379_v14  ;;  %v5384_v16 = vpop.f32.mrf.mxu0  ;;  %v5408_v14 = vsel %vm2084_vm3, %v2094_v10, %v2096_v32  ;;  %v4234_v10 = vld [vmem:[%s4435_s13 + $0x38] sm:$0xff]  }
 0x1d6   : > { %7362 = vst [vmem:[#allocation181_spill] sm:$0xff] %v5384_v16  ;;  %v5386_v63 = vpop.f32.mrf.mxu1  ;;  %v2098_v49 = vrot.slane %v4234_v10, 1 }
 0x1d7   : > { %7363 = vst [vmem:[#allocation182_spill] sm:$0xff] %v5386_v63  ;;  %v5388_v53 = vpop.f32.mrf.mxu0  ;;  %4051 = vmatmul.mubr.msk.bf16.gmra.mxu0 %vm591_vm2, %v5382_v7 }
 0x1d8   : > { %7364 = vst [vmem:[#allocation183_spill] sm:$0xff] %v5388_v53  ;;  %v5390_v57 = vpop.f32.mrf.mxu1  ;;  %4064 = vmatmul.mubr.msk.bf16.gmra.mxu1 %vm591_vm2, %v5382_v7  ;;  %2390 = vmatprep.mubr.bf16.mxu0 %v7261_v39 }
 0x1d9   : > { %7365 = vst [vmem:[#allocation184_spill] sm:$0xff] %v5390_v57  ;;  %2541 = vmatprep.mubr.bf16.mxu1 %v7261_v39  ;;  %v5399_v16 = vpop.f32.mrf.mxu0 }
 0x1da   : > { %7366 = vst [vmem:[#allocation185_spill] sm:$0xff] %v5399_v16  ;;  %v5401_v63 = vpop.f32.mrf.mxu1 }
 0x1db   : > { %7367 = vst [vmem:[#allocation186_spill] sm:$0xff] %v5401_v63  ;;  %v5403_v53 = vpop.f32.mrf.mxu0 }
 0x1dc   : > { %7368 = vst [vmem:[#allocation187_spill] sm:$0xff] %v5403_v53  ;;  %v5405_v57 = vpop.f32.mrf.mxu1 }
 0x1dd   : > { %7369 = vst [vmem:[#allocation188_spill] sm:$0xff] %v5405_v57  ;;  %v5410_v45 = vpop.f32.mrf.mxu0  ;;  %v5434_v57 = vsel %vm2084_vm3, %v2096_v32, %v2098_v49  ;;  %v4235_v32 = vld [vmem:[%s4435_s13 + $0x40] sm:$0xff]  }
 0x1de   : > { %7370 = vst [vmem:[#allocation189_spill] sm:$0xff] %v5410_v45  ;;  %v5412_v11 = vpop.f32.mrf.mxu1  ;;  %v2100_v10 = vrot.slane %v4235_v32, 1 }
 0x1df   : > { %7371 = vst [vmem:[#allocation190_spill] sm:$0xff] %v5412_v11  ;;  %v5414_v12 = vpop.f32.mrf.mxu0  ;;  %4052 = vmatmul.mubr.msk.bf16.gmra.mxu0 %vm591_vm2, %v5408_v14 }
 0x1e0   : > { %7372 = vst [vmem:[#allocation191_spill] sm:$0xff] %v5414_v12  ;;  %v5416_v0 = vpop.f32.mrf.mxu1  ;;  %4065 = vmatmul.mubr.msk.bf16.gmra.mxu1 %vm591_vm2, %v5408_v14  ;;  %2400 = vmatprep.mubr.bf16.mxu0 %v7261_v39 }
 0x1e1   : > { %7373 = vst [vmem:[#allocation192_spill] sm:$0xff] %v5416_v0  ;;  %2551 = vmatprep.mubr.bf16.mxu1 %v7261_v39  ;;  %v5425_v45 = vpop.f32.mrf.mxu0 }
 0x1e2   : > { %7374 = vst [vmem:[#allocation193_spill] sm:$0xff] %v5425_v45  ;;  %v5427_v11 = vpop.f32.mrf.mxu1 }
 0x1e3   : > { %7375 = vst [vmem:[#allocation194_spill] sm:$0xff] %v5427_v11  ;;  %v5429_v12 = vpop.f32.mrf.mxu0 }
 0x1e4   : > { %7376 = vst [vmem:[#allocation195_spill] sm:$0xff] %v5429_v12  ;;  %v5431_v0 = vpop.f32.mrf.mxu1 }
 0x1e5   : > { %7377 = vst [vmem:[#allocation196_spill] sm:$0xff] %v5431_v0  ;;  %v5436_v53 = vpop.f32.mrf.mxu0  ;;  %v5460_v0 = vsel %vm2084_vm3, %v2098_v49, %v2100_v10  ;;  %v4236_v49 = vld [vmem:[%s4435_s13 + $0x48] sm:$0xff]  }
 0x1e6   : > { %7378 = vst [vmem:[#allocation197_spill] sm:$0xff] %v5436_v53  ;;  %v5438_v63 = vpop.f32.mrf.mxu1  ;;  %v2102_v32 = vrot.slane %v4236_v49, 1 }
 0x1e7   : > { %7379 = vst [vmem:[#allocation198_spill] sm:$0xff] %v5438_v63  ;;  %v5440_v16 = vpop.f32.mrf.mxu0  ;;  %4053 = vmatmul.mubr.msk.bf16.gmra.mxu0 %vm591_vm2, %v5434_v57 }
 0x1e8   : > { %7380 = vst [vmem:[#allocation199_spill] sm:$0xff] %v5440_v16  ;;  %v5442_v50 = vpop.f32.mrf.mxu1  ;;  %4066 = vmatmul.mubr.msk.bf16.gmra.mxu1 %vm591_vm2, %v5434_v57  ;;  %2410 = vmatprep.mubr.bf16.mxu0 %v7261_v39 }
 0x1e9   : > { %7381 = vst [vmem:[#allocation200_spill] sm:$0xff] %v5442_v50  ;;  %2561 = vmatprep.mubr.bf16.mxu1 %v7261_v39  ;;  %v5451_v53 = vpop.f32.mrf.mxu0 }
 0x1ea   : > { %7382 = vst [vmem:[#allocation201_spill] sm:$0xff] %v5451_v53  ;;  %v5453_v63 = vpop.f32.mrf.mxu1 }
 0x1eb   : > { %7383 = vst [vmem:[#allocation202_spill] sm:$0xff] %v5453_v63  ;;  %v5455_v16 = vpop.f32.mrf.mxu0 }
 0x1ec   : > { %7384 = vst [vmem:[#allocation203_spill] sm:$0xff] %v5455_v16  ;;  %v5457_v50 = vpop.f32.mrf.mxu1 }
 0x1ed   : > { %7385 = vst [vmem:[#allocation204_spill] sm:$0xff] %v5457_v50  ;;  %v5462_v12 = vpop.f32.mrf.mxu0  ;;  %v5486_v50 = vsel %vm2084_vm3, %v2100_v10, %v2102_v32  ;;  %v4237_v10 = vld [vmem:[%s4435_s13 + $0x50] sm:$0xff]  }
 0x1ee   : > { %7386 = vst [vmem:[#allocation205_spill] sm:$0xff] %v5462_v12  ;;  %v5464_v11 = vpop.f32.mrf.mxu1  ;;  %v2104_v49 = vrot.slane %v4237_v10, 1  ;;  %v5527_v10 = vrot.slane %v4596_v15, 1 }
 0x1ef   : > { %7387 = vst [vmem:[#allocation206_spill] sm:$0xff] %v5464_v11  ;;  %v5466_v45 = vpop.f32.mrf.mxu0  ;;  %4054 = vmatmul.mubr.msk.bf16.gmra.mxu0 %vm591_vm2, %v5460_v0 }
 0x1f0   : > { %7388 = vst [vmem:[#allocation207_spill] sm:$0xff] %v5466_v45  ;;  %v5468_v42 = vpop.f32.mrf.mxu1  ;;  %4067 = vmatmul.mubr.msk.bf16.gmra.mxu1 %vm591_vm2, %v5460_v0  ;;  %2420 = vmatprep.mubr.bf16.mxu0 %v7261_v39 }
 0x1f1   : > { %7389 = vst [vmem:[#allocation208_spill] sm:$0xff] %v5468_v42  ;;  %2571 = vmatprep.mubr.bf16.mxu1 %v7261_v39  ;;  %v5477_v12 = vpop.f32.mrf.mxu0 }
 0x1f2   : > { %7390 = vst [vmem:[#allocation209_spill] sm:$0xff] %v5477_v12  ;;  %v5479_v11 = vpop.f32.mrf.mxu1 }
 0x1f3   : > { %7391 = vst [vmem:[#allocation210_spill] sm:$0xff] %v5479_v11  ;;  %v5481_v45 = vpop.f32.mrf.mxu0 }
 0x1f4   : > { %7392 = vst [vmem:[#allocation211_spill] sm:$0xff] %v5481_v45  ;;  %v5483_v42 = vpop.f32.mrf.mxu1 }
 0x1f5   : > { %7393 = vst [vmem:[#allocation212_spill] sm:$0xff] %v5483_v42  ;;  %v5488_v16 = vpop.f32.mrf.mxu0 }
 0x1f6   : > { %7394 = vst [vmem:[#allocation213_spill] sm:$0xff] %v5488_v16  ;;  %v5490_v63 = vpop.f32.mrf.mxu1 }
 0x1f7   : > { %7395 = vst [vmem:[#allocation214_spill] sm:$0xff] %v5490_v63  ;;  %v5492_v53 = vpop.f32.mrf.mxu0  ;;  %4055 = vmatmul.mubr.msk.bf16.gmra.mxu0 %vm591_vm2, %v5486_v50 }
 0x1f8   : > { %7396 = vst [vmem:[#allocation215_spill] sm:$0xff] %v5492_v53  ;;  %v5494_v43 = vpop.f32.mrf.mxu1  ;;  %4068 = vmatmul.mubr.msk.bf16.gmra.mxu1 %vm591_vm2, %v5486_v50  ;;  %2430 = vmatprep.mubr.bf16.mxu0 %v7261_v39 }
 0x1f9   : > { %7397 = vst [vmem:[#allocation216_spill] sm:$0xff] %v5494_v43  ;;  %2581 = vmatprep.mubr.bf16.mxu1 %v7261_v39  ;;  %v5503_v42 = vpop.f32.mrf.mxu0  ;;  %v5512_v43 = vsel %vm2084_vm3, %v2102_v32, %v2104_v49 }
 0x1fa   : > { %v5505_v16 = vpop.f32.mrf.mxu1 }
 0x1fb   : > { %7398 = vst [vmem:[#allocation217_spill] sm:$0xff] %v5505_v16  ;;  %v5507_v63 = vpop.f32.mrf.mxu0 }
 0x1fc   : > { %7399 = vst [vmem:[#allocation218_spill] sm:$0xff] %v5507_v63  ;;  %v5509_v53 = vpop.f32.mrf.mxu1 }
 0x1fd   : > { %7400 = vst [vmem:[#allocation219_spill] sm:$0xff] %v5509_v53  ;;  %v5514_v45 = vpop.f32.mrf.mxu0 }
 0x1fe   : > { %7401 = vst [vmem:[#allocation220_spill] sm:$0xff] %v5514_v45  ;;  %v5516_v11 = vpop.f32.mrf.mxu1  ;;  %v5541_v45 = vsel %vm2084_vm3, %v2104_v49, %v5527_v10 }
 0x1ff   : > { %7402 = vst [vmem:[#allocation221_spill] sm:$0xff] %v5516_v11  ;;  %v5518_v12 = vpop.f32.mrf.mxu0  ;;  %4056 = vmatmul.mubr.msk.bf16.gmra.mxu0 %vm591_vm2, %v5512_v43 }
 0x200   : > { %7403 = vst [vmem:[#allocation222_spill] sm:$0xff] %v5518_v12  ;;  %v5520_v24 = vpop.f32.mrf.mxu1  ;;  %4069 = vmatmul.mubr.msk.bf16.gmra.mxu1 %vm591_vm2, %v5512_v43  ;;  %2440 = vmatprep.mubr.bf16.mxu0 %v7261_v39 }
 0x201   : > { %7404 = vst [vmem:[#allocation223_spill] sm:$0xff] %v5520_v24  ;;  %2591 = vmatprep.mubr.bf16.mxu1 %v7261_v39  ;;  %v5531_v32 = vpop.f32.mrf.mxu0 }
 0x202   : > { %v5533_v11 = vpop.f32.mrf.mxu1 }
 0x203   : > { %7405 = vst [vmem:[#allocation224_spill] sm:$0xff] %v5533_v11  ;;  %v5535_v12 = vpop.f32.mrf.mxu0 }
 0x204   : > { %7406 = vst [vmem:[#allocation225_spill] sm:$0xff] %v5535_v12  ;;  %v5537_v24 = vpop.f32.mrf.mxu1 }
 0x205   : > { %7407 = vst [vmem:[#allocation226_spill] sm:$0xff] %v5537_v24  ;;  %v5543_v53 = vpop.f32.mrf.mxu0 }
 0x206   : > { %7408 = vst [vmem:[#allocation227_spill] sm:$0xff] %v5543_v53  ;;  %v5545_v15 = vpop.f32.mrf.mxu1 }
 0x207   : > { %7409 = vst [vmem:[#allocation228_spill] sm:$0xff] %v5545_v15  ;;  %v5547_v63 = vpop.f32.mrf.mxu0  ;;  %4057 = vmatmul.mubr.msk.bf16.gmra.mxu0 %vm591_vm2, %v5541_v45 }
 0x208   : > { %7410 = vst [vmem:[#allocation229_spill] sm:$0xff] %v5547_v63  ;;  %v5549_v16 = vpop.f32.mrf.mxu1  ;;  %4070 = vmatmul.mubr.msk.bf16.gmra.mxu1 %vm591_vm2, %v5541_v45  ;;  %2450 = vmatprep.mubr.bf16.mxu0 %v7261_v39 }
 0x209   : > { %7411 = vst [vmem:[#allocation230_spill] sm:$0xff] %v5549_v16  ;;  %2601 = vmatprep.mubr.bf16.mxu1 %v7261_v39  ;;  %v5557_v49 = vpop.f32.mrf.mxu0 }
 0x20a   : > { %7412 = vst [vmem:[#allocation231_spill] sm:$0xff] %v5557_v49  ;;  %v5559_v24 = vpop.f32.mrf.mxu1 }
 0x20b   : > { %7413 = vst [vmem:[#allocation232_spill] sm:$0xff] %v5559_v24  ;;  %v5561_v53 = vpop.f32.mrf.mxu0 }
 0x20c   : > { %7414 = vst [vmem:[#allocation233_spill] sm:$0xff] %v5561_v53  ;;  %v5563_v15 = vpop.f32.mrf.mxu1 }
 0x20d   : > { %7415 = vst [vmem:[#allocation234_spill] sm:$0xff] %v5563_v15  ;;  %v5565_v63 = vpop.f32.mrf.mxu0 }
 0x20e   : > { %7416 = vst [vmem:[#allocation235_spill] sm:$0xff] %v5565_v63  ;;  %v5567_v16 = vpop.f32.mrf.mxu1 }
 0x20f   : > { %7417 = vst [vmem:[#allocation236_spill] sm:$0xff] %v5567_v16  ;;  %v5569_v12 = vpop.f32.mrf.mxu0  ;;  %4058 = vmatmul.mubr.msk.bf16.gmra.mxu0 %vm591_vm2, %v5527_v10 }
 0x210   : > { %7418 = vst [vmem:[#allocation237_spill] sm:$0xff] %v5569_v12  ;;  %v5571_v11 = vpop.f32.mrf.mxu1  ;;  %4071 = vmatmul.mubr.msk.bf16.gmra.mxu1 %vm591_vm2, %v5527_v10  ;;  %2642 = vmatprep.mubr.bf16.mxu0 %v7261_v39 }
 0x211   : > { %7419 = vst [vmem:[#allocation238_spill] sm:$0xff] %v5571_v11  ;;  %2793 = vmatprep.mubr.bf16.mxu1 %v7261_v39  ;;  %v5579_v53 = vpop.f32.mrf.mxu0 }
 0x212   : > { %7420 = vst [vmem:[#allocation239_spill] sm:$0xff] %v5579_v53  ;;  %v5581_v15 = vpop.f32.mrf.mxu1 }
 0x213   : > { %7421 = vst [vmem:[#allocation240_spill] sm:$0xff] %v5581_v15  ;;  %v1595_v63 = vpop.f32.mrf.mxu0 }
 0x214   : > { %v1746_v16 = vpop.f32.mrf.mxu1 }
 0x215   : > { %v1596_v24 = vpop.f32.mrf.mxu0 }
 0x216   : > { %v1747_v12 = vpop.f32.mrf.mxu1 }
 0x217   : > { %v5583_v49 = vpop.f32.mrf.mxu0  ;;  %4073 = vmatmul.mubr.msk.bf16.vlgmr.msra.gmra.mxu0 %vm591_vm2, %v5280_v48 }
 0x218   : > { %7422 = vst [vmem:[#allocation241_spill] sm:$0xff] %v5583_v49  ;;  %v5585_v11 = vpop.f32.mrf.mxu1  ;;  %4086 = vmatmul.mubr.msk.bf16.vlgmr.msra.gmra.mxu1 %vm591_vm2, %v5280_v48  ;;  %2652 = vmatprep.mubr.bf16.mxu0 %v7261_v39 }
 0x219   : > { %7423 = vst [vmem:[#allocation242_spill] sm:$0xff] %v5585_v11  ;;  %2803 = vmatprep.mubr.bf16.mxu1 %v7261_v39  ;;  %v5593_v53 = vpop.f32.mrf.mxu0 }
 0x21a   : > { %v5595_v63 = vpop.f32.mrf.mxu1 }
 0x21b   : > { %7424 = vst [vmem:[#allocation243_spill] sm:$0xff] %v5595_v63  ;;  %v5597_v16 = vpop.f32.mrf.mxu0 }
 0x21c   : > { %7425 = vst [vmem:[#allocation244_spill] sm:$0xff] %v5597_v16  ;;  %v5599_v12 = vpop.f32.mrf.mxu1 }
 0x21d   : > { %7426 = vst [vmem:[#allocation245_spill] sm:$0xff] %v5599_v12  ;;  %v5601_v24 = vpop.f32.mrf.mxu0 }
 0x21e   : > { %7427 = vst [vmem:[#allocation246_spill] sm:$0xff] %v5601_v24  ;;  %v5603_v11 = vpop.f32.mrf.mxu1 }
 0x21f   : > { %7428 = vst [vmem:[#allocation247_spill] sm:$0xff] %v5603_v11  ;;  %v5605_v49 = vpop.f32.mrf.mxu0  ;;  %4074 = vmatmul.mubr.msk.bf16.gmra.mxu0 %vm591_vm2, %v5304_v56 }
 0x220   : > { %7429 = vst [vmem:[#allocation248_spill] sm:$0xff] %v5605_v49  ;;  %v5607_v15 = vpop.f32.mrf.mxu1  ;;  %4087 = vmatmul.mubr.msk.bf16.gmra.mxu1 %vm591_vm2, %v5304_v56  ;;  %2662 = vmatprep.mubr.bf16.mxu0 %v7261_v39 }
 0x221   : > { %7430 = vst [vmem:[#allocation249_spill] sm:$0xff] %v5607_v15  ;;  %2813 = vmatprep.mubr.bf16.mxu1 %v7261_v39  ;;  %v5615_v48 = vpop.f32.mrf.mxu0 }
 0x222   : > { %7431 = vst [vmem:[#allocation250_spill] sm:$0xff] %v5615_v48  ;;  %v5617_v12 = vpop.f32.mrf.mxu1  ;;  %v7621_v48 = vld [vmem:[#allocation192_spill] sm:$0xff] }
 0x223   : > { %7432 = vst [vmem:[#allocation251_spill] sm:$0xff] %v5617_v12  ;;  %v5619_v24 = vpop.f32.mrf.mxu0 }
 0x224   : > { %7433 = vst [vmem:[#allocation252_spill] sm:$0xff] %v5619_v24  ;;  %v5621_v11 = vpop.f32.mrf.mxu1 }
 0x225   : > { %7434 = vst [vmem:[#allocation253_spill] sm:$0xff] %v5621_v11  ;;  %v5623_v49 = vpop.f32.mrf.mxu0 }
 0x226   : > { %7435 = vst [vmem:[#allocation254_spill] sm:$0xff] %v5623_v49  ;;  %v5625_v15 = vpop.f32.mrf.mxu1 }
 0x227   : > { %7436 = vst [vmem:[#allocation255_spill] sm:$0xff] %v5625_v15  ;;  %v5627_v16 = vpop.f32.mrf.mxu0  ;;  %4075 = vmatmul.mubr.msk.bf16.gmra.mxu0 %vm591_vm2, %v5330_v33 }
 0x228   : > { %7437 = vst [vmem:[#allocation256_spill] sm:$0xff] %v5627_v16  ;;  %v5629_v63 = vpop.f32.mrf.mxu1  ;;  %4088 = vmatmul.mubr.msk.bf16.gmra.mxu1 %vm591_vm2, %v5330_v33  ;;  %2672 = vmatprep.mubr.bf16.mxu0 %v7261_v39 }
 0x229   : > { %7438 = vst [vmem:[#allocation257_spill] sm:$0xff] %v5629_v63  ;;  %2823 = vmatprep.mubr.bf16.mxu1 %v7261_v39  ;;  %v5637_v56 = vpop.f32.mrf.mxu0 }
 0x22a   : > { %7439 = vst [vmem:[#allocation258_spill] sm:$0xff] %v5637_v56  ;;  %v5639_v11 = vpop.f32.mrf.mxu1  ;;  %v7571_v56 = vld [vmem:[#allocation175_spill] sm:$0xff] }
 0x22b   : > { %7440 = vst [vmem:[#allocation259_spill] sm:$0xff] %v5639_v11  ;;  %v5641_v49 = vpop.f32.mrf.mxu0 }
 0x22c   : > { %7441 = vst [vmem:[#allocation260_spill] sm:$0xff] %v5641_v49  ;;  %v5643_v15 = vpop.f32.mrf.mxu1 }
 0x22d   : > { %7442 = vst [vmem:[#allocation261_spill] sm:$0xff] %v5643_v15  ;;  %v5645_v16 = vpop.f32.mrf.mxu0 }
 0x22e   : > { %7443 = vst [vmem:[#allocation262_spill] sm:$0xff] %v5645_v16  ;;  %v5647_v63 = vpop.f32.mrf.mxu1 }
 0x22f   : > { %7444 = vst [vmem:[#allocation263_spill] sm:$0xff] %v5647_v63  ;;  %v5649_v24 = vpop.f32.mrf.mxu0  ;;  %4076 = vmatmul.mubr.msk.bf16.gmra.mxu0 %vm591_vm2, %v5356_v41 }
 0x230   : > { %7445 = vst [vmem:[#allocation264_spill] sm:$0xff] %v5649_v24  ;;  %v5651_v12 = vpop.f32.mrf.mxu1  ;;  %4089 = vmatmul.mubr.msk.bf16.gmra.mxu1 %vm591_vm2, %v5356_v41  ;;  %2682 = vmatprep.mubr.bf16.mxu0 %v7261_v39 }
 0x231   : > { %7446 = vst [vmem:[#allocation265_spill] sm:$0xff] %v5651_v12  ;;  %2833 = vmatprep.mubr.bf16.mxu1 %v7261_v39  ;;  %v5659_v33 = vpop.f32.mrf.mxu0 }
 0x232   : > { %7447 = vst [vmem:[#allocation266_spill] sm:$0xff] %v5659_v33  ;;  %v5661_v15 = vpop.f32.mrf.mxu1 }
 0x233   : > { %7448 = vst [vmem:[#allocation267_spill] sm:$0xff] %v5661_v15  ;;  %v5663_v16 = vpop.f32.mrf.mxu0 }
 0x234   : > { %7449 = vst [vmem:[#allocation268_spill] sm:$0xff] %v5663_v16  ;;  %v5665_v63 = vpop.f32.mrf.mxu1 }
 0x235   : > { %7450 = vst [vmem:[#allocation269_spill] sm:$0xff] %v5665_v63  ;;  %v5667_v24 = vpop.f32.mrf.mxu0 }
 0x236   : > { %7451 = vst [vmem:[#allocation270_spill] sm:$0xff] %v5667_v24  ;;  %v5669_v12 = vpop.f32.mrf.mxu1 }
 0x237   : > { %7452 = vst [vmem:[#allocation271_spill] sm:$0xff] %v5669_v12  ;;  %v5671_v49 = vpop.f32.mrf.mxu0  ;;  %4077 = vmatmul.mubr.msk.bf16.gmra.mxu0 %vm591_vm2, %v5382_v7 }
 0x238   : > { %7453 = vst [vmem:[#allocation272_spill] sm:$0xff] %v5671_v49  ;;  %v5673_v11 = vpop.f32.mrf.mxu1  ;;  %4090 = vmatmul.mubr.msk.bf16.gmra.mxu1 %vm591_vm2, %v5382_v7  ;;  %2692 = vmatprep.mubr.bf16.mxu0 %v7261_v39 }
 0x239   : > { %7454 = vst [vmem:[#allocation273_spill] sm:$0xff] %v5673_v11  ;;  %2843 = vmatprep.mubr.bf16.mxu1 %v7261_v39  ;;  %v5681_v41 = vpop.f32.mrf.mxu0 }
 0x23a   : > { %7455 = vst [vmem:[#allocation274_spill] sm:$0xff] %v5681_v41  ;;  %v5683_v63 = vpop.f32.mrf.mxu1 }
 0x23b   : > { %7456 = vst [vmem:[#allocation275_spill] sm:$0xff] %v5683_v63  ;;  %v5685_v24 = vpop.f32.mrf.mxu0 }
 0x23c   : > { %7457 = vst [vmem:[#allocation276_spill] sm:$0xff] %v5685_v24  ;;  %v5687_v12 = vpop.f32.mrf.mxu1 }
 0x23d   : > { %7458 = vst [vmem:[#allocation277_spill] sm:$0xff] %v5687_v12  ;;  %v5689_v49 = vpop.f32.mrf.mxu0 }
 0x23e   : > { %7459 = vst [vmem:[#allocation278_spill] sm:$0xff] %v5689_v49  ;;  %v5691_v11 = vpop.f32.mrf.mxu1 }
 0x23f   : > { %7460 = vst [vmem:[#allocation279_spill] sm:$0xff] %v5691_v11  ;;  %v5693_v16 = vpop.f32.mrf.mxu0  ;;  %4078 = vmatmul.mubr.msk.bf16.gmra.mxu0 %vm591_vm2, %v5408_v14 }
 0x240   : > { %7461 = vst [vmem:[#allocation280_spill] sm:$0xff] %v5693_v16  ;;  %v5695_v15 = vpop.f32.mrf.mxu1  ;;  %4091 = vmatmul.mubr.msk.bf16.gmra.mxu1 %vm591_vm2, %v5408_v14  ;;  %2702 = vmatprep.mubr.bf16.mxu0 %v7261_v39 }
 0x241   : > { %7462 = vst [vmem:[#allocation281_spill] sm:$0xff] %v5695_v15  ;;  %2853 = vmatprep.mubr.bf16.mxu1 %v7261_v39  ;;  %v5703_v7 = vpop.f32.mrf.mxu0 }
 0x242   : > { %7463 = vst [vmem:[#allocation282_spill] sm:$0xff] %v5703_v7  ;;  %v5705_v12 = vpop.f32.mrf.mxu1 }
 0x243   : > { %7464 = vst [vmem:[#allocation283_spill] sm:$0xff] %v5705_v12  ;;  %v5707_v49 = vpop.f32.mrf.mxu0 }
 0x244   : > { %7465 = vst [vmem:[#allocation284_spill] sm:$0xff] %v5707_v49  ;;  %v5709_v11 = vpop.f32.mrf.mxu1 }
 0x245   : > { %7466 = vst [vmem:[#allocation285_spill] sm:$0xff] %v5709_v11  ;;  %v5711_v16 = vpop.f32.mrf.mxu0 }
 0x246   : > { %7467 = vst [vmem:[#allocation286_spill] sm:$0xff] %v5711_v16  ;;  %v5713_v15 = vpop.f32.mrf.mxu1 }
 0x247   : > { %7468 = vst [vmem:[#allocation287_spill] sm:$0xff] %v5713_v15  ;;  %v5715_v24 = vpop.f32.mrf.mxu0  ;;  %4079 = vmatmul.mubr.msk.bf16.gmra.mxu0 %vm591_vm2, %v5434_v57 }
 0x248   : > { %7469 = vst [vmem:[#allocation288_spill] sm:$0xff] %v5715_v24  ;;  %v5717_v63 = vpop.f32.mrf.mxu1  ;;  %4092 = vmatmul.mubr.msk.bf16.gmra.mxu1 %vm591_vm2, %v5434_v57  ;;  %2712 = vmatprep.mubr.bf16.mxu0 %v7261_v39 }
 0x249   : > { %7470 = vst [vmem:[#allocation289_spill] sm:$0xff] %v5717_v63  ;;  %2863 = vmatprep.mubr.bf16.mxu1 %v7261_v39  ;;  %v5725_v14 = vpop.f32.mrf.mxu0 }
 0x24a   : > { %7471 = vst [vmem:[#allocation290_spill] sm:$0xff] %v5725_v14  ;;  %v5727_v11 = vpop.f32.mrf.mxu1 }
 0x24b   : > { %7472 = vst [vmem:[#allocation291_spill] sm:$0xff] %v5727_v11  ;;  %v5729_v16 = vpop.f32.mrf.mxu0 }
 0x24c   : > { %7473 = vst [vmem:[#allocation292_spill] sm:$0xff] %v5729_v16  ;;  %v5731_v15 = vpop.f32.mrf.mxu1 }
 0x24d   : > { %7474 = vst [vmem:[#allocation293_spill] sm:$0xff] %v5731_v15  ;;  %v5733_v24 = vpop.f32.mrf.mxu0 }
 0x24e   : > { %7475 = vst [vmem:[#allocation294_spill] sm:$0xff] %v5733_v24  ;;  %v5735_v63 = vpop.f32.mrf.mxu1 }
 0x24f   : > { %7476 = vst [vmem:[#allocation295_spill] sm:$0xff] %v5735_v63  ;;  %v5737_v49 = vpop.f32.mrf.mxu0  ;;  %4080 = vmatmul.mubr.msk.bf16.gmra.mxu0 %vm591_vm2, %v5460_v0 }
 0x250   : > { %7477 = vst [vmem:[#allocation296_spill] sm:$0xff] %v5737_v49  ;;  %v5739_v12 = vpop.f32.mrf.mxu1  ;;  %4093 = vmatmul.mubr.msk.bf16.gmra.mxu1 %vm591_vm2, %v5460_v0  ;;  %2722 = vmatprep.mubr.bf16.mxu0 %v7261_v39 }
 0x251   : > { %7478 = vst [vmem:[#allocation297_spill] sm:$0xff] %v5739_v12  ;;  %2873 = vmatprep.mubr.bf16.mxu1 %v7261_v39  ;;  %v5747_v57 = vpop.f32.mrf.mxu0 }
 0x252   : > { %7479 = vst [vmem:[#allocation298_spill] sm:$0xff] %v5747_v57  ;;  %v5749_v15 = vpop.f32.mrf.mxu1 }
 0x253   : > { %7480 = vst [vmem:[#allocation299_spill] sm:$0xff] %v5749_v15  ;;  %v5751_v24 = vpop.f32.mrf.mxu0 }
 0x254   : > { %7481 = vst [vmem:[#allocation300_spill] sm:$0xff] %v5751_v24  ;;  %v5753_v63 = vpop.f32.mrf.mxu1 }
 0x255   : > { %7482 = vst [vmem:[#allocation301_spill] sm:$0xff] %v5753_v63  ;;  %v5755_v49 = vpop.f32.mrf.mxu0 }
 0x256   : > { %7483 = vst [vmem:[#allocation302_spill] sm:$0xff] %v5755_v49  ;;  %v5757_v12 = vpop.f32.mrf.mxu1 }
 0x257   : > { %7484 = vst [vmem:[#allocation303_spill] sm:$0xff] %v5757_v12  ;;  %v5759_v16 = vpop.f32.mrf.mxu0  ;;  %4081 = vmatmul.mubr.msk.bf16.gmra.mxu0 %vm591_vm2, %v5486_v50 }
 0x258   : > { %7485 = vst [vmem:[#allocation304_spill] sm:$0xff] %v5759_v16  ;;  %v5761_v11 = vpop.f32.mrf.mxu1  ;;  %4094 = vmatmul.mubr.msk.bf16.gmra.mxu1 %vm591_vm2, %v5486_v50  ;;  %2732 = vmatprep.mubr.bf16.mxu0 %v7261_v39  ;;  %v3280_v16 = vlaneseq }
 0x259   : > { %7486 = vst [vmem:[#allocation305_spill] sm:$0xff] %v5761_v11  ;;  %2883 = vmatprep.mubr.bf16.mxu1 %v7261_v39  ;;  %v5769_v0 = vpop.f32.mrf.mxu0 }
 0x25a   : > { %7487 = vst [vmem:[#allocation306_spill] sm:$0xff] %v5769_v0  ;;  %v5771_v63 = vpop.f32.mrf.mxu1  ;;  %v5781_v15 = vshrl.u32 %v3280_v16, 7 }
 0x25b   : > { %7488 = vst [vmem:[#allocation307_spill] sm:$0xff] %v5771_v63  ;;  %v5773_v49 = vpop.f32.mrf.mxu0 }
 0x25c   : > { %7489 = vst [vmem:[#allocation308_spill] sm:$0xff] %v5773_v49  ;;  %v5775_v12 = vpop.f32.mrf.mxu1  ;;  %7493 = vst [vmem:[#allocation312_spill] sm:$0xff] %v5781_v15 }
 0x25d   : > { %7490 = vst [vmem:[#allocation309_spill] sm:$0xff] %v5775_v12  ;;  %v5777_v11 = vpop.f32.mrf.mxu0  ;;  %v3283_v12 = vand.u32 127, %v3280_v16 }
 0x25e   : > { %7491 = vst [vmem:[#allocation310_spill] sm:$0xff] %v5777_v11  ;;  %v5779_v24 = vpop.f32.mrf.mxu1  ;;  %v3285_v11 = vmul.u32 24, %v5781_v15  ;;  %v7504_v15 = vmov 0 }
 0x25f   : > { %7492 = vst [vmem:[#allocation311_spill] sm:$0xff] %v5779_v24  ;;  %v5783_v50 = vpop.f32.mrf.mxu0  ;;  %4082 = vmatmul.mubr.msk.bf16.gmra.mxu0 %vm591_vm2, %v5512_v43  ;;  %v3284_v63 = vadd.s32 128, %v3283_v12 }
 0x260   : > { %7494 = vst [vmem:[#allocation313_spill] sm:$0xff] %v5783_v50  ;;  %v5785_v57 = vpop.f32.mrf.mxu1  ;;  %4095 = vmatmul.mubr.msk.bf16.gmra.mxu1 %vm591_vm2, %v5512_v43  ;;  %2742 = vmatprep.mubr.bf16.mxu0 %v7261_v39  ;;  %v3288_v0 = vadd.s32 16, %v3285_v11  ;;  %vm3286_vm4 = vcmp.ge.s32.totalorder %v3283_v12, %v3285_v11 }
 0x261   : > { %7495 = vst [vmem:[#allocation314_spill] sm:$0xff] %v5785_v57  ;;  %2893 = vmatprep.mubr.bf16.mxu1 %v7261_v39  ;;  %v5794_v24 = vpop.f32.mrf.mxu0  ;;  %vm3287_vm6 = vcmp.ge.s32.totalorder %v3284_v63, %v3285_v11 }
 0x262   : > { %7496 = vst [vmem:[#allocation315_spill] sm:$0xff] %v5794_v24  ;;  %v5796_v49 = vpop.f32.mrf.mxu1  ;;  %vm3289_vm5 = vcmp.lt.s32.totalorder %v3283_v12, %v3288_v0  ;;  %vm3290_vm7 = vcmp.lt.s32.totalorder %v3284_v63, %v3288_v0  ;;  %v4334_v63 = vmov 0.0   ;;  %v7568_v24 = vld [vmem:[#allocation174_spill] sm:$0xff] }
 0x263   : > { %7497 = vst [vmem:[#allocation316_spill] sm:$0xff] %v5796_v49  ;;  %v5798_v50 = vpop.f32.mrf.mxu0  ;;  %vm5814_vm8 = vmand %vm3286_vm4, %vm3289_vm5  ;;  %v7567_v49 = vld [vmem:[#allocation10_spill] sm:$0xff] }
 0x264   : > { %7498 = vst [vmem:[#allocation317_spill] sm:$0xff] %v5798_v50  ;;  %v5800_v57 = vpop.f32.mrf.mxu1  ;;  %v7505_v15 = vsel %vm5814_vm8, 4294967295, %v7504_v15  ;;  %vm3292_vm9 = vmand %vm3287_vm6, %vm3290_vm7  ;;  %v5992_v41 = vadd.f32 %v7568_v24, %v7567_v49  ;;  %v7582_v24 = vld [vmem:[#allocation15_spill] sm:$0xff] }
 0x265   : > { %7499 = vst [vmem:[#allocation318_spill] sm:$0xff] %v5800_v57  ;;  %v5802_v14 = vpop.f32.mrf.mxu0  ;;  %7506 = vst [vmem:[#allocation323_spill] sm:$0xff] %v7505_v15  ;;  %v5832_v0 = vsel %vm3292_vm9, 0.00390625, %v4334_v63  ;;  %v1484_v57 = vadd.f32 %v5294_v62, %v4730_v26  ;;  %v7570_v15 = vld [vmem:[#allocation11_spill] sm:$0xff] }
 0x266   : > { %7500 = vst [vmem:[#allocation319_spill] sm:$0xff] %v5802_v14  ;;  %v5804_v43 = vpop.f32.mrf.mxu1  ;;  %7513 = vst [vmem:[#allocation330_spill] sm:$0xff] %v5832_v0 }
 0x267   : > { %7501 = vst [vmem:[#allocation320_spill] sm:$0xff] %v5804_v43  ;;  %v5806_v7 = vpop.f32.mrf.mxu0  ;;  %4083 = vmatmul.mubr.msk.bf16.gmra.mxu0 %vm591_vm2, %v5541_v45 }
 0x268   : > { %7502 = vst [vmem:[#allocation321_spill] sm:$0xff] %v5806_v7  ;;  %v5808_v16 = vpop.f32.mrf.mxu1  ;;  %4096 = vmatmul.mubr.msk.bf16.gmra.mxu1 %vm591_vm2, %v5541_v45  ;;  %2752 = vmatprep.mubr.bf16.mxu0 %v7261_v39 }
 0x269   : > { %7503 = vst [vmem:[#allocation322_spill] sm:$0xff] %v5808_v16  ;;  %2903 = vmatprep.mubr.bf16.mxu1 %v7261_v39  ;;  %v5820_v12 = vpop.f32.mrf.mxu0 }
 0x26a   : > { %7507 = vst [vmem:[#allocation324_spill] sm:$0xff] %v5820_v12  ;;  %v5822_v7 = vpop.f32.mrf.mxu1 }
 0x26b   : > { %7508 = vst [vmem:[#allocation325_spill] sm:$0xff] %v5822_v7  ;;  %v5824_v16 = vpop.f32.mrf.mxu0 }
 0x26c   : > { %7509 = vst [vmem:[#allocation326_spill] sm:$0xff] %v5824_v16  ;;  %v5826_v43 = vpop.f32.mrf.mxu1  ;;  %v1482_v16 = vadd.f32 %v5284_v28, %v4721_v20  ;;  %v1486_v20 = vadd.f32 %v5299_v29, %v4735_v35 }
 0x26d   : > { %7510 = vst [vmem:[#allocation327_spill] sm:$0xff] %v5826_v43  ;;  %v5828_v45 = vpop.f32.mrf.mxu0 }
 0x26e   : > { %7511 = vst [vmem:[#allocation328_spill] sm:$0xff] %v5828_v45  ;;  %v5830_v11 = vpop.f32.mrf.mxu1 }
 0x26f   : > { %7512 = vst [vmem:[#allocation329_spill] sm:$0xff] %v5830_v11  ;;  %v5834_v14 = vpop.f32.mrf.mxu0  ;;  %4084 = vmatmul.mubr.msk.bf16.gmra.mxu0 %vm591_vm2, %v5527_v10 }
 0x270   : > { %7514 = vst [vmem:[#allocation331_spill] sm:$0xff] %v5834_v14  ;;  %v5836_v39 = vpop.f32.mrf.mxu1  ;;  %4097 = vmatmul.mubr.msk.bf16.gmra.mxu1 %vm591_vm2, %v5527_v10  ;;  %4098 = vmatprep.mubr.msk.f32.mxu0 %vm3295_vm10, %v5832_v0  ;;  %v1633_v10 = vadd.f32 %v5286_v60, %v4723_v21  ;;  %v1637_v21 = vadd.f32 %v5301_v55, %v4737_v38 }
 0x271   : > { %7515 = vst [vmem:[#allocation332_spill] sm:$0xff] %v5836_v39  ;;  %4100 = vmatprep.mubr.msk.f32.mxu1 %vm3295_vm10, %v5832_v0  ;;  %v5846_v11 = vpop.f32.mrf.mxu0  ;;  %v1492_v38 = vadd.f32 %v5310_v22, %v4743_v51  ;;  %v1643_v55 = vadd.f32 %v5312_v17, %v4745_v52  ;;  %v1496_v52 = vadd.f32 %v5325_v47, %v4765_v1 }
 0x272   : > { %7516 = vst [vmem:[#allocation333_spill] sm:$0xff] %v5846_v11  ;;  %v5848_v63 = vpop.f32.mrf.mxu1  ;;  %v1635_v11 = vadd.f32 %v5296_v23, %v4732_v27  ;;  %v1488_v27 = vadd.f32 %v5306_v18, %v4739_v44  ;;  %v1639_v23 = vadd.f32 %v5308_v36, %v4741_v46  ;;  %v1494_v46 = vadd.f32 %v5321_v4, %v4757_v58 }
 0x273   : > { %7517 = vst [vmem:[#allocation334_spill] sm:$0xff] %v5848_v63  ;;  %v1897_v45 = vpop.f32.mrf.mxu0  ;;  %v1645_v36 = vadd.f32 %v5323_v25, %v4759_v59  ;;  %v1647_v17 = vadd.f32 %v5327_v40, %v4767_v2  ;;  %v1498_v59 = vadd.f32 %v5332_v6, %v4769_v3  ;;  %v1649_v25 = vadd.f32 %v5334_v30, %v4771_v5 }
 0x274   : > { %v2048_v14 = vpop.f32.mrf.mxu1  ;;  %v1502_v2 = vadd.f32 %v5336_v61, %v4775_v8  ;;  %v1653_v40 = vadd.f32 %v5338_v54, %v4777_v9  ;;  %v1504_v5 = vadd.f32 %v5347_v19, %v4785_v13  ;;  %v1655_v30 = vadd.f32 %v5349_v34, %v4787_v31 }
 0x275   : > { %v1898_v43 = vpop.f32.mrf.mxu0 }
 0x276   : > { %v2049_v39 = vpop.f32.mrf.mxu1 }
 0x277   : > { %v2342_v7 = vpop.f32.mrf.mxu0 }
 0x278   : > { %v2493_v12 = vpop.f32.mrf.mxu1  ;;  %v5858_v50 = vadd.f32 %v2342_v7, %v1482_v16 }
 0x279   : > { %v5860_v45 = vadd.f32 %v2493_v12, %v1633_v10  ;;  %v2344_v14 = vpop.f32.mrf.mxu0 }
 0x27a   : > { %7518 = vst [vmem:[#allocation335_spill] sm:$0xff] %v5858_v50  ;;  %v2495_v39 = vpop.f32.mrf.mxu1  ;;  %v5866_v28 = vadd.f32 %v2344_v14, %v1484_v57  ;;  %v7613_v50 = vld [vmem:[#allocation189_spill] sm:$0xff] }
 0x27b   : > { %7519 = vst [vmem:[#allocation336_spill] sm:$0xff] %v5860_v45  ;;  %v5868_v60 = vadd.f32 %v2495_v39, %v1635_v11  ;;  %v2346_v26 = vpop.f32.mrf.mxu0  ;;  %v7574_v45 = vld [vmem:[#allocation176_spill] sm:$0xff] }
 0x27c   : > { %7520 = vst [vmem:[#allocation337_spill] sm:$0xff] %v5866_v28  ;;  %v2497_v62 = vpop.f32.mrf.mxu1  ;;  %v5874_v7 = vadd.f32 %v2346_v26, %v1486_v20  ;;  %v7610_v28 = vld [vmem:[#allocation188_spill] sm:$0xff] }
 0x27d   : > { %7521 = vst [vmem:[#allocation338_spill] sm:$0xff] %v5868_v60  ;;  %v5876_v43 = vadd.f32 %v2497_v62, %v1637_v21  ;;  %v2348_v35 = vpop.f32.mrf.mxu0  ;;  %v7577_v60 = vld [vmem:[#allocation177_spill] sm:$0xff] }
 0x27e   : > { %7522 = vst [vmem:[#allocation339_spill] sm:$0xff] %v5874_v7  ;;  %v2499_v29 = vpop.f32.mrf.mxu1  ;;  %v5882_v57 = vadd.f32 %v2348_v35, %v1488_v27  ;;  %v7607_v7 = vld [vmem:[#allocation187_spill] sm:$0xff] }
 0x27f   : > { %7523 = vst [vmem:[#allocation340_spill] sm:$0xff] %v5876_v43  ;;  %v5884_v16 = vadd.f32 %v2499_v29, %v1639_v23  ;;  %v2352_v44 = vpop.f32.mrf.mxu0  ;;  %v7580_v43 = vld [vmem:[#allocation178_spill] sm:$0xff] }
 0x280   : > { %7524 = vst [vmem:[#allocation341_spill] sm:$0xff] %v5882_v57  ;;  %v2503_v18 = vpop.f32.mrf.mxu1  ;;  %v5890_v12 = vadd.f32 %v2352_v44, %v1492_v38  ;;  %v7604_v57 = vld [vmem:[#allocation186_spill] sm:$0xff] }
 0x281   : > { %7525 = vst [vmem:[#allocation342_spill] sm:$0xff] %v5884_v16  ;;  %v5892_v11 = vadd.f32 %v2503_v18, %v1643_v55  ;;  %v2354_v51 = vpop.f32.mrf.mxu0  ;;  %v7583_v16 = vld [vmem:[#allocation179_spill] sm:$0xff] }
 0x282   : > { %7526 = vst [vmem:[#allocation343_spill] sm:$0xff] %v5890_v12  ;;  %v2505_v22 = vpop.f32.mrf.mxu1  ;;  %v5898_v10 = vadd.f32 %v2354_v51, %v1494_v46  ;;  %v7595_v12 = vld [vmem:[#allocation183_spill] sm:$0xff] }
 0x283   : > { %7527 = vst [vmem:[#allocation344_spill] sm:$0xff] %v5892_v11  ;;  %v5900_v14 = vadd.f32 %v2505_v22, %v1645_v36  ;;  %v2356_v58 = vpop.f32.mrf.mxu0  ;;  %v6016_v11 = vadd.f32 %v7583_v16, %v7582_v24  ;;  %v7597_v24 = vld [vmem:[#allocation20_spill] sm:$0xff] }
 0x284   : > { %7528 = vst [vmem:[#allocation345_spill] sm:$0xff] %v5898_v10  ;;  %v2507_v4 = vpop.f32.mrf.mxu1  ;;  %v5906_v39 = vadd.f32 %v2356_v58, %v1496_v52  ;;  %v7592_v10 = vld [vmem:[#allocation182_spill] sm:$0xff] }
 0x285   : > { %7529 = vst [vmem:[#allocation346_spill] sm:$0xff] %v5900_v14  ;;  %v5908_v20 = vadd.f32 %v2507_v4, %v1647_v17  ;;  %v2358_v1 = vpop.f32.mrf.mxu0  ;;  %7584 = vst [vmem:[#allocation175_spill] sm:$0xff] %v6016_v11  ;;  %v7585_v14 = vld [vmem:[#allocation16_spill] sm:$0xff] }
 0x286   : > { %7530 = vst [vmem:[#allocation347_spill] sm:$0xff] %v5906_v39  ;;  %v2509_v47 = vpop.f32.mrf.mxu1  ;;  %v5914_v21 = vadd.f32 %v2358_v1, %v1498_v59  ;;  %v7589_v39 = vld [vmem:[#allocation181_spill] sm:$0xff]  ;;  %v7653_v11 = vld [vmem:[#allocation208_spill] sm:$0xff] }
 0x287   : > { %7531 = vst [vmem:[#allocation348_spill] sm:$0xff] %v5908_v20  ;;  %v5916_v26 = vadd.f32 %v2509_v47, %v1649_v25  ;;  %v2362_v3 = vpop.f32.mrf.mxu0  ;;  %v7586_v20 = vld [vmem:[#allocation180_spill] sm:$0xff] }
 0x288   : > { %7532 = vst [vmem:[#allocation349_spill] sm:$0xff] %v5914_v21  ;;  %v2513_v6 = vpop.f32.mrf.mxu1  ;;  %v5922_v62 = vadd.f32 %v2362_v3, %v1502_v2  ;;  %v7601_v21 = vld [vmem:[#allocation185_spill] sm:$0xff] }
 0x289   : > { %7533 = vst [vmem:[#allocation350_spill] sm:$0xff] %v5916_v26  ;;  %v5924_v27 = vadd.f32 %v2513_v6, %v1653_v40  ;;  %v2364_v8 = vpop.f32.mrf.mxu0  ;;  %v7559_v40 = vld [vmem:[#allocation171_spill] sm:$0xff]  ;;  %v7561_v6 = vld [vmem:[#allocation8_spill] sm:$0xff] }
 0x28a   : > { %7534 = vst [vmem:[#allocation351_spill] sm:$0xff] %v5922_v62  ;;  %v2515_v61 = vpop.f32.mrf.mxu1  ;;  %v5926_v23 = vadd.f32 %v2364_v8, %v1504_v5  ;;  %v5980_v3 = vadd.f32 %v7559_v40, %v4789_v37  ;;  %v7562_v5 = vld [vmem:[#allocation172_spill] sm:$0xff]  ;;  %v7564_v8 = vld [vmem:[#allocation9_spill] sm:$0xff]  ;;  %v6000_v37 = vadd.f32 %v7571_v56, %v7570_v15  ;;  %v6020_v15 = vadd.f32 %v7586_v20, %v7585_v14 }
 0x28b   : > { %7535 = vst [vmem:[#allocation352_spill] sm:$0xff] %v5924_v27  ;;  %v5928_v9 = vadd.f32 %v2515_v61, %v1655_v30  ;;  %v5930_v54 = vpop.f32.mrf.mxu0  ;;  %v5984_v30 = vadd.f32 %v7562_v5, %v7561_v6  ;;  %v7565_v61 = vld [vmem:[#allocation173_spill] sm:$0xff]  ;;  %7569 = vst [vmem:[#allocation9_spill] sm:$0xff] %v5992_v41  ;;  %v7573_v40 = vld [vmem:[#allocation12_spill] sm:$0xff] }
 0x28c   : > { %7536 = vst [vmem:[#allocation353_spill] sm:$0xff] %v5926_v23  ;;  %7538 = vst [vmem:[#allocation355_spill] sm:$0xff] %v5930_v54  ;;  %v5932_v35 = vpop.f32.mrf.mxu1  ;;  %v5988_v63 = vadd.f32 %v7565_v61, %v7564_v8  ;;  %v6004_v6 = vadd.f32 %v7574_v45, %v7573_v40  ;;  %v7576_v5 = vld [vmem:[#allocation13_spill] sm:$0xff]  ;;  %v7579_v61 = vld [vmem:[#allocation14_spill] sm:$0xff] }
 0x28d   : > { %7537 = vst [vmem:[#allocation354_spill] sm:$0xff] %v5928_v9  ;;  %7539 = vst [vmem:[#allocation356_spill] sm:$0xff] %v5932_v35  ;;  %v5934_v29 = vpop.f32.mrf.mxu0  ;;  %v6008_v8 = vadd.f32 %v7577_v60, %v7576_v5  ;;  %v6012_v49 = vadd.f32 %v7580_v43, %v7579_v61  ;;  %v7588_v56 = vld [vmem:[#allocation17_spill] sm:$0xff]  ;;  %v7591_v40 = vld [vmem:[#allocation18_spill] sm:$0xff] }
 0x28e   : > { %7540 = vst [vmem:[#allocation357_spill] sm:$0xff] %v5934_v29  ;;  %v5936_v13 = vpop.f32.mrf.mxu1  ;;  %7560 = vst [vmem:[#allocation171_spill] sm:$0xff] %v5980_v3  ;;  %v6024_v45 = vadd.f32 %v7589_v39, %v7588_v56  ;;  %v6028_v60 = vadd.f32 %v7592_v10, %v7591_v40  ;;  %v7594_v61 = vld [vmem:[#allocation19_spill] sm:$0xff]  ;;  %v7598_v26 = vld [vmem:[#allocation184_spill] sm:$0xff] }
 0x28f   : > { %7541 = vst [vmem:[#allocation358_spill] sm:$0xff] %v5936_v13  ;;  %v5938_v19 = vpop.f32.mrf.mxu0  ;;  %7563 = vst [vmem:[#allocation8_spill] sm:$0xff] %v5984_v30  ;;  %v6036_v16 = vadd.f32 %v7595_v12, %v7594_v61  ;;  %v6040_v14 = vadd.f32 %v7598_v26, %v7597_v24  ;;  %v7600_v20 = vld [vmem:[#allocation21_spill] sm:$0xff]  ;;  %v7603_v56 = vld [vmem:[#allocation22_spill] sm:$0xff] }
 0x290   : > { %7542 = vst [vmem:[#allocation359_spill] sm:$0xff] %v5938_v19  ;;  %v5940_v31 = vpop.f32.mrf.mxu1  ;;  %7566 = vst [vmem:[#allocation172_spill] sm:$0xff] %v5988_v63  ;;  %v6044_v39 = vadd.f32 %v7601_v21, %v7600_v20  ;;  %v6048_v10 = vadd.f32 %v7604_v57, %v7603_v56  ;;  %v7606_v40 = vld [vmem:[#allocation23_spill] sm:$0xff]  ;;  %v7609_v62 = vld [vmem:[#allocation24_spill] sm:$0xff] }
 0x291   : > { %7543 = vst [vmem:[#allocation360_spill] sm:$0xff] %v5940_v31  ;;  %v5942_v34 = vpop.f32.mrf.mxu0  ;;  %7572 = vst [vmem:[#allocation173_spill] sm:$0xff] %v6000_v37  ;;  %v6052_v27 = vadd.f32 %v7607_v7, %v7606_v40  ;;  %v6056_v12 = vadd.f32 %v7610_v28, %v7609_v62  ;;  %v7612_v61 = vld [vmem:[#allocation25_spill] sm:$0xff]  ;;  %v7615_v24 = vld [vmem:[#allocation26_spill] sm:$0xff] }
 0x292   : > { %7544 = vst [vmem:[#allocation361_spill] sm:$0xff] %v5942_v34  ;;  %v5944_v38 = vpop.f32.mrf.mxu1  ;;  %7575 = vst [vmem:[#allocation10_spill] sm:$0xff] %v6004_v6  ;;  %v6060_v26 = vadd.f32 %v7613_v50, %v7612_v61  ;;  %v7616_v9 = vld [vmem:[#allocation190_spill] sm:$0xff]  ;;  %v7618_v56 = vld [vmem:[#allocation27_spill] sm:$0xff] }
 0x293   : > { %7545 = vst [vmem:[#allocation362_spill] sm:$0xff] %v5944_v38  ;;  %v5946_v55 = vpop.f32.mrf.mxu0  ;;  %7578 = vst [vmem:[#allocation174_spill] sm:$0xff] %v6008_v8  ;;  %v6064_v21 = vadd.f32 %v7616_v9, %v7615_v24  ;;  %v7619_v23 = vld [vmem:[#allocation191_spill] sm:$0xff]  ;;  %v7620_v40 = vld [vmem:[#allocation28_spill] sm:$0xff] }
 0x294   : > { %7546 = vst [vmem:[#allocation363_spill] sm:$0xff] %v5946_v55  ;;  %v5948_v44 = vpop.f32.mrf.mxu1  ;;  %7581 = vst [vmem:[#allocation11_spill] sm:$0xff] %v6012_v49  ;;  %v6072_v7 = vadd.f32 %v7619_v23, %v7618_v56  ;;  %v6076_v28 = vadd.f32 %v7621_v48, %v7620_v40  ;;  %v7622_v62 = vld [vmem:[#allocation29_spill] sm:$0xff]  ;;  %v7624_v61 = vld [vmem:[#allocation30_spill] sm:$0xff] }
 0x295   : > { %7547 = vst [vmem:[#allocation364_spill] sm:$0xff] %v5948_v44  ;;  %v5950_v18 = vpop.f32.mrf.mxu0  ;;  %7587 = vst [vmem:[#allocation12_spill] sm:$0xff] %v6020_v15  ;;  %v7623_v35 = vld [vmem:[#allocation193_spill] sm:$0xff]  ;;  %v7625_v30 = vld [vmem:[#allocation194_spill] sm:$0xff] }
 0x296   : > { %7548 = vst [vmem:[#allocation365_spill] sm:$0xff] %v5950_v18  ;;  %v5952_v46 = vpop.f32.mrf.mxu1  ;;  %7590 = vst [vmem:[#allocation176_spill] sm:$0xff] %v6024_v45  ;;  %v6080_v50 = vadd.f32 %v7623_v35, %v7622_v62  ;;  %v6084_v9 = vadd.f32 %v7625_v30, %v7624_v61  ;;  %v7626_v24 = vld [vmem:[#allocation31_spill] sm:$0xff]  ;;  %v7628_v13 = vld [vmem:[#allocation32_spill] sm:$0xff] }
 0x297   : > { %7549 = vst [vmem:[#allocation366_spill] sm:$0xff] %v5952_v46  ;;  %v5954_v36 = vpop.f32.mrf.mxu0  ;;  %7593 = vst [vmem:[#allocation13_spill] sm:$0xff] %v6028_v60  ;;  %v7627_v54 = vld [vmem:[#allocation195_spill] sm:$0xff]  ;;  %v7629_v41 = vld [vmem:[#allocation196_spill] sm:$0xff] }
 0x298   : > { %7550 = vst [vmem:[#allocation367_spill] sm:$0xff] %v5954_v36  ;;  %v5956_v51 = vpop.f32.mrf.mxu1  ;;  %7596 = vst [vmem:[#allocation177_spill] sm:$0xff] %v6036_v16  ;;  %v6088_v3 = vadd.f32 %v7627_v54, %v7626_v24  ;;  %v6092_v23 = vadd.f32 %v7629_v41, %v7628_v13  ;;  %v7630_v56 = vld [vmem:[#allocation33_spill] sm:$0xff]  ;;  %v7632_v40 = vld [vmem:[#allocation34_spill] sm:$0xff] }
 0x299   : > { %7551 = vst [vmem:[#allocation368_spill] sm:$0xff] %v5956_v51  ;;  %v5958_v22 = vpop.f32.mrf.mxu0  ;;  %7599 = vst [vmem:[#allocation14_spill] sm:$0xff] %v6040_v14  ;;  %v7631_v29 = vld [vmem:[#allocation197_spill] sm:$0xff]  ;;  %v7633_v63 = vld [vmem:[#allocation198_spill] sm:$0xff] }
 0x29a   : > { %7552 = vst [vmem:[#allocation369_spill] sm:$0xff] %v5958_v22  ;;  %v5960_v52 = vpop.f32.mrf.mxu1  ;;  %7602 = vst [vmem:[#allocation178_spill] sm:$0xff] %v6044_v39  ;;  %v6096_v48 = vadd.f32 %v7631_v29, %v7630_v56  ;;  %v6100_v35 = vadd.f32 %v7633_v63, %v7632_v40  ;;  %v7634_v61 = vld [vmem:[#allocation35_spill] sm:$0xff]  ;;  %v7636_v24 = vld [vmem:[#allocation36_spill] sm:$0xff] }
 0x29b   : > { %7553 = vst [vmem:[#allocation370_spill] sm:$0xff] %v5960_v52  ;;  %v5962_v17 = vpop.f32.mrf.mxu0  ;;  %7605 = vst [vmem:[#allocation15_spill] sm:$0xff] %v6048_v10  ;;  %v7635_v31 = vld [vmem:[#allocation199_spill] sm:$0xff]  ;;  %v7637_v6 = vld [vmem:[#allocation200_spill] sm:$0xff] }
 0x29c   : > { %7554 = vst [vmem:[#allocation371_spill] sm:$0xff] %v5962_v17  ;;  %v5964_v58 = vpop.f32.mrf.mxu1  ;;  %7608 = vst [vmem:[#allocation179_spill] sm:$0xff] %v6052_v27  ;;  %v6108_v54 = vadd.f32 %v7635_v31, %v7634_v61  ;;  %v6112_v41 = vadd.f32 %v7637_v6, %v7636_v24  ;;  %v7638_v13 = vld [vmem:[#allocation37_spill] sm:$0xff]  ;;  %v7640_v56 = vld [vmem:[#allocation38_spill] sm:$0xff] }
 0x29d   : > { %7555 = vst [vmem:[#allocation372_spill] sm:$0xff] %v5964_v58  ;;  %v5966_v4 = vpop.f32.mrf.mxu0  ;;  %7611 = vst [vmem:[#allocation16_spill] sm:$0xff] %v6056_v12  ;;  %v7639_v19 = vld [vmem:[#allocation201_spill] sm:$0xff]  ;;  %v7641_v37 = vld [vmem:[#allocation202_spill] sm:$0xff] }
 0x29e   : > { %7556 = vst [vmem:[#allocation373_spill] sm:$0xff] %v5966_v4  ;;  %v5968_v59 = vpop.f32.mrf.mxu1  ;;  %7614 = vst [vmem:[#allocation180_spill] sm:$0xff] %v6060_v26  ;;  %v6116_v29 = vadd.f32 %v7639_v19, %v7638_v13  ;;  %v6120_v63 = vadd.f32 %v7641_v37, %v7640_v56  ;;  %v7642_v40 = vld [vmem:[#allocation39_spill] sm:$0xff]  ;;  %v7644_v34 = vld [vmem:[#allocation40_spill] sm:$0xff] }
 0x29f   : > { %7557 = vst [vmem:[#allocation374_spill] sm:$0xff] %v5968_v59  ;;  %v5970_v25 = vpop.f32.mrf.mxu0  ;;  %7617 = vst [vmem:[#allocation17_spill] sm:$0xff] %v6064_v21  ;;  %v7643_v38 = vld [vmem:[#allocation203_spill] sm:$0xff]  ;;  %v7645_v8 = vld [vmem:[#allocation204_spill] sm:$0xff] }
 0x2a0   : > { %v5972_v1 = vpop.f32.mrf.mxu1  ;;  %v6124_v49 = vadd.f32 %v7643_v38, %v7642_v40  ;;  %v6128_v31 = vadd.f32 %v7645_v8, %v7644_v34  ;;  %v7646_v61 = vld [vmem:[#allocation41_spill] sm:$0xff]  ;;  %v7648_v24 = vld [vmem:[#allocation42_spill] sm:$0xff]  ;;  %v7650_v56 = vld [vmem:[#allocation43_spill] sm:$0xff] }
 0x2a1   : > { %7558 = vst [vmem:[#allocation375_spill] sm:$0xff] %v5972_v1  ;;  %v5974_v47 = vpop.f32.mrf.mxu0  ;;  %v7647_v44 = vld [vmem:[#allocation205_spill] sm:$0xff]  ;;  %v7649_v15 = vld [vmem:[#allocation206_spill] sm:$0xff]  ;;  %v7651_v55 = vld [vmem:[#allocation207_spill] sm:$0xff] }
 0x2a2   : > { %v5976_v2 = vpop.f32.mrf.mxu1  ;;  %v6132_v6 = vadd.f32 %v7647_v44, %v7646_v61  ;;  %v6136_v19 = vadd.f32 %v7649_v15, %v7648_v24  ;;  %v1552_v38 = vadd.f32 %v7651_v55, %v7650_v56  ;;  %v7652_v40 = vld [vmem:[#allocation44_spill] sm:$0xff]  ;;  %v7654_v34 = vld [vmem:[#allocation45_spill] sm:$0xff]  ;;  %v7656_v18 = vld [vmem:[#allocation46_spill] sm:$0xff] }
 0x2a3   : > { %v5994_v33 = vpop.f32.mrf.mxu0  ;;  %v1703_v46 = vadd.f32 %v7653_v11, %v7652_v40  ;;  %v7655_v8 = vld [vmem:[#allocation209_spill] sm:$0xff]  ;;  %v7657_v44 = vld [vmem:[#allocation210_spill] sm:$0xff]  ;;  %v7658_v45 = vld [vmem:[#allocation47_spill] sm:$0xff] }
 0x2a4   : > { %v5996_v0 = vpop.f32.mrf.mxu1  ;;  %v1554_v60 = vadd.f32 %v7655_v8, %v7654_v34  ;;  %v1705_v61 = vadd.f32 %v7657_v44, %v7656_v18  ;;  %v7659_v51 = vld [vmem:[#allocation211_spill] sm:$0xff]  ;;  %v7660_v24 = vld [vmem:[#allocation48_spill] sm:$0xff]  ;;  %v7662_v16 = vld [vmem:[#allocation49_spill] sm:$0xff] }
 0x2a5   : > { %v6030_v5 = vpop.f32.mrf.mxu0  ;;  %v1556_v15 = vadd.f32 %v7659_v51, %v7658_v45  ;;  %v7661_v14 = vld [vmem:[#allocation212_spill] sm:$0xff]  ;;  %v7663_v52 = vld [vmem:[#allocation213_spill] sm:$0xff]  ;;  %v7664_v22 = vld [vmem:[#allocation50_spill] sm:$0xff] }
 0x2a6   : > { %v6032_v43 = vpop.f32.mrf.mxu1  ;;  %v1707_v36 = vadd.f32 %v7661_v14, %v7660_v24  ;;  %v1558_v10 = vadd.f32 %v7663_v52, %v7662_v16  ;;  %v7665_v55 = vld [vmem:[#allocation214_spill] sm:$0xff]  ;;  %v7666_v40 = vld [vmem:[#allocation51_spill] sm:$0xff]  ;;  %v7669_v8 = vld [vmem:[#allocation52_spill] sm:$0xff] }
 0x2a7   : > { %v6066_v20 = vpop.f32.mrf.mxu0  ;;  %v1709_v56 = vadd.f32 %v7665_v55, %v7664_v22  ;;  %v7667_v58 = vld [vmem:[#allocation215_spill] sm:$0xff]  ;;  %v7670_v18 = vld [vmem:[#allocation216_spill] sm:$0xff]  ;;  %v7672_v51 = vld [vmem:[#allocation53_spill] sm:$0xff] }
 0x2a8   : > { %v6068_v57 = vpop.f32.mrf.mxu1  ;;  %v6160_v34 = vadd.f32 %v7667_v58, %v7666_v40  ;;  %v6164_v44 = vadd.f32 %v7670_v18, %v7669_v8  ;;  %v6168_v45 = vadd.f32 %v5503_v42, %v7672_v51  ;;  %v7674_v14 = vld [vmem:[#allocation54_spill] sm:$0xff]  ;;  %v7675_v24 = vld [vmem:[#allocation217_spill] sm:$0xff]  ;;  %v7677_v16 = vld [vmem:[#allocation55_spill] sm:$0xff] }
 0x2a9   : > { %v6102_v62 = vpop.f32.mrf.mxu0  ;;  %v6172_v52 = vadd.f32 %v7675_v24, %v7674_v14  ;;  %v7678_v22 = vld [vmem:[#allocation218_spill] sm:$0xff]  ;;  %v7680_v12 = vld [vmem:[#allocation56_spill] sm:$0xff]  ;;  %v7681_v17 = vld [vmem:[#allocation219_spill] sm:$0xff] }
 0x2aa   : > { %v6104_v30 = vpop.f32.mrf.mxu1  ;;  %7668 = vst [vmem:[#allocation181_spill] sm:$0xff] %v6160_v34  ;;  %7671 = vst [vmem:[#allocation18_spill] sm:$0xff] %v6164_v44  ;;  %v6176_v55 = vadd.f32 %v7678_v22, %v7677_v16  ;;  %v6180_v58 = vadd.f32 %v7681_v17, %v7680_v12  ;;  %v7683_v40 = vld [vmem:[#allocation57_spill] sm:$0xff]  ;;  %v7684_v34 = vld [vmem:[#allocation220_spill] sm:$0xff] }
 0x2ab   : > { %v6138_v13 = vpop.f32.mrf.mxu0  ;;  %7673 = vst [vmem:[#allocation182_spill] sm:$0xff] %v6168_v45  ;;  %7676 = vst [vmem:[#allocation19_spill] sm:$0xff] %v6172_v52  ;;  %v6184_v8 = vadd.f32 %v7684_v34, %v7683_v40  ;;  %v7686_v18 = vld [vmem:[#allocation58_spill] sm:$0xff]  ;;  %v7687_v44 = vld [vmem:[#allocation221_spill] sm:$0xff] }
 0x2ac   : > { %v6140_v37 = vpop.f32.mrf.mxu1  ;;  %7679 = vst [vmem:[#allocation183_spill] sm:$0xff] %v6176_v55  ;;  %7682 = vst [vmem:[#allocation20_spill] sm:$0xff] %v6180_v58  ;;  %v6188_v42 = vadd.f32 %v7687_v44, %v7686_v18  ;;  %v7689_v14 = vld [vmem:[#allocation59_spill] sm:$0xff]  ;;  %v7690_v24 = vld [vmem:[#allocation222_spill] sm:$0xff] }
 0x2ad   : > { %v2408_v39 = vpop.f32.mrf.mxu0  ;;  %7685 = vst [vmem:[#allocation184_spill] sm:$0xff] %v6184_v8  ;;  %v6192_v52 = vadd.f32 %v7690_v24, %v7689_v14  ;;  %v7692_v16 = vld [vmem:[#allocation60_spill] sm:$0xff]  ;;  %v7693_v22 = vld [vmem:[#allocation223_spill] sm:$0xff]  ;;  %v7695_v17 = vld [vmem:[#allocation61_spill] sm:$0xff] }
 0x2ae   : > { %v2559_v11 = vpop.f32.mrf.mxu1  ;;  %7688 = vst [vmem:[#allocation21_spill] sm:$0xff] %v6188_v42  ;;  %v6196_v55 = vadd.f32 %v7693_v22, %v7692_v16  ;;  %v6200_v12 = vadd.f32 %v5531_v32, %v7695_v17  ;;  %v7697_v34 = vld [vmem:[#allocation62_spill] sm:$0xff]  ;;  %v7698_v40 = vld [vmem:[#allocation224_spill] sm:$0xff]  ;;  %v7700_v44 = vld [vmem:[#allocation63_spill] sm:$0xff] }
 0x2af   : > { %v2412_v51 = vpop.f32.mrf.mxu0  ;;  %7691 = vst [vmem:[#allocation185_spill] sm:$0xff] %v6192_v52  ;;  %v6204_v58 = vadd.f32 %v7698_v40, %v7697_v34  ;;  %v7701_v18 = vld [vmem:[#allocation225_spill] sm:$0xff]  ;;  %v7703_v8 = vld [vmem:[#allocation64_spill] sm:$0xff]  ;;  %v7704_v27 = vld [vmem:[#allocation226_spill] sm:$0xff] }
 0x2b0   : > { %v2563_v45 = vpop.f32.mrf.mxu1  ;;  %7694 = vst [vmem:[#allocation22_spill] sm:$0xff] %v6196_v55  ;;  %7696 = vst [vmem:[#allocation186_spill] sm:$0xff] %v6200_v12  ;;  %v6208_v42 = vadd.f32 %v7701_v18, %v7700_v44  ;;  %v6212_v14 = vadd.f32 %v7704_v27, %v7703_v8  ;;  %v7706_v24 = vld [vmem:[#allocation65_spill] sm:$0xff]  ;;  %v7707_v52 = vld [vmem:[#allocation227_spill] sm:$0xff] }
 0x2b1   : > { %7699 = vst [vmem:[#allocation23_spill] sm:$0xff] %v6204_v58  ;;  %v6216_v16 = vadd.f32 %v7707_v52, %v7706_v24  ;;  %v7709_v22 = vld [vmem:[#allocation66_spill] sm:$0xff]  ;;  %v7710_v55 = vld [vmem:[#allocation228_spill] sm:$0xff]  ;;  %v2414_v17 = vpop.f32.mrf.mxu0  ;;  %v7712_v34 = vld [vmem:[#allocation67_spill] sm:$0xff] }
 0x2b2   : > { %7702 = vst [vmem:[#allocation187_spill] sm:$0xff] %v6208_v42  ;;  %7705 = vst [vmem:[#allocation24_spill] sm:$0xff] %v6212_v14  ;;  %v6220_v32 = vadd.f32 %v7710_v55, %v7709_v22  ;;  %v2565_v12 = vpop.f32.mrf.mxu1  ;;  %v7713_v40 = vld [vmem:[#allocation229_spill] sm:$0xff]  ;;  %v7715_v44 = vld [vmem:[#allocation68_spill] sm:$0xff] }
 0x2b3   : > { %7708 = vst [vmem:[#allocation188_spill] sm:$0xff] %v6216_v16  ;;  %v6224_v58 = vadd.f32 %v7713_v40, %v7712_v34  ;;  %v7716_v18 = vld [vmem:[#allocation230_spill] sm:$0xff]  ;;  %v7718_v27 = vld [vmem:[#allocation69_spill] sm:$0xff]  ;;  %v7719_v8 = vld [vmem:[#allocation231_spill] sm:$0xff]  ;;  %v3027_v1 = vadd.f32 %v2565_v12, %v1705_v61 }
 0x2b4   : > { %7711 = vst [vmem:[#allocation25_spill] sm:$0xff] %v6220_v32  ;;  %v6228_v42 = vadd.f32 %v7716_v18, %v7715_v44  ;;  %v6232_v14 = vadd.f32 %v7719_v8, %v7718_v27  ;;  %v7721_v52 = vld [vmem:[#allocation70_spill] sm:$0xff]  ;;  %v7722_v24 = vld [vmem:[#allocation232_spill] sm:$0xff]  ;;  %v7724_v55 = vld [vmem:[#allocation71_spill] sm:$0xff]  ;;  %v2416_v8 = vpop.f32.mrf.mxu0 }
 0x2b5   : > { %7714 = vst [vmem:[#allocation189_spill] sm:$0xff] %v6224_v58  ;;  %v6236_v16 = vadd.f32 %v7722_v24, %v7721_v52  ;;  %v7725_v22 = vld [vmem:[#allocation233_spill] sm:$0xff]  ;;  %v7727_v59 = vld [vmem:[#allocation72_spill] sm:$0xff]  ;;  %v7728_v21 = vld [vmem:[#allocation234_spill] sm:$0xff] }
 0x2b6   : > { %7717 = vst [vmem:[#allocation26_spill] sm:$0xff] %v6228_v42  ;;  %7720 = vst [vmem:[#allocation190_spill] sm:$0xff] %v6232_v14  ;;  %v6240_v32 = vadd.f32 %v7725_v22, %v7724_v55  ;;  %v6244_v34 = vadd.f32 %v7728_v21, %v7727_v59  ;;  %v7730_v40 = vld [vmem:[#allocation73_spill] sm:$0xff]  ;;  %v7731_v58 = vld [vmem:[#allocation235_spill] sm:$0xff]  ;;  %v2567_v14 = vpop.f32.mrf.mxu1 }
 0x2b7   : > { %7723 = vst [vmem:[#allocation27_spill] sm:$0xff] %v6236_v16  ;;  %v6248_v44 = vadd.f32 %v7731_v58, %v7730_v40  ;;  %v7733_v18 = vld [vmem:[#allocation74_spill] sm:$0xff]  ;;  %v7734_v42 = vld [vmem:[#allocation236_spill] sm:$0xff]  ;;  %v7736_v52 = vld [vmem:[#allocation75_spill] sm:$0xff] }
 0x2b8   : > { %7726 = vst [vmem:[#allocation191_spill] sm:$0xff] %v6240_v32  ;;  %7729 = vst [vmem:[#allocation28_spill] sm:$0xff] %v6244_v34  ;;  %v6252_v27 = vadd.f32 %v7734_v42, %v7733_v18  ;;  %v7737_v24 = vld [vmem:[#allocation237_spill] sm:$0xff]  ;;  %v7739_v55 = vld [vmem:[#allocation76_spill] sm:$0xff] }
 0x2b9   : > { %7732 = vst [vmem:[#allocation192_spill] sm:$0xff] %v6248_v44  ;;  %v6256_v16 = vadd.f32 %v7737_v24, %v7736_v52  ;;  %v7740_v22 = vld [vmem:[#allocation238_spill] sm:$0xff]  ;;  %v7742_v59 = vld [vmem:[#allocation77_spill] sm:$0xff]  ;;  %v7743_v21 = vld [vmem:[#allocation239_spill] sm:$0xff]  ;;  %v3032_v24 = vadd.f32 %v2416_v8, %v1556_v15  ;;  %v3018_v15 = vadd.f32 %v6140_v37, %v6128_v31  ;;  %v3010_v31 = vadd.f32 %v6068_v57, %v6112_v41 }
 0x2ba   : > { %7735 = vst [vmem:[#allocation29_spill] sm:$0xff] %v6252_v27  ;;  %v6260_v32 = vadd.f32 %v7740_v22, %v7739_v55  ;;  %v6264_v34 = vadd.f32 %v7743_v21, %v7742_v59  ;;  %v7745_v58 = vld [vmem:[#allocation78_spill] sm:$0xff]  ;;  %v7746_v40 = vld [vmem:[#allocation240_spill] sm:$0xff]  ;;  %v7748_v42 = vld [vmem:[#allocation79_spill] sm:$0xff]  ;;  %v2418_v55 = vpop.f32.mrf.mxu0  ;;  %v2569_v22 = vpop.f32.mrf.mxu1  ;;  %v3002_v57 = vadd.f32 %v5996_v0, %v6092_v23 }
 0x2bb   : > { %7738 = vst [vmem:[#allocation193_spill] sm:$0xff] %v6256_v16  ;;  %v6268_v44 = vadd.f32 %v7746_v40, %v7745_v58  ;;  %v7749_v18 = vld [vmem:[#allocation241_spill] sm:$0xff]  ;;  %v7751_v4 = vld [vmem:[#allocation80_spill] sm:$0xff]  ;;  %v7752_v26 = vld [vmem:[#allocation242_spill] sm:$0xff]  ;;  %v3034_v16 = vadd.f32 %v2567_v14, %v1707_v36  ;;  %v3033_v59 = vadd.f32 %v2418_v55, %v1558_v10  ;;  %v3035_v21 = vadd.f32 %v2569_v22, %v1709_v56 }
 0x2bc   : > { %7741 = vst [vmem:[#allocation30_spill] sm:$0xff] %v6260_v32  ;;  %7744 = vst [vmem:[#allocation194_spill] sm:$0xff] %v6264_v34  ;;  %v6272_v27 = vadd.f32 %v7749_v18, %v7748_v42  ;;  %v6276_v52 = vadd.f32 %v7752_v26, %v7751_v4  ;;  %v3025_v32 = vadd.f32 %v2414_v17, %v1554_v60  ;;  %v7753_v34 = vld [vmem:[#allocation81_spill] sm:$0xff]  ;;  %v7754_v40 = vld [vmem:[#allocation82_spill] sm:$0xff]  ;;  %v6286_v4 = vpop.f32.mrf.mxu0  ;;  %v6288_v26 = vpop.f32.mrf.mxu1  ;;  %v3216_v56 = vmax.f32 %v3032_v24, 0.0 }
 0x2bd   : > { %7747 = vst [vmem:[#allocation31_spill] sm:$0xff] %v6268_v44  ;;  %v6280_v58 = vadd.f32 %v5593_v53, %v7753_v34  ;;  %v7755_v44 = vld [vmem:[#allocation243_spill] sm:$0xff]  ;;  %v3024_v18 = vadd.f32 %v2412_v51, %v1552_v38  ;;  %v3017_v36 = vadd.f32 %v2408_v39, %v6132_v6  ;;  %v3019_v60 = vadd.f32 %v2559_v11, %v6136_v19  ;;  %v7760_v34 = vld [vmem:[#allocation374_spill] sm:$0xff]  ;;  %v7763_v24 = vld [vmem:[#allocation16_spill] sm:$0xff] }
 0x2be   : > { %7750 = vst [vmem:[#allocation195_spill] sm:$0xff] %v6272_v27  ;;  %v6284_v42 = vadd.f32 %v7755_v44, %v7754_v40  ;;  %v3026_v27 = vadd.f32 %v2563_v45, %v1703_v46  ;;  %v3217_v10 = vmax.f32 %v3033_v59, 0.0  ;;  %v3219_v61 = vmax.f32 %v3035_v21, 0.0  ;;  %v6296_v38 = vpop.f32.mrf.mxu0  ;;  %v6298_v46 = vpop.f32.mrf.mxu1  ;;  %v7756_v0 = vld [vmem:[#allocation375_spill] sm:$0xff]  ;;  %v7764_v55 = vld [vmem:[#allocation372_spill] sm:$0xff] }
 0x2bf   : > { %v3016_v53 = vadd.f32 %v6138_v13, %v6124_v49  ;;  %v3218_v12 = vmax.f32 %v3034_v16, 0.0  ;;  %v3009_v45 = vadd.f32 %v6102_v62, %v6116_v29  ;;  %v3011_v39 = vadd.f32 %v6104_v30, %v6120_v63 }
 0x2c0   : > { %v3209_v6 = vmax.f32 %v3025_v32, 0.0  ;;  %v3211_v19 = vmax.f32 %v3027_v1, 0.0  ;;  %3299 = vmatprep.subr.mxu0 %v3217_v10  ;;  %3370 = vmatprep.subr.mxu1 %v3219_v61  ;;  %v3008_v49 = vadd.f32 %v6066_v20, %v6108_v54  ;;  %v3208_v13 = vmax.f32 %v3024_v18, 0.0  ;;  %v6308_v11 = vpop.f32.mrf.mxu0  ;;  %v6310_v51 = vpop.f32.mrf.mxu1  ;;  %v7767_v61 = vld [vmem:[#allocation15_spill] sm:$0xff] }
 0x2c1   : > { %v3210_v37 = vmax.f32 %v3026_v27, 0.0  ;;  %3300 = vmatpush1.msra.mxu0 %v3216_v56  ;;  %3371 = vmatpush1.msra.mxu1 %v3218_v12  ;;  %v3001_v62 = vadd.f32 %v6030_v5, %v6096_v48  ;;  %v3003_v1 = vadd.f32 %v6032_v43, %v6100_v35  ;;  %v3201_v30 = vmax.f32 %v3017_v36, 0.0  ;;  %v7765_v36 = vld [vmem:[#allocation178_spill] sm:$0xff] }
 0x2c2   : > { %v3203_v29 = vmax.f32 %v3019_v60, 0.0  ;;  %3301 = vmatprep.subr.mxu0 %v3209_v6  ;;  %3372 = vmatprep.subr.mxu1 %v3211_v19  ;;  %v3000_v20 = vadd.f32 %v5994_v33, %v6088_v3  ;;  %v3200_v54 = vmax.f32 %v3016_v53, 0.0  ;;  %v3202_v41 = vmax.f32 %v3018_v15, 0.0  ;;  %v6320_v63 = vpop.f32.mrf.mxu0  ;;  %v6322_v14 = vpop.f32.mrf.mxu1  ;;  %v7766_v60 = vld [vmem:[#allocation369_spill] sm:$0xff]  ;;  %v7768_v53 = vld [vmem:[#allocation370_spill] sm:$0xff] }
 0x2c3   : > { %3302 = vmatpush1.msra.mxu0 %v3208_v13  ;;  %3373 = vmatpush1.msra.mxu1 %v3210_v37  ;;  %v2993_v5 = vadd.f32 %v5974_v47, %v6080_v50  ;;  %v2995_v43 = vadd.f32 %v5976_v2, %v6084_v9  ;;  %v3193_v48 = vmax.f32 %v3009_v45, 0.0  ;;  %v3195_v35 = vmax.f32 %v3011_v39, 0.0  ;;  %v7757_v47 = vld [vmem:[#allocation180_spill] sm:$0xff]  ;;  %v7758_v2 = vld [vmem:[#allocation373_spill] sm:$0xff]  ;;  %v7770_v39 = vld [vmem:[#allocation367_spill] sm:$0xff] }
 0x2c4   : > { %3303 = vmatprep.subr.mxu0 %v3201_v30  ;;  %3374 = vmatprep.subr.mxu1 %v3203_v29  ;;  %v2992_v33 = vadd.f32 %v5970_v25, %v6072_v7  ;;  %v2994_v3 = vadd.f32 %v7756_v0, %v6076_v28  ;;  %v3192_v23 = vmax.f32 %v3008_v49, 0.0  ;;  %v3194_v16 = vmax.f32 %v3010_v31, 0.0  ;;  %v6332_v32 = vpop.f32.mrf.mxu0  ;;  %v6334_v17 = vpop.f32.mrf.mxu1  ;;  %v7759_v9 = vld [vmem:[#allocation17_spill] sm:$0xff]  ;;  %v7761_v25 = vld [vmem:[#allocation179_spill] sm:$0xff]  ;;  %v7771_v19 = vld [vmem:[#allocation14_spill] sm:$0xff] }
 0x2c5   : > { %3304 = vmatpush1.msra.mxu0 %v3200_v54  ;;  %3375 = vmatpush1.msra.mxu1 %v3202_v41  ;;  %v2985_v50 = vadd.f32 %v7758_v2, %v7757_v47  ;;  %v2987_v44 = vadd.f32 %v7760_v34, %v7759_v9  ;;  %v3185_v27 = vmax.f32 %v3001_v62, 0.0  ;;  %v3187_v8 = vmax.f32 %v3003_v1, 0.0  ;;  %v7762_v7 = vld [vmem:[#allocation371_spill] sm:$0xff]  ;;  %v7769_v45 = vld [vmem:[#allocation177_spill] sm:$0xff]  ;;  %v7772_v49 = vld [vmem:[#allocation368_spill] sm:$0xff] }
 0x2c6   : > { %3305 = vmatprep.subr.mxu0 %v3193_v48  ;;  %3376 = vmatprep.subr.mxu1 %v3195_v35  ;;  %v2984_v28 = vadd.f32 %v7762_v7, %v7761_v25  ;;  %v2986_v22 = vadd.f32 %v7764_v55, %v7763_v24  ;;  %v3184_v59 = vmax.f32 %v3000_v20, 0.0  ;;  %v3186_v21 = vmax.f32 %v3002_v57, 0.0  ;;  %v6344_v40 = vpop.f32.mrf.mxu0  ;;  %v6346_v18 = vpop.f32.mrf.mxu1  ;;  %v7773_v30 = vld [vmem:[#allocation176_spill] sm:$0xff]  ;;  %v7774_v29 = vld [vmem:[#allocation365_spill] sm:$0xff]  ;;  %v7776_v54 = vld [vmem:[#allocation366_spill] sm:$0xff] }
 0x2c7   : > { %3306 = vmatpush1.msra.mxu0 %v3192_v23  ;;  %3377 = vmatpush1.msra.mxu1 %v3194_v16  ;;  %v2977_v10 = vadd.f32 %v7766_v60, %v7765_v36  ;;  %v2979_v15 = vadd.f32 %v7768_v53, %v7767_v61  ;;  %v3177_v56 = vmax.f32 %v2993_v5, 0.0  ;;  %v3179_v12 = vmax.f32 %v2995_v43, 0.0  ;;  %v7775_v57 = vld [vmem:[#allocation13_spill] sm:$0xff]  ;;  %v7777_v48 = vld [vmem:[#allocation175_spill] sm:$0xff]  ;;  %v7779_v0 = vld [vmem:[#allocation12_spill] sm:$0xff] }
 0x2c8   : > { %3307 = vmatprep.subr.mxu0 %v3185_v27  ;;  %3378 = vmatprep.subr.mxu1 %v3187_v8  ;;  %v2976_v6 = vadd.f32 %v7770_v39, %v7769_v45  ;;  %v2978_v31 = vadd.f32 %v7772_v49, %v7771_v19  ;;  %v3176_v13 = vmax.f32 %v2992_v33, 0.0  ;;  %v3178_v37 = vmax.f32 %v2994_v3, 0.0  ;;  %v6356_v62 = vpop.f32.mrf.mxu0  ;;  %v6358_v1 = vpop.f32.mrf.mxu1  ;;  %v7778_v35 = vld [vmem:[#allocation363_spill] sm:$0xff]  ;;  %v7780_v3 = vld [vmem:[#allocation364_spill] sm:$0xff]  ;;  %v7781_v34 = vld [vmem:[#allocation174_spill] sm:$0xff] }
 0x2c9   : > { %3308 = vmatpush1.msra.mxu0 %v3184_v59  ;;  %3379 = vmatpush1.msra.mxu1 %v3186_v21  ;;  %v2969_v20 = vadd.f32 %v7774_v29, %v7773_v30  ;;  %v2971_v41 = vadd.f32 %v7776_v54, %v7775_v57  ;;  %v3169_v5 = vmax.f32 %v2985_v50, 0.0  ;;  %v3171_v43 = vmax.f32 %v2987_v44, 0.0  ;;  %v7782_v27 = vld [vmem:[#allocation361_spill] sm:$0xff]  ;;  %v7783_v44 = vld [vmem:[#allocation11_spill] sm:$0xff]  ;;  %v7784_v8 = vld [vmem:[#allocation362_spill] sm:$0xff] }
 0x2ca   : > { %3309 = vmatprep.subr.mxu0 %v3177_v56  ;;  %3380 = vmatprep.subr.mxu1 %v3179_v12  ;;  %v2968_v33 = vadd.f32 %v7778_v35, %v7777_v48  ;;  %v2970_v23 = vadd.f32 %v7780_v3, %v7779_v0  ;;  %v3168_v16 = vmax.f32 %v2984_v28, 0.0  ;;  %v3170_v47 = vmax.f32 %v2986_v22, 0.0  ;;  %v6368_v2 = vpop.f32.mrf.mxu0  ;;  %v6370_v9 = vpop.f32.mrf.mxu1  ;;  %v7785_v55 = vld [vmem:[#allocation173_spill] sm:$0xff]  ;;  %v7786_v59 = vld [vmem:[#allocation359_spill] sm:$0xff]  ;;  %v7787_v22 = vld [vmem:[#allocation10_spill] sm:$0xff] }
 0x2cb   : > { %3310 = vmatpush1.msra.mxu0 %v3176_v13  ;;  %3381 = vmatpush1.msra.mxu1 %v3178_v37  ;;  %v2961_v50 = vadd.f32 %v7782_v27, %v7781_v34  ;;  %v2963_v25 = vadd.f32 %v7784_v8, %v7783_v44  ;;  %v3161_v7 = vmax.f32 %v2977_v10, 0.0  ;;  %v3163_v24 = vmax.f32 %v2979_v15, 0.0  ;;  %v7788_v21 = vld [vmem:[#allocation360_spill] sm:$0xff]  ;;  %v7790_v45 = vld [vmem:[#allocation357_spill] sm:$0xff]  ;;  %v7792_v39 = vld [vmem:[#allocation358_spill] sm:$0xff] }
 0x2cc   : > { %3311 = vmatprep.subr.mxu0 %v3169_v5  ;;  %3382 = vmatprep.subr.mxu1 %v3171_v43  ;;  %v2960_v28 = vadd.f32 %v7786_v59, %v7785_v55  ;;  %v2962_v36 = vadd.f32 %v7788_v21, %v7787_v22  ;;  %v3160_v60 = vmax.f32 %v2976_v6, 0.0  ;;  %v3162_v61 = vmax.f32 %v2978_v31, 0.0  ;;  %v6380_v53 = vpop.f32.mrf.mxu0  ;;  %v6382_v56 = vpop.f32.mrf.mxu1  ;;  %v7789_v12 = vld [vmem:[#allocation172_spill] sm:$0xff]  ;;  %v7791_v15 = vld [vmem:[#allocation9_spill] sm:$0xff]  ;;  %v7793_v37 = vld [vmem:[#allocation171_spill] sm:$0xff] }
 0x2cd   : > { %3312 = vmatpush1.msra.mxu0 %v3168_v16  ;;  %3383 = vmatpush1.msra.mxu1 %v3170_v47  ;;  %v2953_v10 = vadd.f32 %v7790_v45, %v7789_v12  ;;  %v2955_v19 = vadd.f32 %v7792_v39, %v7791_v15  ;;  %v3153_v49 = vmax.f32 %v2969_v20, 0.0  ;;  %v3155_v13 = vmax.f32 %v2971_v41, 0.0  ;;  %v7794_v30 = vld [vmem:[#allocation355_spill] sm:$0xff]  ;;  %v7795_v31 = vld [vmem:[#allocation8_spill] sm:$0xff]  ;;  %v7800_v3 = vld [vmem:[#allocation245_spill] sm:$0xff] }
 0x2ce   : > { %3313 = vmatprep.subr.mxu0 %v3161_v7  ;;  %3384 = vmatprep.subr.mxu1 %v3163_v24  ;;  %v2952_v6 = vadd.f32 %v7794_v30, %v7793_v37  ;;  %v7796_v29 = vld [vmem:[#allocation356_spill] sm:$0xff]  ;;  %v3152_v54 = vmax.f32 %v2968_v33, 0.0  ;;  %v3154_v5 = vmax.f32 %v2970_v23, 0.0  ;;  %v6392_v43 = vpop.f32.mrf.mxu0  ;;  %v6394_v48 = vpop.f32.mrf.mxu1  ;;  %v7797_v35 = vld [vmem:[#allocation83_spill] sm:$0xff]  ;;  %v3145_v47 = vmax.f32 %v2961_v50, 0.0  ;;  %v7801_v33 = vld [vmem:[#allocation85_spill] sm:$0xff] }
 0x2cf   : > { %v2954_v57 = vadd.f32 %v7796_v29, %v7795_v31  ;;  %3314 = vmatpush1.msra.mxu0 %v3160_v60  ;;  %3385 = vmatpush1.msra.mxu1 %v3162_v61  ;;  %v7798_v0 = vld [vmem:[#allocation244_spill] sm:$0xff]  ;;  %v3147_v34 = vmax.f32 %v2963_v25, 0.0  ;;  %v7802_v23 = vld [vmem:[#allocation246_spill] sm:$0xff]  ;;  %v7804_v8 = vld [vmem:[#allocation247_spill] sm:$0xff]  ;;  %v3144_v24 = vmax.f32 %v2960_v28, 0.0  ;;  %v3146_v55 = vmax.f32 %v2962_v36, 0.0 }
 0x2d0   : > { %v6398_v20 = vadd.f32 %v7798_v0, %v7797_v35  ;;  %v7799_v41 = vld [vmem:[#allocation84_spill] sm:$0xff]  ;;  %3315 = vmatprep.subr.mxu0 %v3153_v49  ;;  %3386 = vmatprep.subr.mxu1 %v3155_v13  ;;  %v6406_v27 = vadd.f32 %v7802_v23, %v7801_v33  ;;  %v7803_v44 = vld [vmem:[#allocation86_spill] sm:$0xff]  ;;  %v6412_v59 = vpop.f32.mrf.mxu0  ;;  %v6414_v22 = vpop.f32.mrf.mxu1  ;;  %v7805_v50 = vld [vmem:[#allocation87_spill] sm:$0xff]  ;;  %v3137_v45 = vmax.f32 %v2953_v10, 0.0  ;;  %v3139_v15 = vmax.f32 %v2955_v19, 0.0 }
 0x2d1   : > { %v6402_v16 = vadd.f32 %v7800_v3, %v7799_v41  ;;  %v6410_v7 = vadd.f32 %v7804_v8, %v7803_v44  ;;  %3316 = vmatpush1.msra.mxu0 %v3152_v54  ;;  %3387 = vmatpush1.msra.mxu1 %v3154_v5  ;;  %v7806_v25 = vld [vmem:[#allocation248_spill] sm:$0xff]  ;;  %v7808_v61 = vld [vmem:[#allocation249_spill] sm:$0xff]  ;;  %v7810_v36 = vld [vmem:[#allocation250_spill] sm:$0xff]  ;;  %v3136_v30 = vmax.f32 %v2952_v6, 0.0  ;;  %v3138_v31 = vmax.f32 %v2954_v57, 0.0 }
 0x2d2   : > { %v6418_v21 = vadd.f32 %v7806_v25, %v7805_v50  ;;  %v7807_v60 = vld [vmem:[#allocation88_spill] sm:$0xff]  ;;  %3317 = vmatprep.subr.mxu0 %v3145_v47  ;;  %3388 = vmatprep.subr.mxu1 %v3147_v34  ;;  %v7809_v28 = vld [vmem:[#allocation89_spill] sm:$0xff]  ;;  %v7811_v49 = vld [vmem:[#allocation90_spill] sm:$0xff]  ;;  %v2448_v29 = vpop.f32.mrf.mxu0  ;;  %v2599_v54 = vpop.f32.mrf.mxu1 }
 0x2d3   : > { %v6422_v12 = vadd.f32 %v7808_v61, %v7807_v60  ;;  %v6426_v39 = vadd.f32 %v7810_v36, %v7809_v28  ;;  %v7812_v13 = vld [vmem:[#allocation251_spill] sm:$0xff]  ;;  %3318 = vmatpush1.msra.mxu0 %v3144_v24  ;;  %3389 = vmatpush1.msra.mxu1 %v3146_v55  ;;  %v7814_v35 = vld [vmem:[#allocation252_spill] sm:$0xff]  ;;  %v7817_v0 = vld [vmem:[#allocation253_spill] sm:$0xff] }
 0x2d4   : > { %v6430_v37 = vadd.f32 %v7812_v13, %v7811_v49  ;;  %v7813_v5 = vld [vmem:[#allocation91_spill] sm:$0xff]  ;;  %v7816_v19 = vld [vmem:[#allocation92_spill] sm:$0xff]  ;;  %v7819_v3 = vld [vmem:[#allocation353_spill] sm:$0xff]  ;;  %3319 = vmatprep.subr.mxu0 %v3137_v45  ;;  %3390 = vmatprep.subr.mxu1 %v3139_v15  ;;  %v2452_v25 = vpop.f32.mrf.mxu0  ;;  %v2603_v60 = vpop.f32.mrf.mxu1 }
 0x2d5   : > { %v6434_v10 = vadd.f32 %v7814_v35, %v7813_v5  ;;  %v6438_v41 = vadd.f32 %v7817_v0, %v7816_v19  ;;  %v3129_v47 = vmax.f32 %v7819_v3, 0.0  ;;  %v7820_v34 = vld [vmem:[#allocation354_spill] sm:$0xff]  ;;  %v7821_v6 = vld [vmem:[#allocation335_spill] sm:$0xff]  ;;  %v7822_v23 = vld [vmem:[#allocation337_spill] sm:$0xff]  ;;  %3320 = vmatpush1.msra.mxu0 %v3136_v30  ;;  %3391 = vmatpush1.msra.mxu1 %v3138_v31 }
 0x2d6   : > { %v3131_v33 = vmax.f32 %v7820_v34, 0.0  ;;  %v7823_v8 = vld [vmem:[#allocation351_spill] sm:$0xff]  ;;  %v7824_v55 = vld [vmem:[#allocation352_spill] sm:$0xff]  ;;  %v7826_v36 = vld [vmem:[#allocation341_spill] sm:$0xff]  ;;  %v2454_v30 = vpop.f32.mrf.mxu0  ;;  %v2605_v31 = vpop.f32.mrf.mxu1 }
 0x2d7   : > { %7815 = vst [vmem:[#allocation32_spill] sm:$0xff] %v6434_v10  ;;  %7818 = vst [vmem:[#allocation196_spill] sm:$0xff] %v6438_v41  ;;  %v3128_v24 = vmax.f32 %v7823_v8, 0.0  ;;  %v3130_v50 = vmax.f32 %v7824_v55, 0.0  ;;  %v7825_v61 = vld [vmem:[#allocation339_spill] sm:$0xff]  ;;  %v3105_v49 = vmax.f32 %v7826_v36, 0.0  ;;  %3321 = vmatprep.subr.mxu0 %v3129_v47 }
 0x2d8   : > { %v3104_v28 = vmax.f32 %v7825_v61, 0.0  ;;  %v7827_v13 = vld [vmem:[#allocation349_spill] sm:$0xff]  ;;  %v7828_v45 = vld [vmem:[#allocation350_spill] sm:$0xff]  ;;  %3392 = vmatprep.subr.mxu1 %v3131_v33  ;;  %v7829_v35 = vld [vmem:[#allocation343_spill] sm:$0xff] }
 0x2d9   : > { %v3121_v5 = vmax.f32 %v7827_v13, 0.0  ;;  %v3123_v15 = vmax.f32 %v7828_v45, 0.0  ;;  %v3112_v19 = vmax.f32 %v7829_v35, 0.0  ;;  %v7830_v0 = vld [vmem:[#allocation345_spill] sm:$0xff]  ;;  %v7831_v34 = vld [vmem:[#allocation347_spill] sm:$0xff]  ;;  %v7832_v55 = vld [vmem:[#allocation348_spill] sm:$0xff]  ;;  %3322 = vmatpush1.msra.mxu0 %v3128_v24  ;;  %3393 = vmatpush1.msra.mxu1 %v3130_v50 }
 0x2da   : > { %v3113_v3 = vmax.f32 %v7830_v0, 0.0  ;;  %v3120_v8 = vmax.f32 %v7831_v34, 0.0  ;;  %v3122_v57 = vmax.f32 %v7832_v55, 0.0  ;;  %v7833_v61 = vld [vmem:[#allocation346_spill] sm:$0xff]  ;;  %v7835_v47 = vld [vmem:[#allocation19_spill] sm:$0xff]  ;;  %v7836_v45 = vld [vmem:[#allocation184_spill] sm:$0xff] }
 0x2db   : > { %v3115_v36 = vmax.f32 %v7833_v61, 0.0  ;;  %v7834_v44 = vld [vmem:[#allocation182_spill] sm:$0xff]  ;;  %v6461_v33 = vadd.f32 %v6298_v46, %v7835_v47  ;;  %v6465_v35 = vadd.f32 %v6320_v63, %v7836_v45  ;;  %3323 = vmatprep.subr.mxu0 %v3121_v5  ;;  %3394 = vmatprep.subr.mxu1 %v3123_v15  ;;  %v7837_v0 = vld [vmem:[#allocation344_spill] sm:$0xff]  ;;  %v7838_v24 = vld [vmem:[#allocation21_spill] sm:$0xff]  ;;  %v2456_v61 = vpop.f32.mrf.mxu0  ;;  %v2607_v47 = vpop.f32.mrf.mxu1 }
 0x2dc   : > { %v6457_v13 = vadd.f32 %v6296_v38, %v7834_v44  ;;  %v3114_v34 = vmax.f32 %v7837_v0, 0.0  ;;  %v6470_v50 = vadd.f32 %v6322_v14, %v7838_v24  ;;  %v7839_v55 = vld [vmem:[#allocation186_spill] sm:$0xff]  ;;  %v7840_v44 = vld [vmem:[#allocation23_spill] sm:$0xff]  ;;  %3324 = vmatpush1.msra.mxu0 %v3120_v8  ;;  %3395 = vmatpush1.msra.mxu1 %v3122_v57  ;;  %v7842_v15 = vld [vmem:[#allocation188_spill] sm:$0xff] }
 0x2dd   : > { %v6474_v38 = vadd.f32 %v6344_v40, %v7839_v55  ;;  %v6478_v46 = vadd.f32 %v6346_v18, %v7840_v44  ;;  %v7841_v63 = vld [vmem:[#allocation342_spill] sm:$0xff]  ;;  %v6483_v45 = vadd.f32 %v6368_v2, %v7842_v15  ;;  %v7844_v24 = vld [vmem:[#allocation31_spill] sm:$0xff]  ;;  %3325 = vmatprep.subr.mxu0 %v3113_v3  ;;  %3396 = vmatprep.subr.mxu1 %v3115_v36  ;;  %v7845_v40 = vld [vmem:[#allocation340_spill] sm:$0xff]  ;;  %v2608_v10 = vpop.f32.mrf.mxu1 }
 0x2de   : > { %v3107_v5 = vmax.f32 %v7841_v63, 0.0  ;;  %v7843_v14 = vld [vmem:[#allocation194_spill] sm:$0xff]  ;;  %v3091_v41 = vadd.f32 %v2605_v31, %v7844_v24  ;;  %v3106_v55 = vmax.f32 %v7845_v40, 0.0  ;;  %v7846_v18 = vld [vmem:[#allocation25_spill] sm:$0xff]  ;;  %v2457_v63 = vpop.f32.mrf.mxu0  ;;  %3326 = vmatpush1.msra.mxu0 %v3112_v19  ;;  %3397 = vmatpush1.msra.mxu1 %v3114_v34  ;;  %v7851_v31 = vld [vmem:[#allocation192_spill] sm:$0xff] }
 0x2df   : > { %v3089_v0 = vadd.f32 %v2454_v30, %v7843_v14  ;;  %v6490_v44 = vadd.f32 %v6370_v9, %v7846_v18  ;;  %v7847_v8 = vld [vmem:[#allocation193_spill] sm:$0xff]  ;;  %v7848_v61 = vld [vmem:[#allocation30_spill] sm:$0xff]  ;;  %v3081_v36 = vadd.f32 %v2448_v29, %v7851_v31  ;;  %3327 = vmatprep.subr.mxu0 %v3105_v49  ;;  %v7853_v9 = vld [vmem:[#allocation336_spill] sm:$0xff] }
 0x2e0   : > { %v3088_v57 = vadd.f32 %v2452_v25, %v7847_v8  ;;  %v3090_v47 = vadd.f32 %v2603_v60, %v7848_v61  ;;  %v7849_v2 = vld [vmem:[#allocation338_spill] sm:$0xff]  ;;  %v7852_v14 = vld [vmem:[#allocation29_spill] sm:$0xff]  ;;  %3398 = vmatprep.subr.mxu1 %v3107_v5  ;;  %v3098_v40 = vmax.f32 %v7853_v9, 0.0  ;;  %v7854_v25 = vld [vmem:[#allocation27_spill] sm:$0xff]  ;;  %v2644_v8 = vpop.f32.mrf.mxu0  ;;  %v2795_v61 = vpop.f32.mrf.mxu1  ;;  %3328 = vmatpush1.msra.mxu0 %v3104_v28  ;;  %v3275_v29 = vmax.f32 %v3091_v41, 0.0 }
 0x2e1   : > { %v3099_v30 = vmax.f32 %v7849_v2, 0.0  ;;  %v7850_v15 = vld [vmem:[#allocation190_spill] sm:$0xff]  ;;  %v3083_v24 = vadd.f32 %v2599_v54, %v7852_v14  ;;  %v3075_v60 = vadd.f32 %v6394_v48, %v7854_v25  ;;  %v7855_v18 = vld [vmem:[#allocation191_spill] sm:$0xff]  ;;  %v7856_v19 = vld [vmem:[#allocation28_spill] sm:$0xff]  ;;  %3399 = vmatpush1.msra.mxu1 %v3106_v55  ;;  %v6510_v5 = vadd.f32 %v2795_v61, %v6276_v52 }
 0x2e2   : > { %v3073_v3 = vadd.f32 %v6392_v43, %v7850_v15  ;;  %v3080_v10 = vadd.f32 %v6412_v59, %v7855_v18  ;;  %v3082_v34 = vadd.f32 %v6414_v22, %v7856_v19  ;;  %v3273_v43 = vmax.f32 %v3089_v0, 0.0  ;;  %v7857_v54 = vld [vmem:[#allocation195_spill] sm:$0xff]  ;;  %v7861_v59 = vld [vmem:[#allocation189_spill] sm:$0xff]  ;;  %v7862_v22 = vld [vmem:[#allocation26_spill] sm:$0xff]  ;;  %v2646_v0 = vpop.f32.mrf.mxu0  ;;  %v2797_v41 = vpop.f32.mrf.mxu1 }
 0x2e3   : > { %v6507_v49 = vadd.f32 %v2644_v8, %v7857_v54  ;;  %7859 = vst [vmem:[#allocation197_spill] sm:$0xff] %v6510_v5  ;;  %v7860_v48 = vmax.f32 %v7822_v23, 0.0  ;;  %3400 = vmatprep.subr.mxu1 %v3099_v30  ;;  %v3072_v63 = vadd.f32 %v6380_v53, %v7861_v59  ;;  %v3074_v2 = vadd.f32 %v6382_v56, %v7862_v22  ;;  %v7866_v53 = vld [vmem:[#allocation187_spill] sm:$0xff]  ;;  %v7875_v61 = vld [vmem:[#allocation20_spill] sm:$0xff] }
 0x2e4   : > { %v3272_v28 = vmax.f32 %v3088_v57, 0.0  ;;  %v3274_v55 = vmax.f32 %v3090_v47, 0.0  ;;  %v7863_v15 = vmax.f32 %v7821_v6, 0.0  ;;  %3401 = vmatpush1.msra.mxu1 %v3098_v40  ;;  %v3265_v52 = vmax.f32 %v3081_v36, 0.0  ;;  %v7867_v57 = vld [vmem:[#allocation24_spill] sm:$0xff]  ;;  %v2648_v9 = vpop.f32.mrf.mxu0  ;;  %v2799_v40 = vpop.f32.mrf.mxu1  ;;  %v7939_v5 = vld [vmem:[#allocation103_spill] sm:$0xff] }
 0x2e5   : > { %7858 = vst [vmem:[#allocation33_spill] sm:$0xff] %v6507_v49  ;;  %3329 = vmatprep.subr.mxu0 %v7860_v48  ;;  %v3267_v31 = vmax.f32 %v3083_v24, 0.0  ;;  %v6521_v23 = vadd.f32 %v2646_v0, %v6280_v58  ;;  %v6524_v30 = vadd.f32 %v2797_v41, %v6284_v42  ;;  %3420 = vmatprep.subr.mxu1 %v3275_v29  ;;  %v3264_v14 = vmax.f32 %v3080_v10, 0.0  ;;  %v7940_v49 = vld [vmem:[#allocation264_spill] sm:$0xff] }
 0x2e6   : > { %3330 = vmatpush1.msra.mxu0 %v7863_v15  ;;  %v3064_v56 = vadd.f32 %v6356_v62, %v7866_v53  ;;  %v3066_v47 = vadd.f32 %v6358_v1, %v7867_v57  ;;  %v3266_v6 = vmax.f32 %v3082_v34, 0.0  ;;  %3421 = vmatpush2.msra.mxu1 %v3274_v55  ;;  %v3257_v36 = vmax.f32 %v3073_v3, 0.0  ;;  %v7870_v62 = vld [vmem:[#allocation185_spill] sm:$0xff]  ;;  %v7871_v1 = vld [vmem:[#allocation22_spill] sm:$0xff]  ;;  %v2650_v34 = vpop.f32.mrf.mxu0  ;;  %v2801_v8 = vpop.f32.mrf.mxu1 }
 0x2e7   : > { %7864 = vst [vmem:[#allocation34_spill] sm:$0xff] %v6521_v23  ;;  %7865 = vst [vmem:[#allocation198_spill] sm:$0xff] %v6524_v30  ;;  %3349 = vmatprep.subr.mxu0 %v3273_v43  ;;  %v3259_v58 = vmax.f32 %v3075_v60, 0.0  ;;  %v6531_v24 = vadd.f32 %v2648_v9, %v6398_v20  ;;  %v6534_v42 = vadd.f32 %v2799_v40, %v6402_v16  ;;  %3422 = vmatprep.subr.mxu1 %v3267_v31  ;;  %v7884_v15 = vld [vmem:[#allocation94_spill] sm:$0xff]  ;;  %v7890_v9 = vld [vmem:[#allocation95_spill] sm:$0xff] }
 0x2e8   : > { %3350 = vmatpush2.msra.mxu0 %v3272_v28  ;;  %v3056_v25 = vadd.f32 %v6332_v32, %v7870_v62  ;;  %v3058_v18 = vadd.f32 %v6334_v17, %v7871_v1  ;;  %v3256_v10 = vmax.f32 %v3072_v63, 0.0  ;;  %v3258_v19 = vmax.f32 %v3074_v2, 0.0  ;;  %3423 = vmatpush2.msra.mxu1 %v3266_v6  ;;  %v7874_v32 = vld [vmem:[#allocation183_spill] sm:$0xff]  ;;  %v2654_v48 = vpop.f32.mrf.mxu0  ;;  %v7879_v63 = vld [vmem:[#allocation18_spill] sm:$0xff]  ;;  %v7891_v40 = vld [vmem:[#allocation256_spill] sm:$0xff] }
 0x2e9   : > { %7868 = vst [vmem:[#allocation35_spill] sm:$0xff] %v6531_v24  ;;  %7869 = vst [vmem:[#allocation199_spill] sm:$0xff] %v6534_v42  ;;  %3351 = vmatprep.subr.mxu0 %v3265_v52  ;;  %v3249_v20 = vmax.f32 %v6483_v45, 0.0  ;;  %v3251_v3 = vmax.f32 %v6490_v44, 0.0  ;;  %v6543_v16 = vadd.f32 %v2650_v34, %v6406_v27  ;;  %v6546_v60 = vadd.f32 %v2801_v8, %v6410_v7  ;;  %v2805_v45 = vpop.f32.mrf.mxu1  ;;  %v7885_v52 = vld [vmem:[#allocation255_spill] sm:$0xff]  ;;  %v7896_v34 = vld [vmem:[#allocation97_spill] sm:$0xff] }
 0x2ea   : > { %3352 = vmatpush2.msra.mxu0 %v3264_v14  ;;  %3424 = vmatprep.subr.mxu1 %v3259_v58  ;;  %v3048_v17 = vadd.f32 %v6308_v11, %v7874_v32  ;;  %v3050_v43 = vadd.f32 %v6310_v51, %v7875_v61  ;;  %v3248_v29 = vmax.f32 %v3064_v56, 0.0  ;;  %v3250_v54 = vmax.f32 %v3066_v47, 0.0  ;;  %v7878_v11 = vld [vmem:[#allocation181_spill] sm:$0xff]  ;;  %v2656_v55 = vpop.f32.mrf.mxu0  ;;  %v7888_v14 = vld [vmem:[#allocation196_spill] sm:$0xff]  ;;  %v7897_v8 = vld [vmem:[#allocation258_spill] sm:$0xff] }
 0x2eb   : > { %7872 = vst [vmem:[#allocation36_spill] sm:$0xff] %v6543_v16  ;;  %7873 = vst [vmem:[#allocation200_spill] sm:$0xff] %v6546_v60  ;;  %3353 = vmatprep.subr.mxu0 %v3257_v36  ;;  %3425 = vmatpush2.msra.mxu1 %v3258_v19  ;;  %v3241_v27 = vmax.f32 %v6474_v38, 0.0  ;;  %v3243_v44 = vmax.f32 %v6478_v46, 0.0  ;;  %v6555_v7 = vadd.f32 %v2654_v48, %v6418_v21  ;;  %v3240_v2 = vmax.f32 %v3056_v25, 0.0  ;;  %v2807_v38 = vpop.f32.mrf.mxu1  ;;  %v7899_v61 = vld [vmem:[#allocation259_spill] sm:$0xff] }
 0x2ec   : > { %3354 = vmatpush2.msra.mxu0 %v3256_v10  ;;  %v6558_v59 = vadd.f32 %v2805_v45, %v6422_v12  ;;  %3426 = vmatprep.subr.mxu1 %v3251_v3  ;;  %v3040_v51 = vadd.f32 %v6286_v4, %v7878_v11  ;;  %v3042_v22 = vadd.f32 %v6288_v26, %v7879_v63  ;;  %v3242_v28 = vmax.f32 %v3058_v18, 0.0  ;;  %v7882_v4 = vld [vmem:[#allocation93_spill] sm:$0xff]  ;;  %v7883_v26 = vld [vmem:[#allocation254_spill] sm:$0xff]  ;;  %v2658_v57 = vpop.f32.mrf.mxu0  ;;  %v7949_v42 = vld [vmem:[#allocation267_spill] sm:$0xff] }
 0x2ed   : > { %7876 = vst [vmem:[#allocation37_spill] sm:$0xff] %v6555_v7  ;;  %3355 = vmatprep.subr.mxu0 %v3249_v20  ;;  %3427 = vmatpush2.msra.mxu1 %v3250_v54  ;;  %v3233_v21 = vmax.f32 %v6465_v35, 0.0  ;;  %v3235_v46 = vmax.f32 %v6470_v50, 0.0  ;;  %v6567_v12 = vadd.f32 %v2656_v55, %v6426_v39  ;;  %v6570_v0 = vadd.f32 %v2807_v38, %v6430_v37  ;;  %v2809_v35 = vpop.f32.mrf.mxu1  ;;  %v7886_v37 = vld [vmem:[#allocation32_spill] sm:$0xff]  ;;  %v7893_v18 = vld [vmem:[#allocation257_spill] sm:$0xff]  ;;  %v7903_v11 = vld [vmem:[#allocation330_spill] sm:$0xff] }
 0x2ee   : > { %7877 = vst [vmem:[#allocation201_spill] sm:$0xff] %v6558_v59  ;;  %3356 = vmatpush2.msra.mxu0 %v3248_v29  ;;  %3428 = vmatprep.subr.mxu1 %v3243_v44  ;;  %v1800_v41 = vadd.f32 %v7883_v26, %v7882_v4  ;;  %v1951_v31 = vadd.f32 %v7885_v52, %v7884_v15  ;;  %v3232_v53 = vmax.f32 %v3048_v17, 0.0  ;;  %v3234_v56 = vmax.f32 %v3050_v43, 0.0  ;;  %v2660_v25 = vpop.f32.mrf.mxu0  ;;  %v7898_v17 = vld [vmem:[#allocation98_spill] sm:$0xff]  ;;  %v7943_v30 = vld [vmem:[#allocation265_spill] sm:$0xff]  ;;  %v7952_v24 = vld [vmem:[#allocation268_spill] sm:$0xff] }
 0x2ef   : > { %7880 = vst [vmem:[#allocation38_spill] sm:$0xff] %v6567_v12  ;;  %7881 = vst [vmem:[#allocation202_spill] sm:$0xff] %v6570_v0  ;;  %3357 = vmatprep.subr.mxu0 %v3241_v27  ;;  %3429 = vmatpush2.msra.mxu1 %v3242_v28  ;;  %v3225_v39 = vmax.f32 %v6457_v13, 0.0  ;;  %v3227_v50 = vmax.f32 %v6461_v33, 0.0  ;;  %v6579_v47 = vadd.f32 %v2658_v57, %v7886_v37  ;;  %v3224_v58 = vmax.f32 %v3040_v51, 0.0  ;;  %v2811_v1 = vpop.f32.mrf.mxu1  ;;  %v7892_v13 = vld [vmem:[#allocation96_spill] sm:$0xff] }
 0x2f0   : > { %3358 = vmatpush2.msra.mxu0 %v3240_v2  ;;  %v6582_v6 = vadd.f32 %v2809_v35, %v7888_v14  ;;  %3430 = vmatprep.subr.mxu1 %v3235_v46  ;;  %v1804_v36 = vadd.f32 %v7891_v40, %v7890_v9  ;;  %v3226_v62 = vmax.f32 %v3042_v22, 0.0  ;;  %v1955_v33 = vadd.f32 %v7893_v18, %v7892_v13  ;;  %v2664_v3 = vpop.f32.mrf.mxu0  ;;  %v7946_v23 = vld [vmem:[#allocation266_spill] sm:$0xff]  ;;  %v7954_v16 = vld [vmem:[#allocation108_spill] sm:$0xff]  ;;  %v7955_v59 = vld [vmem:[#allocation269_spill] sm:$0xff] }
 0x2f1   : > { %7887 = vst [vmem:[#allocation39_spill] sm:$0xff] %v6579_v47  ;;  %3359 = vmatprep.subr.mxu0 %v3233_v21  ;;  %3431 = vmatpush2.msra.mxu1 %v3234_v56  ;;  %v6588_v10 = vadd.f32 %v2660_v25, %v1800_v41  ;;  %v6590_v19 = vadd.f32 %v2811_v1, %v1951_v31  ;;  %v2815_v32 = vpop.f32.mrf.mxu1  ;;  %v7182_v48 = vmov 0.00390625   ;;  %v7958_v7 = vld [vmem:[#allocation270_spill] sm:$0xff]  ;;  %v7961_v0 = vld [vmem:[#allocation271_spill] sm:$0xff]  ;;  %v7964_v12 = vld [vmem:[#allocation272_spill] sm:$0xff] }
 0x2f2   : > { %7889 = vst [vmem:[#allocation203_spill] sm:$0xff] %v6582_v6  ;;  %3360 = vmatpush2.msra.mxu0 %v3232_v53  ;;  %3432 = vmatprep.subr.mxu1 %v3227_v50  ;;  %v1806_v20 = vadd.f32 %v7897_v8, %v7896_v34  ;;  %v1957_v43 = vadd.f32 %v7899_v61, %v7898_v17  ;;  %v2666_v27 = vpop.f32.mrf.mxu0  ;;  %v7928_v34 = vld [vmem:[#allocation260_spill] sm:$0xff]  ;;  %v7933_v17 = vld [vmem:[#allocation101_spill] sm:$0xff]  ;;  %v7934_v61 = vld [vmem:[#allocation262_spill] sm:$0xff] }
 0x2f3   : > { %7894 = vst [vmem:[#allocation40_spill] sm:$0xff] %v6588_v10  ;;  %7895 = vst [vmem:[#allocation204_spill] sm:$0xff] %v6590_v19  ;;  %3361 = vmatprep.subr.mxu0 %v3225_v39  ;;  %3433 = vmatpush2.msra.mxu1 %v3226_v62  ;;  %v6596_v29 = vadd.f32 %v2664_v3, %v1804_v36  ;;  %v6598_v54 = vadd.f32 %v2815_v32, %v1955_v33  ;;  %v2817_v44 = vpop.f32.mrf.mxu1  ;;  %v7927_v33 = vld [vmem:[#allocation99_spill] sm:$0xff]  ;;  %v7931_v3 = vld [vmem:[#allocation261_spill] sm:$0xff] }
 0x2f4   : > { %3362 = vmatpush2.msra.mxu0 %v3224_v58  ;;  %4101 = vmatmul.mubr.msk.f32.vlgmr.msra.gmra.mxu1 %vm5814_vm8, %v7182_v48  ;;  %v6610_v51 = vadd.f32 %v2666_v27, %v1806_v20  ;;  %v6612_v63 = vadd.f32 %v2817_v44, %v1957_v43  ;;  %v6614_v22 = vpop.f32.mrf.mxu0  ;;  %v6676_v8 = vadd.f32 %v7928_v34, %v7927_v33  ;;  %v7930_v20 = vld [vmem:[#allocation100_spill] sm:$0xff]  ;;  %v7936_v27 = vld [vmem:[#allocation102_spill] sm:$0xff]  ;;  %v7937_v44 = vld [vmem:[#allocation263_spill] sm:$0xff] }
 0x2f5   : > { %7900 = vst [vmem:[#allocation41_spill] sm:$0xff] %v6596_v29  ;;  %7901 = vst [vmem:[#allocation205_spill] sm:$0xff] %v6598_v54  ;;  %4099 = vmatmul.mubr.msk.f32.vlgmr.msra.gmra.mxu0 %vm5814_vm8, %v7182_v48  ;;  %4104 = vmatprep.mubr.msk.f32.mxu1 %vm3295_vm10, %v7903_v11  ;;  %v6616_v2 = vpop.f32.mrf.mxu1  ;;  %v6680_v32 = vadd.f32 %v7931_v3, %v7930_v20  ;;  %v6684_v43 = vadd.f32 %v7934_v61, %v7933_v17  ;;  %v7942_v34 = vld [vmem:[#allocation104_spill] sm:$0xff]  ;;  %v7945_v3 = vld [vmem:[#allocation105_spill] sm:$0xff] }
 0x2f6   : > { %4102 = vmatprep.mubr.msk.f32.mxu0 %vm3295_vm10, %v7903_v11  ;;  %7904 = vst [vmem:[#allocation42_spill] sm:$0xff] %v6610_v51  ;;  %7905 = vst [vmem:[#allocation206_spill] sm:$0xff] %v6612_v63  ;;  %v6618_v28 = vpop.f32.mrf.mxu0  ;;  %v6688_v11 = vadd.f32 %v7937_v44, %v7936_v27  ;;  %v6696_v33 = vadd.f32 %v7940_v49, %v7939_v5  ;;  %v6700_v20 = vadd.f32 %v7943_v30, %v7942_v34  ;;  %v7948_v61 = vld [vmem:[#allocation106_spill] sm:$0xff]  ;;  %v7951_v44 = vld [vmem:[#allocation107_spill] sm:$0xff] }
 0x2f7   : > { %7906 = vst [vmem:[#allocation43_spill] sm:$0xff] %v6614_v22  ;;  %7907 = vst [vmem:[#allocation207_spill] sm:$0xff] %v6616_v2  ;;  %v6620_v55 = vpop.f32.mrf.mxu1  ;;  %v6704_v17 = vadd.f32 %v7946_v23, %v7945_v3  ;;  %v6708_v27 = vadd.f32 %v7949_v42, %v7948_v61  ;;  %v6712_v60 = vadd.f32 %v7952_v24, %v7951_v44  ;;  %v7957_v5 = vld [vmem:[#allocation109_spill] sm:$0xff]  ;;  %v7960_v34 = vld [vmem:[#allocation110_spill] sm:$0xff] }
 0x2f8   : > { %7908 = vst [vmem:[#allocation44_spill] sm:$0xff] %v6618_v28  ;;  %7909 = vst [vmem:[#allocation208_spill] sm:$0xff] %v6620_v55  ;;  %v6622_v38 = vpop.f32.mrf.mxu0  ;;  %v6716_v49 = vadd.f32 %v7955_v59, %v7954_v16  ;;  %v6720_v30 = vadd.f32 %v7958_v7, %v7957_v5  ;;  %v6724_v23 = vadd.f32 %v7961_v0, %v7960_v34  ;;  %v7963_v61 = vld [vmem:[#allocation111_spill] sm:$0xff]  ;;  %v7966_v44 = vld [vmem:[#allocation112_spill] sm:$0xff] }
 0x2f9   : > { %7910 = vst [vmem:[#allocation45_spill] sm:$0xff] %v6622_v38  ;;  %v6624_v21 = vpop.f32.mrf.mxu1  ;;  %7929 = vst [vmem:[#allocation54_spill] sm:$0xff] %v6676_v8  ;;  %v6732_v24 = vadd.f32 %v7964_v12, %v7963_v61  ;;  %v7967_v6 = vld [vmem:[#allocation273_spill] sm:$0xff]  ;;  %v7970_v47 = vld [vmem:[#allocation274_spill] sm:$0xff] }
 0x2fa   : > { %7911 = vst [vmem:[#allocation209_spill] sm:$0xff] %v6624_v21  ;;  %v6626_v46 = vpop.f32.mrf.mxu0  ;;  %7932 = vst [vmem:[#allocation217_spill] sm:$0xff] %v6680_v32  ;;  %v6736_v16 = vadd.f32 %v7967_v6, %v7966_v44  ;;  %v7969_v59 = vld [vmem:[#allocation113_spill] sm:$0xff]  ;;  %v7972_v5 = vld [vmem:[#allocation114_spill] sm:$0xff] }
 0x2fb   : > { %7912 = vst [vmem:[#allocation46_spill] sm:$0xff] %v6626_v46  ;;  %v6628_v4 = vpop.f32.mrf.mxu1  ;;  %7935 = vst [vmem:[#allocation55_spill] sm:$0xff] %v6684_v43  ;;  %v6740_v7 = vadd.f32 %v7970_v47, %v7969_v59  ;;  %v7973_v19 = vld [vmem:[#allocation275_spill] sm:$0xff]  ;;  %v7976_v10 = vld [vmem:[#allocation276_spill] sm:$0xff] }
 0x2fc   : > { %7913 = vst [vmem:[#allocation210_spill] sm:$0xff] %v6628_v4  ;;  %v6630_v26 = vpop.f32.mrf.mxu0  ;;  %7938 = vst [vmem:[#allocation218_spill] sm:$0xff] %v6688_v11  ;;  %v6744_v0 = vadd.f32 %v7973_v19, %v7972_v5  ;;  %v7975_v34 = vld [vmem:[#allocation115_spill] sm:$0xff]  ;;  %v7978_v29 = vld [vmem:[#allocation116_spill] sm:$0xff] }
 0x2fd   : > { %7914 = vst [vmem:[#allocation47_spill] sm:$0xff] %v6630_v26  ;;  %v6632_v41 = vpop.f32.mrf.mxu1  ;;  %7941 = vst [vmem:[#allocation56_spill] sm:$0xff] %v6696_v33  ;;  %v6748_v54 = vadd.f32 %v7976_v10, %v7975_v34  ;;  %v7979_v63 = vld [vmem:[#allocation277_spill] sm:$0xff]  ;;  %v7982_v51 = vld [vmem:[#allocation278_spill] sm:$0xff] }
 0x2fe   : > { %7915 = vst [vmem:[#allocation211_spill] sm:$0xff] %v6632_v41  ;;  %v6634_v15 = vpop.f32.mrf.mxu0  ;;  %7944 = vst [vmem:[#allocation219_spill] sm:$0xff] %v6700_v20  ;;  %v6752_v12 = vadd.f32 %v7979_v63, %v7978_v29  ;;  %v7981_v61 = vld [vmem:[#allocation117_spill] sm:$0xff]  ;;  %v7984_v44 = vld [vmem:[#allocation118_spill] sm:$0xff] }
 0x2ff   : > { %7916 = vst [vmem:[#allocation48_spill] sm:$0xff] %v6634_v15  ;;  %v6636_v52 = vpop.f32.mrf.mxu1  ;;  %7947 = vst [vmem:[#allocation57_spill] sm:$0xff] %v6704_v17  ;;  %v6756_v6 = vadd.f32 %v7982_v51, %v7981_v61  ;;  %v7985_v2 = vld [vmem:[#allocation279_spill] sm:$0xff]  ;;  %v7988_v5 = vld [vmem:[#allocation280_spill] sm:$0xff] }
 0x300   : > { %7917 = vst [vmem:[#allocation212_spill] sm:$0xff] %v6636_v52  ;;  %v6638_v31 = vpop.f32.mrf.mxu0  ;;  %7950 = vst [vmem:[#allocation220_spill] sm:$0xff] %v6708_v27  ;;  %v6760_v47 = vadd.f32 %v7985_v2, %v7984_v44  ;;  %v7987_v19 = vld [vmem:[#allocation119_spill] sm:$0xff]  ;;  %v7989_v10 = vld [vmem:[#allocation120_spill] sm:$0xff] }
 0x301   : > { %7918 = vst [vmem:[#allocation49_spill] sm:$0xff] %v6638_v31  ;;  %v6640_v53 = vpop.f32.mrf.mxu1  ;;  %7953 = vst [vmem:[#allocation58_spill] sm:$0xff] %v6712_v60  ;;  %v6764_v22 = vadd.f32 %v7988_v5, %v7987_v19  ;;  %v7990_v34 = vld [vmem:[#allocation281_spill] sm:$0xff]  ;;  %v7992_v63 = vld [vmem:[#allocation282_spill] sm:$0xff] }
 0x302   : > { %7919 = vst [vmem:[#allocation213_spill] sm:$0xff] %v6640_v53  ;;  %v6642_v56 = vpop.f32.mrf.mxu0  ;;  %7956 = vst [vmem:[#allocation221_spill] sm:$0xff] %v6716_v49  ;;  %v6768_v8 = vadd.f32 %v7990_v34, %v7989_v10  ;;  %v7991_v29 = vld [vmem:[#allocation121_spill] sm:$0xff]  ;;  %v7993_v51 = vld [vmem:[#allocation122_spill] sm:$0xff] }
 0x303   : > { %7920 = vst [vmem:[#allocation50_spill] sm:$0xff] %v6642_v56  ;;  %v6644_v57 = vpop.f32.mrf.mxu1  ;;  %7959 = vst [vmem:[#allocation59_spill] sm:$0xff] %v6720_v30  ;;  %v6772_v55 = vadd.f32 %v7992_v63, %v7991_v29  ;;  %v7994_v61 = vld [vmem:[#allocation283_spill] sm:$0xff]  ;;  %v7996_v44 = vld [vmem:[#allocation284_spill] sm:$0xff] }
 0x304   : > { %7921 = vst [vmem:[#allocation214_spill] sm:$0xff] %v6644_v57  ;;  %v6646_v35 = vpop.f32.mrf.mxu0  ;;  %7962 = vst [vmem:[#allocation222_spill] sm:$0xff] %v6724_v23  ;;  %v6776_v11 = vadd.f32 %v7994_v61, %v7993_v51  ;;  %v7995_v2 = vld [vmem:[#allocation123_spill] sm:$0xff]  ;;  %v7997_v43 = vld [vmem:[#allocation124_spill] sm:$0xff] }
 0x305   : > { %7922 = vst [vmem:[#allocation51_spill] sm:$0xff] %v6646_v35  ;;  %v6648_v39 = vpop.f32.mrf.mxu1  ;;  %7965 = vst [vmem:[#allocation60_spill] sm:$0xff] %v6732_v24  ;;  %v6780_v28 = vadd.f32 %v7996_v44, %v7995_v2  ;;  %v7998_v21 = vld [vmem:[#allocation285_spill] sm:$0xff]  ;;  %v8000_v20 = vld [vmem:[#allocation286_spill] sm:$0xff] }
 0x306   : > { %7923 = vst [vmem:[#allocation215_spill] sm:$0xff] %v6648_v39  ;;  %v6650_v50 = vpop.f32.mrf.mxu0  ;;  %7968 = vst [vmem:[#allocation223_spill] sm:$0xff] %v6736_v16  ;;  %v6784_v19 = vadd.f32 %v7998_v21, %v7997_v43  ;;  %v7999_v5 = vld [vmem:[#allocation125_spill] sm:$0xff]  ;;  %v8001_v34 = vld [vmem:[#allocation126_spill] sm:$0xff] }
 0x307   : > { %7924 = vst [vmem:[#allocation52_spill] sm:$0xff] %v6650_v50  ;;  %v6652_v37 = vpop.f32.mrf.mxu1  ;;  %7971 = vst [vmem:[#allocation61_spill] sm:$0xff] %v6740_v7  ;;  %v6788_v10 = vadd.f32 %v8000_v20, %v7999_v5  ;;  %v8002_v38 = vld [vmem:[#allocation287_spill] sm:$0xff]  ;;  %v8004_v61 = vld [vmem:[#allocation288_spill] sm:$0xff] }
 0x308   : > { %7925 = vst [vmem:[#allocation216_spill] sm:$0xff] %v6652_v37  ;;  %v6654_v14 = vpop.f32.mrf.mxu0  ;;  %7974 = vst [vmem:[#allocation62_spill] sm:$0xff] %v6744_v0  ;;  %v6792_v29 = vadd.f32 %v8002_v38, %v8001_v34  ;;  %v8003_v51 = vld [vmem:[#allocation127_spill] sm:$0xff]  ;;  %v8005_v27 = vld [vmem:[#allocation128_spill] sm:$0xff] }
 0x309   : > { %v6656_v9 = vpop.f32.mrf.mxu1  ;;  %7977 = vst [vmem:[#allocation224_spill] sm:$0xff] %v6748_v54  ;;  %7980 = vst [vmem:[#allocation63_spill] sm:$0xff] %v6752_v12  ;;  %v1844_v4 = vadd.f32 %v8004_v61, %v8003_v51  ;;  %v8006_v2 = vld [vmem:[#allocation289_spill] sm:$0xff]  ;;  %v8008_v17 = vld [vmem:[#allocation290_spill] sm:$0xff] }
 0x30a   : > { %7926 = vst [vmem:[#allocation53_spill] sm:$0xff] %v6656_v9  ;;  %v6658_v40 = vpop.f32.mrf.mxu0  ;;  %7983 = vst [vmem:[#allocation225_spill] sm:$0xff] %v6756_v6  ;;  %v1995_v44 = vadd.f32 %v8006_v2, %v8005_v27  ;;  %v8007_v46 = vld [vmem:[#allocation129_spill] sm:$0xff]  ;;  %v8009_v43 = vld [vmem:[#allocation130_spill] sm:$0xff] }
 0x30b   : > { %v6660_v36 = vpop.f32.mrf.mxu1  ;;  %7986 = vst [vmem:[#allocation64_spill] sm:$0xff] %v6760_v47  ;;  %v1846_v21 = vadd.f32 %v8008_v17, %v8007_v46  ;;  %v8010_v41 = vld [vmem:[#allocation291_spill] sm:$0xff]  ;;  %v8012_v5 = vld [vmem:[#allocation292_spill] sm:$0xff]  ;;  %v8014_v38 = vld [vmem:[#allocation293_spill] sm:$0xff] }
 0x30c   : > { %v6662_v58 = vpop.f32.mrf.mxu0  ;;  %v1997_v49 = vadd.f32 %v8010_v41, %v8009_v43  ;;  %v8011_v20 = vld [vmem:[#allocation131_spill] sm:$0xff]  ;;  %v8013_v60 = vld [vmem:[#allocation132_spill] sm:$0xff]  ;;  %v8015_v52 = vld [vmem:[#allocation133_spill] sm:$0xff] }
 0x30d   : > { %v6664_v62 = vpop.f32.mrf.mxu1  ;;  %v1848_v26 = vadd.f32 %v8012_v5, %v8011_v20  ;;  %v1999_v34 = vadd.f32 %v8014_v38, %v8013_v60  ;;  %v8016_v23 = vld [vmem:[#allocation294_spill] sm:$0xff]  ;;  %v8018_v51 = vld [vmem:[#allocation295_spill] sm:$0xff]  ;;  %v8020_v16 = vld [vmem:[#allocation296_spill] sm:$0xff] }
 0x30e   : > { %v6666_v25 = vpop.f32.mrf.mxu0  ;;  %v1850_v15 = vadd.f32 %v8016_v23, %v8015_v52  ;;  %v8017_v30 = vld [vmem:[#allocation134_spill] sm:$0xff]  ;;  %v8019_v2 = vld [vmem:[#allocation135_spill] sm:$0xff]  ;;  %v8021_v17 = vld [vmem:[#allocation136_spill] sm:$0xff] }
 0x30f   : > { %v6668_v1 = vpop.f32.mrf.mxu1  ;;  %v2001_v61 = vadd.f32 %v8018_v51, %v8017_v30  ;;  %v1854_v46 = vadd.f32 %v8020_v16, %v8019_v2  ;;  %v8022_v31 = vld [vmem:[#allocation297_spill] sm:$0xff]  ;;  %v8024_v24 = vld [vmem:[#allocation298_spill] sm:$0xff]  ;;  %v8026_v57 = vld [vmem:[#allocation299_spill] sm:$0xff] }
 0x310   : > { %v6670_v13 = vpop.f32.mrf.mxu0  ;;  %v2005_v41 = vadd.f32 %v8022_v31, %v8021_v17  ;;  %v8023_v43 = vld [vmem:[#allocation137_spill] sm:$0xff]  ;;  %v8025_v5 = vld [vmem:[#allocation138_spill] sm:$0xff]  ;;  %v8027_v38 = vld [vmem:[#allocation139_spill] sm:$0xff] }
 0x311   : > { %v6672_v18 = vpop.f32.mrf.mxu1  ;;  %v1856_v20 = vadd.f32 %v8024_v24, %v8023_v43  ;;  %v2007_v60 = vadd.f32 %v8026_v57, %v8025_v5  ;;  %v8028_v0 = vld [vmem:[#allocation300_spill] sm:$0xff]  ;;  %v8030_v56 = vld [vmem:[#allocation301_spill] sm:$0xff]  ;;  %v8032_v7 = vld [vmem:[#allocation302_spill] sm:$0xff] }
 0x312   : > { %v6690_v48 = vpop.f32.mrf.mxu0  ;;  %v1858_v52 = vadd.f32 %v8028_v0, %v8027_v38  ;;  %v8029_v23 = vld [vmem:[#allocation140_spill] sm:$0xff]  ;;  %v8031_v51 = vld [vmem:[#allocation141_spill] sm:$0xff]  ;;  %v8033_v12 = vld [vmem:[#allocation142_spill] sm:$0xff] }
 0x313   : > { %v6692_v45 = vpop.f32.mrf.mxu1  ;;  %v2009_v30 = vadd.f32 %v8030_v56, %v8029_v23  ;;  %v1860_v39 = vadd.f32 %v8032_v7, %v8031_v51  ;;  %v8034_v16 = vld [vmem:[#allocation303_spill] sm:$0xff]  ;;  %v8036_v54 = vld [vmem:[#allocation304_spill] sm:$0xff]  ;;  %v8039_v57 = vld [vmem:[#allocation305_spill] sm:$0xff] }
 0x314   : > { %v6726_v3 = vpop.f32.mrf.mxu0  ;;  %v2011_v2 = vadd.f32 %v8034_v16, %v8033_v12  ;;  %v8035_v17 = vld [vmem:[#allocation143_spill] sm:$0xff]  ;;  %v8038_v43 = vld [vmem:[#allocation144_spill] sm:$0xff]  ;;  %v8041_v0 = vld [vmem:[#allocation145_spill] sm:$0xff] }
 0x315   : > { %v6728_v42 = vpop.f32.mrf.mxu1  ;;  %v6828_v24 = vadd.f32 %v8036_v54, %v8035_v17  ;;  %v6832_v5 = vadd.f32 %v8039_v57, %v8038_v43  ;;  %v8042_v38 = vld [vmem:[#allocation306_spill] sm:$0xff]  ;;  %v8045_v23 = vld [vmem:[#allocation307_spill] sm:$0xff]  ;;  %v8048_v12 = vld [vmem:[#allocation308_spill] sm:$0xff] }
 0x316   : > { %v2710_v59 = vpop.f32.mrf.mxu0  ;;  %v6836_v37 = vadd.f32 %v8042_v38, %v8041_v0  ;;  %v8044_v56 = vld [vmem:[#allocation146_spill] sm:$0xff]  ;;  %v8047_v51 = vld [vmem:[#allocation147_spill] sm:$0xff]  ;;  %v8050_v47 = vld [vmem:[#allocation148_spill] sm:$0xff] }
 0x317   : > { %v2861_v32 = vpop.f32.mrf.mxu1  ;;  %8037 = vst [vmem:[#allocation226_spill] sm:$0xff] %v6828_v24  ;;  %8040 = vst [vmem:[#allocation65_spill] sm:$0xff] %v6832_v5  ;;  %v6840_v7 = vadd.f32 %v8045_v23, %v8044_v56  ;;  %v6844_v16 = vadd.f32 %v8048_v12, %v8047_v51  ;;  %v8051_v50 = vld [vmem:[#allocation309_spill] sm:$0xff]  ;;  %v8054_v9 = vld [vmem:[#allocation310_spill] sm:$0xff] }
 0x318   : > { %v2714_v63 = vpop.f32.mrf.mxu0  ;;  %8043 = vst [vmem:[#allocation227_spill] sm:$0xff] %v6836_v37  ;;  %v6848_v54 = vadd.f32 %v8051_v50, %v8050_v47  ;;  %v8053_v37 = vld [vmem:[#allocation149_spill] sm:$0xff]  ;;  %v8055_v23 = vld [vmem:[#allocation150_spill] sm:$0xff]  ;;  %v3021_v47 = vadd.f32 %v2710_v59, %v1850_v15  ;;  %v3012_v15 = vadd.f32 %v6670_v13, %v1844_v4  ;;  %v3004_v4 = vadd.f32 %v6662_v58, %v6780_v28 }
 0x319   : > { %v2865_v33 = vpop.f32.mrf.mxu1  ;;  %8046 = vst [vmem:[#allocation66_spill] sm:$0xff] %v6840_v7  ;;  %8049 = vst [vmem:[#allocation228_spill] sm:$0xff] %v6844_v16  ;;  %v6852_v56 = vadd.f32 %v8054_v9, %v8053_v37  ;;  %v8056_v7 = vld [vmem:[#allocation311_spill] sm:$0xff]  ;;  %v3028_v12 = vadd.f32 %v2714_v63, %v1854_v46  ;;  %v3015_v63 = vadd.f32 %v6692_v45, %v1997_v49  ;;  %v8065_v58 = vld [vmem:[#allocation53_spill] sm:$0xff] }
 0x31a   : > { %v2716_v53 = vpop.f32.mrf.mxu0  ;;  %8052 = vst [vmem:[#allocation67_spill] sm:$0xff] %v6848_v54  ;;  %v6856_v51 = vadd.f32 %v8056_v7, %v8055_v23  ;;  %v3030_v16 = vadd.f32 %v2865_v33, %v2005_v41  ;;  %v3013_v33 = vadd.f32 %v6690_v48, %v1846_v21  ;;  %v3005_v48 = vadd.f32 %v6666_v25, %v6788_v10  ;;  %v8157_v54 = vld [vmem:[#allocation201_spill] sm:$0xff] }
 0x31b   : > { %v2867_v27 = vpop.f32.mrf.mxu1  ;;  %v3029_v5 = vadd.f32 %v2716_v53, %v1856_v20  ;;  %v3022_v20 = vadd.f32 %v6728_v42, %v1999_v34  ;;  %v3007_v45 = vadd.f32 %v6668_v1, %v6792_v29  ;;  %v3205_v49 = vmax.f32 %v3021_v47, 0.0  ;;  %v8074_v47 = vld [vmem:[#allocation61_spill] sm:$0xff] }
 0x31c   : > { %v2718_v35 = vpop.f32.mrf.mxu0  ;;  %v3031_v6 = vadd.f32 %v2867_v27, %v2007_v60  ;;  %8057 = vst [vmem:[#allocation229_spill] sm:$0xff] %v6856_v51  ;;  %v3006_v13 = vadd.f32 %v6664_v62, %v6784_v19  ;;  %v2997_v25 = vadd.f32 %v6658_v40, %v6772_v55  ;;  %v2999_v1 = vadd.f32 %v6660_v36, %v6776_v11  ;;  %v8066_v55 = vld [vmem:[#allocation225_spill] sm:$0xff]  ;;  %v8067_v40 = vld [vmem:[#allocation52_spill] sm:$0xff] }
 0x31d   : > { %v2869_v31 = vpop.f32.mrf.mxu1  ;;  %v3036_v17 = vadd.f32 %v2718_v35, %v1858_v52  ;;  %v3023_v52 = vadd.f32 %v2861_v32, %v2001_v61  ;;  %v3213_v46 = vmax.f32 %v3029_v5, 0.0  ;;  %v3212_v32 = vmax.f32 %v3028_v12, 0.0  ;;  %v8068_v11 = vld [vmem:[#allocation64_spill] sm:$0xff] }
 0x31e   : > { %v3038_v24 = vadd.f32 %v2869_v31, %v2009_v30  ;;  %v2720_v43 = vpop.f32.mrf.mxu0  ;;  %v3215_v41 = vmax.f32 %v3031_v6, 0.0  ;;  %v3197_v10 = vmax.f32 %v3013_v33, 0.0  ;;  %v3199_v29 = vmax.f32 %v3015_v63, 0.0  ;;  %v8078_v33 = vld [vmem:[#allocation60_spill] sm:$0xff]  ;;  %v8079_v63 = vld [vmem:[#allocation49_spill] sm:$0xff] }
 0x31f   : > { %v2871_v57 = vpop.f32.mrf.mxu1  ;;  %v3037_v0 = vadd.f32 %v2720_v43, %v1860_v39  ;;  %v3020_v39 = vadd.f32 %v6726_v3, %v1848_v26  ;;  %v3220_v37 = vmax.f32 %v3036_v17, 0.0  ;;  %v3014_v26 = vadd.f32 %v6672_v18, %v1995_v44  ;;  %v8072_v17 = vld [vmem:[#allocation63_spill] sm:$0xff] }
 0x320   : > { %v3039_v38 = vadd.f32 %v2871_v57, %v2011_v2  ;;  %v6858_v50 = vpop.f32.mrf.mxu0  ;;  %v3222_v9 = vmax.f32 %v3038_v24, 0.0  ;;  %v3214_v3 = vmax.f32 %v3030_v16, 0.0  ;;  %v3207_v6 = vmax.f32 %v3023_v52, 0.0  ;;  %v8069_v24 = vld [vmem:[#allocation216_spill] sm:$0xff]  ;;  %v8073_v43 = vld [vmem:[#allocation215_spill] sm:$0xff]  ;;  %v8075_v52 = vld [vmem:[#allocation50_spill] sm:$0xff] }
 0x321   : > { %8058 = vst [vmem:[#allocation68_spill] sm:$0xff] %v6858_v50  ;;  %v6860_v35 = vpop.f32.mrf.mxu1  ;;  %v3221_v53 = vmax.f32 %v3037_v0, 0.0  ;;  %v3204_v18 = vmax.f32 %v3020_v39, 0.0  ;;  %v3206_v44 = vmax.f32 %v3022_v20, 0.0  ;;  %v2996_v28 = vadd.f32 %v6654_v14, %v6764_v22  ;;  %v8070_v22 = vld [vmem:[#allocation224_spill] sm:$0xff]  ;;  %v8071_v14 = vld [vmem:[#allocation51_spill] sm:$0xff] }
 0x322   : > { %8059 = vst [vmem:[#allocation230_spill] sm:$0xff] %v6860_v35  ;;  %v3223_v27 = vmax.f32 %v3039_v38, 0.0  ;;  %v6864_v60 = vpop.f32.mrf.mxu0  ;;  %v2998_v62 = vadd.f32 %v8065_v58, %v6768_v8  ;;  %v3196_v19 = vmax.f32 %v3012_v15, 0.0  ;;  %v3198_v61 = vmax.f32 %v3014_v26, 0.0  ;;  %v8077_v39 = vld [vmem:[#allocation214_spill] sm:$0xff]  ;;  %v8081_v15 = vld [vmem:[#allocation213_spill] sm:$0xff] }
 0x323   : > { %8060 = vst [vmem:[#allocation69_spill] sm:$0xff] %v6864_v60  ;;  %v6866_v30 = vpop.f32.mrf.mxu1  ;;  %3441 = vmatprep.subr.mxu0 %v3221_v53  ;;  %v2989_v36 = vadd.f32 %v8067_v40, %v8066_v55  ;;  %v2991_v5 = vadd.f32 %v8069_v24, %v8068_v11  ;;  %v3189_v7 = vmax.f32 %v3005_v48, 0.0  ;;  %v3191_v16 = vmax.f32 %v3007_v45, 0.0  ;;  %v8088_v58 = vld [vmem:[#allocation221_spill] sm:$0xff]  ;;  %v8150_v50 = vld [vmem:[#allocation38_spill] sm:$0xff]  ;;  %v8155_v60 = vld [vmem:[#allocation332_spill] sm:$0xff] }
 0x324   : > { %8061 = vst [vmem:[#allocation231_spill] sm:$0xff] %v6866_v30  ;;  %3512 = vmatprep.subr.mxu1 %v3223_v27  ;;  %v6872_v42 = vpop.f32.mrf.mxu0  ;;  %3442 = vmatpush1.msra.mxu0 %v3220_v37  ;;  %v2988_v8 = vadd.f32 %v8071_v14, %v8070_v22  ;;  %v2990_v57 = vadd.f32 %v8073_v43, %v8072_v17  ;;  %v3188_v0 = vmax.f32 %v3004_v4, 0.0  ;;  %v3190_v38 = vmax.f32 %v3006_v13, 0.0  ;;  %v8076_v27 = vld [vmem:[#allocation62_spill] sm:$0xff]  ;;  %v8090_v24 = vld [vmem:[#allocation57_spill] sm:$0xff]  ;;  %v8094_v43 = vld [vmem:[#allocation56_spill] sm:$0xff] }
 0x325   : > { %8062 = vst [vmem:[#allocation70_spill] sm:$0xff] %v6872_v42  ;;  %v6874_v59 = vpop.f32.mrf.mxu1  ;;  %3513 = vmatpush1.msra.mxu1 %v3222_v9  ;;  %3443 = vmatprep.subr.mxu0 %v3213_v46  ;;  %v2981_v53 = vadd.f32 %v8075_v52, %v8074_v47  ;;  %v2983_v20 = vadd.f32 %v8077_v39, %v8076_v27  ;;  %v3181_v37 = vmax.f32 %v2997_v25, 0.0  ;;  %v3183_v9 = vmax.f32 %v2999_v1, 0.0  ;;  %v8084_v13 = vld [vmem:[#allocation222_spill] sm:$0xff] }
 0x326   : > { %8063 = vst [vmem:[#allocation232_spill] sm:$0xff] %v6874_v59  ;;  %3514 = vmatprep.subr.mxu1 %v3215_v41  ;;  %v6884_v21 = vpop.f32.mrf.mxu0  ;;  %3444 = vmatpush1.msra.mxu0 %v3212_v32  ;;  %v2980_v46 = vadd.f32 %v8079_v63, %v8078_v33  ;;  %v8080_v41 = vld [vmem:[#allocation223_spill] sm:$0xff]  ;;  %v3180_v32 = vmax.f32 %v2996_v28, 0.0  ;;  %v3173_v25 = vmax.f32 %v2989_v36, 0.0  ;;  %v3175_v1 = vmax.f32 %v2991_v5, 0.0  ;;  %v8092_v5 = vld [vmem:[#allocation220_spill] sm:$0xff] }
 0x327   : > { %v6886_v34 = vpop.f32.mrf.mxu1  ;;  %3515 = vmatpush1.msra.mxu1 %v3214_v3  ;;  %3445 = vmatprep.subr.mxu0 %v3205_v49  ;;  %v2982_v26 = vadd.f32 %v8081_v15, %v8080_v41  ;;  %v3182_v3 = vmax.f32 %v2998_v62, 0.0  ;;  %v8082_v49 = vld [vmem:[#allocation59_spill] sm:$0xff]  ;;  %v3174_v55 = vmax.f32 %v2990_v57, 0.0  ;;  %v3165_v14 = vmax.f32 %v2981_v53, 0.0  ;;  %v8099_v33 = vld [vmem:[#allocation44_spill] sm:$0xff] }
 0x328   : > { %8064 = vst [vmem:[#allocation71_spill] sm:$0xff] %v6886_v34  ;;  %3516 = vmatprep.subr.mxu1 %v3207_v6  ;;  %v6896_v2 = vpop.f32.mrf.mxu0  ;;  %3446 = vmatpush1.msra.mxu0 %v3204_v18  ;;  %v8083_v6 = vld [vmem:[#allocation48_spill] sm:$0xff]  ;;  %v8089_v62 = vld [vmem:[#allocation211_spill] sm:$0xff]  ;;  %v3167_v17 = vmax.f32 %v2983_v20, 0.0  ;;  %v3164_v52 = vmax.f32 %v2980_v46, 0.0  ;;  %v8100_v20 = vld [vmem:[#allocation218_spill] sm:$0xff] }
 0x329   : > { %v6898_v31 = vpop.f32.mrf.mxu1  ;;  %3517 = vmatpush1.msra.mxu1 %v3206_v44  ;;  %3447 = vmatprep.subr.mxu0 %v3197_v10  ;;  %v2973_v4 = vadd.f32 %v8083_v6, %v8082_v49  ;;  %v8085_v18 = vld [vmem:[#allocation212_spill] sm:$0xff]  ;;  %v8086_v10 = vld [vmem:[#allocation58_spill] sm:$0xff]  ;;  %v8096_v57 = vld [vmem:[#allocation219_spill] sm:$0xff]  ;;  %v3166_v27 = vmax.f32 %v2982_v26, 0.0  ;;  %v3117_v30 = vmax.f32 %v8150_v50, 0.0  ;;  %v3118_v42 = vmax.f32 %v8157_v54, 0.0 }
 0x32a   : > { %3518 = vmatprep.subr.mxu1 %v3199_v29  ;;  %v6908_v23 = vpop.f32.mrf.mxu0  ;;  %3448 = vmatpush1.msra.mxu0 %v3196_v19  ;;  %v2975_v44 = vadd.f32 %v8085_v18, %v8084_v13  ;;  %v8087_v29 = vld [vmem:[#allocation47_spill] sm:$0xff]  ;;  %v2974_v19 = vadd.f32 %v8089_v62, %v8088_v58  ;;  %v8101_v63 = vld [vmem:[#allocation208_spill] sm:$0xff]  ;;  %v8104_v26 = vld [vmem:[#allocation217_spill] sm:$0xff] }
 0x32b   : > { %v6910_v12 = vpop.f32.mrf.mxu1  ;;  %3519 = vmatpush1.msra.mxu1 %v3198_v61  ;;  %3449 = vmatprep.subr.mxu0 %v3189_v7  ;;  %v2972_v28 = vadd.f32 %v8087_v29, %v8086_v10  ;;  %v3172_v61 = vmax.f32 %v2988_v8, 0.0  ;;  %v8091_v7 = vld [vmem:[#allocation46_spill] sm:$0xff]  ;;  %v2959_v41 = vadd.f32 %v8101_v63, %v8100_v20  ;;  %v3157_v15 = vmax.f32 %v2973_v4, 0.0  ;;  %v8103_v49 = vld [vmem:[#allocation43_spill] sm:$0xff]  ;;  %v8107_v58 = vld [vmem:[#allocation313_spill] sm:$0xff] }
 0x32c   : > { %3520 = vmatprep.subr.mxu1 %v3191_v16  ;;  %v6920_v48 = vpop.f32.mrf.mxu0  ;;  %3450 = vmatpush1.msra.mxu0 %v3188_v0  ;;  %v2965_v36 = vadd.f32 %v8091_v7, %v8090_v24  ;;  %v8093_v16 = vld [vmem:[#allocation210_spill] sm:$0xff]  ;;  %v8095_v0 = vld [vmem:[#allocation45_spill] sm:$0xff]  ;;  %v8105_v6 = vld [vmem:[#allocation207_spill] sm:$0xff] }
 0x32d   : > { %v6922_v45 = vpop.f32.mrf.mxu1  ;;  %3521 = vmatpush1.msra.mxu1 %v3190_v38  ;;  %3451 = vmatprep.subr.mxu0 %v3181_v37  ;;  %v2967_v22 = vadd.f32 %v8093_v16, %v8092_v5  ;;  %v2964_v8 = vadd.f32 %v8095_v0, %v8094_v43  ;;  %v8097_v38 = vld [vmem:[#allocation209_spill] sm:$0xff]  ;;  %v2958_v13 = vadd.f32 %v8105_v6, %v8104_v26  ;;  %v3156_v18 = vmax.f32 %v2972_v28, 0.0  ;;  %v8106_v29 = vld [vmem:[#allocation151_spill] sm:$0xff]  ;;  %v8109_v62 = vld [vmem:[#allocation314_spill] sm:$0xff] }
 0x32e   : > { %3522 = vmatprep.subr.mxu1 %v3183_v9  ;;  %v6932_v40 = vpop.f32.mrf.mxu0  ;;  %3452 = vmatpush1.msra.mxu0 %v3180_v32  ;;  %v2966_v47 = vadd.f32 %v8097_v38, %v8096_v57  ;;  %v8098_v9 = vld [vmem:[#allocation55_spill] sm:$0xff]  ;;  %v3159_v32 = vmax.f32 %v2975_v44, 0.0  ;;  %v6962_v4 = vadd.f32 %v8107_v58, %v8106_v29  ;;  %v8108_v44 = vld [vmem:[#allocation152_spill] sm:$0xff]  ;;  %v8110_v28 = vld [vmem:[#allocation153_spill] sm:$0xff]  ;;  %v3143_v20 = vmax.f32 %v2959_v41, 0.0 }
 0x32f   : > { %v6934_v11 = vpop.f32.mrf.mxu1  ;;  %3523 = vmatpush1.msra.mxu1 %v3182_v3  ;;  %3453 = vmatprep.subr.mxu0 %v3173_v25  ;;  %v2957_v53 = vadd.f32 %v8099_v33, %v8098_v9  ;;  %v8102_v3 = vld [vmem:[#allocation54_spill] sm:$0xff]  ;;  %v3158_v25 = vmax.f32 %v2974_v19, 0.0  ;;  %v3151_v24 = vmax.f32 %v2967_v22, 0.0  ;;  %v8111_v19 = vld [vmem:[#allocation315_spill] sm:$0xff]  ;;  %v8113_v16 = vld [vmem:[#allocation316_spill] sm:$0xff]  ;;  %v3142_v26 = vmax.f32 %v2958_v13, 0.0 }
 0x330   : > { %3524 = vmatprep.subr.mxu1 %v3175_v1  ;;  %v6944_v39 = vpop.f32.mrf.mxu0  ;;  %3454 = vmatpush1.msra.mxu0 %v3172_v61  ;;  %v2956_v46 = vadd.f32 %v8103_v49, %v8102_v3  ;;  %v6966_v61 = vadd.f32 %v8109_v62, %v8108_v44  ;;  %v6970_v7 = vadd.f32 %v8111_v19, %v8110_v28  ;;  %v8112_v5 = vld [vmem:[#allocation154_spill] sm:$0xff]  ;;  %v3150_v43 = vmax.f32 %v2966_v47, 0.0  ;;  %v8115_v22 = vld [vmem:[#allocation317_spill] sm:$0xff]  ;;  %v8119_v47 = vld [vmem:[#allocation319_spill] sm:$0xff] }
 0x331   : > { %v6946_v37 = vpop.f32.mrf.mxu1  ;;  %3525 = vmatpush1.msra.mxu1 %v3174_v55  ;;  %3455 = vmatprep.subr.mxu0 %v3165_v14  ;;  %v3149_v55 = vmax.f32 %v2965_v36, 0.0  ;;  %v6974_v14 = vadd.f32 %v8113_v16, %v8112_v5  ;;  %v8114_v36 = vld [vmem:[#allocation155_spill] sm:$0xff]  ;;  %v3141_v33 = vmax.f32 %v2957_v53, 0.0  ;;  %v8123_v29 = vld [vmem:[#allocation321_spill] sm:$0xff]  ;;  %v8124_v41 = vld [vmem:[#allocation160_spill] sm:$0xff] }
 0x332   : > { %3526 = vmatprep.subr.mxu1 %v3167_v17  ;;  %v6956_v1 = vpop.f32.mrf.mxu0  ;;  %3456 = vmatpush1.msra.mxu0 %v3164_v52  ;;  %v3148_v17 = vmax.f32 %v2964_v8, 0.0  ;;  %v6982_v38 = vadd.f32 %v8115_v22, %v8114_v36  ;;  %v8116_v52 = vld [vmem:[#allocation156_spill] sm:$0xff]  ;;  %v8118_v8 = vld [vmem:[#allocation157_spill] sm:$0xff]  ;;  %v3140_v49 = vmax.f32 %v2956_v46, 0.0  ;;  %v8125_v58 = vld [vmem:[#allocation322_spill] sm:$0xff] }
 0x333   : > { %v6958_v10 = vpop.f32.mrf.mxu1  ;;  %3527 = vmatpush1.msra.mxu1 %v3166_v27  ;;  %3457 = vmatprep.subr.mxu0 %v3157_v15  ;;  %v8117_v27 = vld [vmem:[#allocation318_spill] sm:$0xff]  ;;  %v6990_v63 = vadd.f32 %v8119_v47, %v8118_v8  ;;  %v7002_v44 = vadd.f32 %v8125_v58, %v8124_v41  ;;  %v8128_v46 = vld [vmem:[#allocation161_spill] sm:$0xff]  ;;  %v8129_v13 = vld [vmem:[#allocation324_spill] sm:$0xff] }
 0x334   : > { %3528 = vmatprep.subr.mxu1 %v3159_v32  ;;  %v6976_v0 = vpop.f32.mrf.mxu0  ;;  %3458 = vmatpush1.msra.mxu0 %v3156_v18  ;;  %v6986_v9 = vadd.f32 %v8117_v27, %v8116_v52  ;;  %v8120_v15 = vld [vmem:[#allocation158_spill] sm:$0xff]  ;;  %v8121_v32 = vld [vmem:[#allocation320_spill] sm:$0xff]  ;;  %v1886_v19 = vadd.f32 %v8129_v13, %v8128_v46  ;;  %v8131_v16 = vld [vmem:[#allocation325_spill] sm:$0xff] }
 0x335   : > { %v6978_v57 = vpop.f32.mrf.mxu1  ;;  %3529 = vmatpush1.msra.mxu1 %v3158_v25  ;;  %3459 = vmatprep.subr.mxu0 %v3149_v55  ;;  %v6994_v3 = vadd.f32 %v8121_v32, %v8120_v15  ;;  %v8122_v25 = vld [vmem:[#allocation159_spill] sm:$0xff]  ;;  %v8126_v62 = vld [vmem:[#allocation42_spill] sm:$0xff]  ;;  %v8133_v22 = vld [vmem:[#allocation205_spill] sm:$0xff] }
 0x336   : > { %3530 = vmatprep.subr.mxu1 %v3151_v24  ;;  %v2750_v6 = vpop.f32.mrf.mxu0  ;;  %3460 = vmatpush1.msra.mxu0 %v3148_v17  ;;  %v6998_v53 = vadd.f32 %v8123_v29, %v8122_v25  ;;  %v3133_v55 = vmax.f32 %v8126_v62, 0.0  ;;  %v8127_v24 = vld [vmem:[#allocation206_spill] sm:$0xff]  ;;  %v3134_v52 = vmax.f32 %v8133_v22, 0.0  ;;  %v8134_v47 = vld [vmem:[#allocation163_spill] sm:$0xff]  ;;  %v8136_v25 = vld [vmem:[#allocation164_spill] sm:$0xff] }
 0x337   : > { %v2901_v18 = vpop.f32.mrf.mxu1  ;;  %3531 = vmatpush1.msra.mxu1 %v3150_v43  ;;  %v3135_v28 = vmax.f32 %v8127_v24, 0.0  ;;  %3461 = vmatprep.subr.mxu0 %v3141_v33  ;;  %v8130_v5 = vld [vmem:[#allocation162_spill] sm:$0xff]  ;;  %v8132_v43 = vld [vmem:[#allocation41_spill] sm:$0xff]  ;;  %v8137_v33 = vld [vmem:[#allocation327_spill] sm:$0xff] }
 0x338   : > { %3532 = vmatprep.subr.mxu1 %v3143_v20  ;;  %v2037_v17 = vadd.f32 %v8131_v16, %v8130_v5  ;;  %v3132_v36 = vmax.f32 %v8132_v43, 0.0  ;;  %v2754_v27 = vpop.f32.mrf.mxu0  ;;  %3462 = vmatpush1.msra.mxu0 %v3140_v49  ;;  %v8135_v15 = vld [vmem:[#allocation326_spill] sm:$0xff]  ;;  %v2039_v20 = vadd.f32 %v8137_v33, %v8136_v25  ;;  %v8138_v29 = vld [vmem:[#allocation40_spill] sm:$0xff]  ;;  %v8140_v24 = vld [vmem:[#allocation165_spill] sm:$0xff] }
 0x339   : > { %v2905_v8 = vpop.f32.mrf.mxu1  ;;  %3533 = vmatpush1.msra.mxu1 %v3142_v26  ;;  %v1888_v32 = vadd.f32 %v8135_v15, %v8134_v47  ;;  %v3125_v41 = vmax.f32 %v8138_v29, 0.0  ;;  %v8139_v58 = vld [vmem:[#allocation204_spill] sm:$0xff]  ;;  %3463 = vmatprep.subr.mxu0 %v3133_v55  ;;  %v8142_v5 = vld [vmem:[#allocation166_spill] sm:$0xff]  ;;  %v8143_v16 = vld [vmem:[#allocation329_spill] sm:$0xff] }
 0x33a   : > { %v3127_v62 = vmax.f32 %v8139_v58, 0.0  ;;  %3534 = vmatprep.subr.mxu1 %v3135_v28  ;;  %v8141_v46 = vld [vmem:[#allocation328_spill] sm:$0xff]  ;;  %v2041_v43 = vadd.f32 %v8143_v16, %v8142_v5  ;;  %v8144_v49 = vld [vmem:[#allocation39_spill] sm:$0xff]  ;;  %v2756_v47 = vpop.f32.mrf.mxu0  ;;  %3464 = vmatpush1.msra.mxu0 %v3132_v36  ;;  %v8146_v25 = vld [vmem:[#allocation169_spill] sm:$0xff] }
 0x33b   : > { %v1890_v13 = vadd.f32 %v8141_v46, %v8140_v24  ;;  %v3124_v26 = vmax.f32 %v8144_v49, 0.0  ;;  %v8145_v22 = vld [vmem:[#allocation203_spill] sm:$0xff]  ;;  %v2907_v15 = vpop.f32.mrf.mxu1  ;;  %3535 = vmatpush1.msra.mxu1 %v3134_v52  ;;  %v8147_v33 = vld [vmem:[#allocation333_spill] sm:$0xff]  ;;  %v8148_v58 = vld [vmem:[#allocation170_spill] sm:$0xff]  ;;  %3465 = vmatprep.subr.mxu0 %v3125_v41 }
 0x33c   : > { %v3126_v35 = vmax.f32 %v8145_v22, 0.0  ;;  %v1896_v29 = vadd.f32 %v8147_v33, %v8146_v25  ;;  %v8149_v55 = vld [vmem:[#allocation334_spill] sm:$0xff]  ;;  %3536 = vmatprep.subr.mxu1 %v3127_v62  ;;  %v8152_v5 = vld [vmem:[#allocation167_spill] sm:$0xff]  ;;  %v8154_v22 = vld [vmem:[#allocation168_spill] sm:$0xff]  ;;  %v2758_v25 = vpop.f32.mrf.mxu0 }
 0x33d   : > { %v2047_v28 = vadd.f32 %v8149_v55, %v8148_v58  ;;  %v8151_v24 = vld [vmem:[#allocation202_spill] sm:$0xff]  ;;  %v8153_v16 = vld [vmem:[#allocation331_spill] sm:$0xff]  ;;  %v2045_v59 = vadd.f32 %v8155_v60, %v8154_v22  ;;  %v8156_v36 = vld [vmem:[#allocation37_spill] sm:$0xff]  ;;  %3466 = vmatpush1.msra.mxu0 %v3124_v26  ;;  %v2909_v33 = vpop.f32.mrf.mxu1 }
 0x33e   : > { %v3119_v46 = vmax.f32 %v8151_v24, 0.0  ;;  %v1894_v49 = vadd.f32 %v8153_v16, %v8152_v5  ;;  %v3116_v52 = vmax.f32 %v8156_v36, 0.0  ;;  %3537 = vmatpush1.msra.mxu1 %v3126_v35  ;;  %v8158_v58 = vld [vmem:[#allocation36_spill] sm:$0xff]  ;;  %v3093_v41 = vadd.f32 %v2756_v47, %v1896_v29  ;;  %3467 = vmatprep.subr.mxu0 %v3117_v30  ;;  %v8160_v5 = vld [vmem:[#allocation35_spill] sm:$0xff]  ;;  %v2759_v51 = vpop.f32.mrf.mxu0  ;;  %v8162_v35 = vld [vmem:[#allocation34_spill] sm:$0xff] }
 0x33f   : > { %v3109_v50 = vmax.f32 %v8158_v58, 0.0  ;;  %v8159_v55 = vld [vmem:[#allocation200_spill] sm:$0xff]  ;;  %v3095_v62 = vadd.f32 %v2907_v15, %v2047_v28  ;;  %v3108_v16 = vmax.f32 %v8160_v5, 0.0  ;;  %v8161_v34 = vld [vmem:[#allocation199_spill] sm:$0xff]  ;;  %v3094_v36 = vadd.f32 %v2905_v8, %v2045_v59  ;;  %v2910_v54 = vpop.f32.mrf.mxu1  ;;  %v8163_v25 = vld [vmem:[#allocation198_spill] sm:$0xff] }
 0x340   : > { %v3111_v24 = vmax.f32 %v8159_v55, 0.0  ;;  %3538 = vmatprep.subr.mxu1 %v3119_v46  ;;  %v3110_v60 = vmax.f32 %v8161_v34, 0.0  ;;  %v3092_v22 = vadd.f32 %v2754_v27, %v1894_v49  ;;  %3468 = vmatpush1.msra.mxu0 %v3116_v52  ;;  %v3101_v26 = vmax.f32 %v8162_v35, 0.0  ;;  %v8164_v30 = vld [vmem:[#allocation33_spill] sm:$0xff]  ;;  %v8171_v28 = vld [vmem:[#allocation232_spill] sm:$0xff]  ;;  %v8172_v49 = vld [vmem:[#allocation227_spill] sm:$0xff] }
 0x341   : > { %3539 = vmatpush1.msra.mxu1 %v3118_v42  ;;  %v3103_v33 = vmax.f32 %v8163_v25, 0.0  ;;  %v3085_v58 = vadd.f32 %v2750_v6, %v1890_v13  ;;  %v3087_v55 = vadd.f32 %v2901_v18, %v2041_v43  ;;  %3469 = vmatprep.subr.mxu0 %v3109_v50  ;;  %v3100_v47 = vmax.f32 %v8164_v30, 0.0  ;;  %v8165_v15 = vld [vmem:[#allocation197_spill] sm:$0xff]  ;;  %v8169_v43 = vld [vmem:[#allocation70_spill] sm:$0xff]  ;;  %v8175_v50 = vld [vmem:[#allocation231_spill] sm:$0xff] }
 0x342   : > { %3540 = vmatprep.subr.mxu1 %v3111_v24  ;;  %v3102_v29 = vmax.f32 %v8165_v15, 0.0  ;;  %v3084_v34 = vadd.f32 %v6976_v0, %v1888_v32  ;;  %v3086_v59 = vadd.f32 %v6978_v57, %v2039_v20  ;;  %3470 = vmatpush1.msra.mxu0 %v3108_v16  ;;  %v3077_v51 = vadd.f32 %v6956_v1, %v1886_v19  ;;  %v8168_v20 = vld [vmem:[#allocation228_spill] sm:$0xff]  ;;  %v8173_v52 = vld [vmem:[#allocation69_spill] sm:$0xff]  ;;  %v8176_v5 = vld [vmem:[#allocation226_spill] sm:$0xff] }
 0x343   : > { %3541 = vmatpush1.msra.mxu1 %v3110_v60  ;;  %v3079_v42 = vadd.f32 %v6958_v10, %v2037_v17  ;;  %v3277_v27 = vmax.f32 %v3093_v41, 0.0  ;;  %v3279_v8 = vmax.f32 %v3095_v62, 0.0  ;;  %3471 = vmatprep.subr.mxu0 %v3101_v26  ;;  %v3076_v6 = vadd.f32 %v6944_v39, %v6998_v53  ;;  %v8167_v17 = vld [vmem:[#allocation71_spill] sm:$0xff]  ;;  %v8177_v16 = vld [vmem:[#allocation68_spill] sm:$0xff] }
 0x344   : > { %3542 = vmatprep.subr.mxu1 %v3103_v33  ;;  %v3078_v18 = vadd.f32 %v6946_v37, %v7002_v44  ;;  %v3276_v13 = vmax.f32 %v3092_v22, 0.0  ;;  %v3278_v0 = vmax.f32 %v3094_v36, 0.0  ;;  %3472 = vmatpush1.msra.mxu0 %v3100_v47  ;;  %v3069_v57 = vadd.f32 %v6932_v40, %v6990_v63  ;;  %v8178_v22 = vld [vmem:[#allocation65_spill] sm:$0xff]  ;;  %v8179_v36 = vld [vmem:[#allocation230_spill] sm:$0xff] }
 0x345   : > { %3543 = vmatpush1.msra.mxu1 %v3102_v29  ;;  %v3071_v1 = vadd.f32 %v6934_v11, %v6994_v3  ;;  %v3269_v10 = vmax.f32 %v3085_v58, 0.0  ;;  %v3271_v19 = vmax.f32 %v3087_v55, 0.0  ;;  %3491 = vmatprep.subr.mxu0 %v3277_v27  ;;  %v3068_v39 = vadd.f32 %v6920_v48, %v6982_v38 }
 0x346   : > { %3562 = vmatprep.subr.mxu1 %v3279_v8  ;;  %v3070_v37 = vadd.f32 %v6922_v45, %v6986_v9  ;;  %v3268_v53 = vmax.f32 %v3084_v34, 0.0  ;;  %v3270_v44 = vmax.f32 %v3086_v59, 0.0  ;;  %3492 = vmatpush2.msra.mxu0 %v3276_v13  ;;  %v3061_v40 = vadd.f32 %v6908_v23, %v6970_v7  ;;  %v8166_v7 = vld [vmem:[#allocation229_spill] sm:$0xff]  ;;  %v4215_v13 = vld [vmem:[%s7168_s2 + $0x30] ss:$8 sps:$4 sm:$0xff]  }
 0x347   : > { %3563 = vmatpush2.msra.mxu1 %v3278_v0  ;;  %v3063_v11 = vadd.f32 %v6910_v12, %v6974_v14  ;;  %v3261_v63 = vmax.f32 %v3077_v51, 0.0  ;;  %v3263_v3 = vmax.f32 %v3079_v42, 0.0  ;;  %3493 = vmatprep.subr.mxu0 %v3269_v10  ;;  %v3060_v48 = vadd.f32 %v6896_v2, %v6962_v4  ;;  %v8170_v4 = vld [vmem:[#allocation67_spill] sm:$0xff]  ;;  %v4220_v0 = vld [vmem:[%s7168_s2 + $0x24] ss:$8 sps:$4 sm:$0xff]  }
 0x348   : > { %3564 = vmatprep.subr.mxu1 %v3271_v19  ;;  %v3062_v45 = vadd.f32 %v6898_v31, %v6966_v61  ;;  %v3260_v38 = vmax.f32 %v3076_v6, 0.0  ;;  %v3262_v9 = vmax.f32 %v3078_v18, 0.0  ;;  %3494 = vmatpush2.msra.mxu0 %v3268_v53  ;;  %v3053_v23 = vadd.f32 %v6884_v21, %v6852_v56  ;;  %v8174_v21 = vld [vmem:[#allocation66_spill] sm:$0xff]  ;;  %v4226_v19 = vld [vmem:[%s7168_s2 + $0x4] ss:$8 sps:$4 sm:$0xff]  }
 0x349   : > { %3565 = vmatpush2.msra.mxu1 %v3270_v44  ;;  %v3055_v12 = vadd.f32 %v8167_v17, %v8166_v7  ;;  %v3253_v14 = vmax.f32 %v3069_v57, 0.0  ;;  %v3255_v32 = vmax.f32 %v3071_v1, 0.0  ;;  %3495 = vmatprep.subr.mxu0 %v3261_v63  ;;  %v3052_v2 = vadd.f32 %v8169_v43, %v8168_v20  ;;  %v4217_v18 = vld [vmem:[%s7168_s2 + $0x34] ss:$8 sps:$4 sm:$0xff]   ;;  %v4218_v57 = vld [vmem:[%s7168_s2 + $0x20] ss:$8 sps:$4 sm:$0xff]  }
 0x34a   : > { %3566 = vmatprep.subr.mxu1 %v3263_v3  ;;  %v3054_v31 = vadd.f32 %v8171_v28, %v8170_v4  ;;  %v3252_v61 = vmax.f32 %v3068_v39, 0.0  ;;  %v3254_v46 = vmax.f32 %v3070_v37, 0.0  ;;  %3496 = vmatpush2.msra.mxu0 %v3260_v38  ;;  %v3045_v56 = vadd.f32 %v8173_v52, %v8172_v49  ;;  %v4223_v1 = vld [vmem:[%s7168_s2 + $0x14] ss:$8 sps:$4 sm:$0xff]   ;;  %v4221_v10 = vld [vmem:[%s7168_s2 + $0x10] ss:$8 sps:$4 sm:$0xff]  }
 0x34b   : > { %3567 = vmatpush2.msra.mxu1 %v3262_v9  ;;  %v3047_v24 = vadd.f32 %v8175_v50, %v8174_v21  ;;  %v3245_v41 = vmax.f32 %v3061_v40, 0.0  ;;  %v3247_v62 = vmax.f32 %v3063_v11, 0.0  ;;  %3497 = vmatprep.subr.mxu0 %v3253_v14  ;;  %v3044_v60 = vadd.f32 %v8177_v16, %v8176_v5  ;;  %v4224_v39 = vld [vmem:[%s7168_s2] ss:$8 sps:$4 sm:$0xff]  }
 0x34c   : > { %3568 = vmatprep.subr.mxu1 %v3255_v32  ;;  %v3046_v54 = vadd.f32 %v8179_v36, %v8178_v22  ;;  %v3244_v35 = vmax.f32 %v3060_v48, 0.0  ;;  %v3246_v26 = vmax.f32 %v3062_v45, 0.0  ;;  %3498 = vmatpush2.msra.mxu0 %v3252_v61  ;;  %v3237_v25 = vmax.f32 %v3053_v23, 0.0  ;;  %v8183_v21 = vld [vmem:[#allocation312_spill] sm:$0xff] }
 0x34d   : > { %3569 = vmatpush2.msra.mxu1 %v3254_v46  ;;  %v3239_v33 = vmax.f32 %v3055_v12, 0.0  ;;  %3499 = vmatprep.subr.mxu0 %v3245_v41  ;;  %v3236_v58 = vmax.f32 %v3052_v2, 0.0  ;;  %v3238_v55 = vmax.f32 %v3054_v31, 0.0  ;;  %v3229_v30 = vmax.f32 %v3045_v56, 0.0 }
 0x34e   : > { %3570 = vmatprep.subr.mxu1 %v3247_v62  ;;  %3500 = vmatpush2.msra.mxu0 %v3244_v35  ;;  %v3231_v47 = vmax.f32 %v3047_v24, 0.0  ;;  %v3228_v15 = vmax.f32 %v3044_v60, 0.0  ;;  %v3230_v29 = vmax.f32 %v3046_v54, 0.0  ;;  %v8180_v34 = vmov 0.00390625   ;;  %v3639_v24 = vld [vmem:[%s7169_s3] sm:$0x3] }
 0x34f   : > { %3571 = vmatpush2.msra.mxu1 %v3246_v26  ;;  %3501 = vmatprep.subr.mxu0 %v3237_v25  ;;  %v8182_v51 = vmov 0   ;;  %v3643_v50 = vsub.s32 0, %v8183_v21  ;;  %v3647_v41 = vsub.s32 1, %v8183_v21 }
 0x350   : > { %3572 = vmatprep.subr.mxu1 %v3239_v33  ;;  %3502 = vmatpush2.msra.mxu0 %v3236_v58 }
 0x351   : > { %3573 = vmatpush2.msra.mxu1 %v3238_v55  ;;  %3503 = vmatprep.subr.mxu0 %v3229_v30  ;;  %v3644_v62 = vrot.slane %v3639_v24, %v3643_v50  ;;  %v3648_v5 = vrot.slane %v3639_v24, %v3647_v41 }
 0x352   : > { %3574 = vmatprep.subr.mxu1 %v3231_v47  ;;  %3504 = vmatpush2.msra.mxu0 %v3228_v15 }
 0x353   : > { %3575 = vmatpush2.msra.mxu1 %v3230_v29  ;;  %4103 = vmatmul.mubr.msk.f32.vlgmr.msra.gmra.mxu0 %vm5814_vm8, %v8180_v34 }
 0x354   : > { %4105 = vmatmul.mubr.msk.f32.vlgmr.msra.gmra.mxu1 %vm5814_vm8, %v8180_v34  ;;  %3727 = vmatprep.mubr.bf16.mxu0 %v8182_v51 }
 0x355   : > { %3703 = vmatprep.subr.bf16.mxu0 %v4217_v18 }
 0x356   : > { %3704 = vmatpush1.bf16.msra.mxu0 %v4215_v13 }
 0x357   : > { %3705 = vmatprep.subr.bf16.mxu0 %v4220_v0 }
 0x35a   : > { %3706 = vmatpush1.bf16.msra.mxu0 %v4218_v57 }
 0x35b   : > { %3707 = vmatprep.subr.bf16.mxu0 %v4223_v1 }
 0x35e   : > { %3708 = vmatpush1.bf16.msra.mxu0 %v4221_v10 }
 0x35f   : > { %3709 = vmatprep.subr.bf16.mxu0 %v4226_v19 }
 0x362   : > { %3710 = vmatpush1.bf16.msra.mxu0 %v4224_v39 }
 0x3b4   : > { %v3436_v27 = vpop.f32.mrf.mxu1 }
 0x3b5   : > { %v3365_v42 = vpop.f32.mrf.mxu0  ;;  %3596 = vrot.lane.b32.xlu1 %v3436_v27, %s4336_s14 }
 0x3b6   : > { %3584 = vrot.lane.b32.xlu0 %v3365_v42, %s4336_s14  ;;  %v3438_v6 = vpop.f32.mrf.mxu1 }
 0x3b7   : > { %v3367_v8 = vpop.f32.mrf.mxu0 }
 0x3b9   : > { %3602 = vrot.lane.b32.xlu1 %v3438_v6, %s4336_s14 }
 0x3ba   : > { %3590 = vrot.lane.b32.xlu0 %v3367_v8, %s4336_s14 }
 0x413   : > { %v3507_v37 = vpop.f32.mrf.mxu0 }
 0x414   : > { %v3578_v53 = vpop.f32.mrf.mxu1  ;;  %3608 = vrot.lane.b32.xlu0 %v3507_v37, %s4336_s14 }
 0x415   : > { %v3509_v44 = vpop.f32.mrf.mxu0 }
 0x416   : > { %3614 = vrot.lane.b32.xlu1 %v3509_v44, %s4336_s14  ;;  %v3580_v40 = vpop.f32.mrf.mxu1 }
 0x418   : > { %3620 = vrot.lane.b32.xlu0 %v3578_v53, %s4336_s14 }
 0x41a   : > { %3626 = vrot.lane.b32.xlu1 %v3580_v40, %s4336_s14  ;;  %s204_s14 = sand.u32 1, %s4320_s16  }
 0x41b   : > { %s3830_s20 = sshll.u32 %s204_s14, 4  ;;  %s3739_s19 = scalar_lea.sflag [#allocation4], %s204_s14 }
 0x41c   : > { %s206_s28 = scalar_lea.vmem [#allocation5], %s3830_s20 }
 0x41d   : > { %s3753_s29 = sshll.u32 %s206_s28, 4  ;;  %s7127_s29 = int_to_ptr.vmem [resolvable:$true] %s3753_s29 }
 0x41e   : > { %s4264_s7 = scalar_lea.vmem %s7127_s29, 256  ;;  %p4271_p11 = scmp.lt.s32.totalorder %s7127_s29, %s4269_s9 }
 0x41f   : > { %p4265_p8 = scmp.ne.s32.totalorder %s7127_s29, %s4264_s7  ;;  %p4272_p12 = scmp.lt.s32.totalorder %s4270_s10, %s4264_s7 }
 0x421   : > { %p4266_p9 = pnand %p4265_p8, %p4401_p5  ;;  %p4273_p13 = por %p4272_p12, %p4271_p11 }
 0x423   : > { %p4267_p10 = pneg %p4266_p9 }
 0x425   : > { %p4274_p0 = pnand %p4273_p13, %p4267_p10 }
 0x427   : > { %v3597_v9 = vpop.permute.xlu1 %3596 }
 0x428   : > { %v3585_v11 = vpop.permute.xlu0 %3584 }
 0x429   : > { %v3587_v63 = vadd.f32 %v3585_v11, %v3365_v42 }
 0x42b   : > { %v3588_v3 = vadd.f32 %v3587_v63, %v3367_v8  ;;  %v3603_v17 = vpop.permute.xlu1 %3602 }
 0x42c   : > { %v3591_v48 = vpop.permute.xlu0 %3590 }
 0x42d   : > { %v3593_v45 = vadd.f32 %v3591_v48, %v3588_v3 }
 0x42f   : > { %v3594_v38 = vadd.f32 %v3593_v45, %v3436_v27 }
 0x431   : > { %v3599_v23 = vadd.f32 %v3597_v9, %v3594_v38 }
 0x433   : > { %v3600_v7 = vadd.f32 %v3599_v23, %v3438_v6 }
 0x435   : > { %v3605_v12 = vadd.f32 %v3603_v17, %v3600_v7 }
 0x437   : > { %v3606_v14 = vadd.f32 %v3605_v12, %v3507_v37 }
 0x486   : > { %v3609_v32 = vpop.permute.xlu0 %3608 }
 0x487   : > { %v3611_v20 = vadd.f32 %v3609_v32, %v3606_v14 }
 0x488   : > { %v3615_v2 = vpop.permute.xlu1 %3614 }
 0x489   : > { %v3612_v43 = vadd.f32 %v3611_v20, %v3509_v44 }
 0x48a   : > { %v3621_v28 = vpop.permute.xlu0 %3620 }
 0x48b   : > { %v3617_v4 = vadd.f32 %v3615_v2, %v3612_v43 }
 0x48c   : > { %v3627_v49 = vpop.permute.xlu1 %3626 }
 0x48d   : > { %v3618_v31 = vadd.f32 %v3617_v4, %v3578_v53 }
 0x48f   : > { %v3623_v61 = vadd.f32 %v3621_v28, %v3618_v31 }
 0x491   : > { %v3624_v46 = vadd.f32 %v3623_v61, %v3580_v40 }
 0x493   : > { %v3629_v52 = vadd.f32 %v3627_v49, %v3624_v46 }
 0x495   : > { %v3630_v56 = vpack.c.bf16 %v3629_v52, %v3629_v52 }
 0x497   : > { %4114 = vmatmul.mubr.msk.bf16.vlgmr.msra.gmra.mxu0 %vm3691_vm11, %v3630_v56 }
 0x557   : > { %v3729_v16 = vpop.f32.mrf.mxu0 }
 0x558   : > { %v3730_v60 = vadd.f32 %v3729_v16, %v3644_v62 }
 0x559   : > { %v3731_v22 = vpop.f32.mrf.mxu0 }
 0x55a   : > { %3736 = vst [vmem:[%s206_s28] sm:$0xff] %v3730_v60  ;;  %v3732_v36 = vadd.f32 %v3731_v22, %v3648_v5 }
 0x55b   : > { %v3733_v54 = vpop.f32.mrf.mxu0 }
 0x55c   : > { %3737 = vst [vmem:[%s206_s28 + $0x8] sm:$0xff] %v3732_v36 }
 0x55d   : > { %v3734_v35 = vpop.f32.mrf.mxu0 }
 0x55e   : > { %4277 = shalt.err (!%p4274_p0)
}
 0x55f   : > { %s4278_s11 = scalar_lea.hbm %s7125_s6, 256  ;;  %s4282_s14 = scalar_lea.hbm %s7170_s4, 512 }
 0x560   : > { %p4279_p1 = scmp.ne.s32.totalorder %s7125_s6, %s4278_s11  ;;  %p4283_p4 = scmp.lt.s32.totalorder %s7125_s6, %s7170_s4 }
 0x561   : > { %p4284_p7 = scmp.lt.s32.totalorder %s4282_s14, %s4278_s11 }
 0x562   : > { %p4280_p2 = pnand %p4279_p1, %p4401_p5 }
 0x563   : > { %p4285_p6 = por %p4284_p7, %p4283_p4 }
 0x564   : > { %p4281_p3 = pneg %p4280_p2 }
 0x566   : > { %p4286_p8 = pnand %p4285_p6, %p4281_p3 }
 0x568   : > { %4289 = shalt.err (!%p4286_p8)
}
 0x569   : > { %4125 = dma.vmem_to_hbm [thread:$0]  (%p4401_p5), %s7127_s29, 256, %s7125_s6, %s3739_s19  }
 0x56a PF: > { %p4137_p9 = scmp.ge.s32.totalorder %s4328_s18, 2  ;;  %s3765_s23 = sand.u32 1, %s4316_s15  }
 0x56b   : > { %p8184_p10 = scmp.ne.s32.totalorder %s7186_s26, 0  ;;  %s3766_s27 = scalar_lea.sflag [#allocation4], %s3765_s23 }
 0x56d   : > { %p4132_p11 = pnand %p4137_p9, %p8184_p10 }
 0x56f   : > { %p4133_p12 = pneg %p4132_p11 }
 0x571   : > { %4311 = dma.done.wait (%p4133_p12), %s3766_s27, 256  }
 0x572   : > { %4313 = vsyncadd (%p4133_p12), %s3766_s27, 4294967040  ;;  %p15_p13 = scmp.ge.s32.totalorder %s4388_s21, 4   ;;  %s8185_s15 = smov %s4320_s16 }
 0x573   : > { %s8186_s16 = smov %s4324_s17  ;;  %s8187_s17 = smov %s4399_s24 }
 0x574   : > { %s8188_s18 = smov %s4388_s21  ;;  %17 = sbr.rel (!%p15_p13) target bundleno = 4 (0x4), region = 78 }
 0x579   :  { %3771 = vsyncpa [#allocation3], 1 }
 0x57a   :  { %3773 = vsyncpa [#allocation3 + $0x1], 1 }
 0x57b   :  { %3774 = vsyncpa [#allocation4], 1 }
 0x57c   :  { %3776 = vsyncpa [#allocation4 + $0x1], 1 }

</bundles_post_ra>
